<compile_context>
chip_gen: v6e
topology: v6e:2x2x1
jax: 0.10.0
libtpu: 0.0.40
codegen_flags: <defaults>
</compile_context>

<pallas_src>
import jax
import jax.numpy as jnp
import numpy as np
from jax.experimental import pallas as pl
from jax.experimental.pallas import tpu as pltpu


def _make_epg_kernel(n_states, lane_width, chunk, unroll):
    L = lane_width

    def kernel(trig_ref, prm_ref, out_ref,
               fp_re_s, fp_im_s, fm_re_s, fm_im_s, z_re_s, z_im_s):
        c = pl.program_id(0)
        base = c * chunk

        # ---- loop-invariant vregs, hoisted out of the pulse loop ----
        lane = jax.lax.broadcasted_iota(jnp.int32, (1, L), 1)
        mask_fp = (lane != 0).astype(jnp.float32)               # zero lane 0
        mask_fm = (lane != (n_states - 1)).astype(jnp.float32)  # zero lane n-1

        e2c = jnp.full((1, L), prm_ref[0], jnp.float32)    # E2*cos(phi_b0)
        e2s = jnp.full((1, L), prm_ref[1], jnp.float32)    # E2*sin(phi_b0)
        ne2s = jnp.full((1, L), -prm_ref[1], jnp.float32)  # -E2*sin(phi_b0)
        e1v = jnp.full((1, L), prm_ref[2], jnp.float32)    # E1
        recv = jnp.full((1, L), prm_ref[3], jnp.float32)   # 1 - E1

        # ---- first grid step: initialize the carried EPG state ----
        @pl.when(c == 0)
        def _():
            zeros = jnp.zeros((1, L), jnp.float32)
            fp_re_s[...] = zeros
            fp_im_s[...] = zeros
            fm_re_s[...] = zeros
            fm_im_s[...] = zeros
            z_re_s[...] = (lane == 0).astype(jnp.float32)   # Z[0] = 1
            z_im_s[...] = zeros

        def cmul(ar, ai, br, bi):
            # (ar + i*ai) * (br + i*bi)
            return ar * br - ai * bi, ar * bi + ai * br

        def cmul_cj(ar, ai, br, bi):
            # conj(ar + i*ai) * (br + i*bi)
            return ar * br + ai * bi, ar * bi - ai * br

        def body(j, carry):
            Fp_re, Fp_im, Fm_re, Fm_im, Z_re, Z_im = carry
            i = base + j

            # Precomputed per-pulse trig (scalar SMEM reads; no EUP on chain).
            ca2 = trig_ref[0, i]
            sa2 = trig_ref[1, i]
            casa = trig_ref[2, i]
            cb = trig_ref[3, i]
            sb = trig_ref[4, i]
            c2b = trig_ref[5, i]
            s2b = trig_ref[6, i]
            nsb = -sb
            ns2b = -s2b

            # ---- relax + B0 precession fused: F *= E2 * e^{±i*phi} ----
            Fp_re, Fp_im = cmul(Fp_re, Fp_im, e2c, e2s)
            Fm_re, Fm_im = cmul(Fm_re, Fm_im, e2c, ne2s)
            Z_re = e1v * Z_re + recv
            Z_im = e1v * Z_im

            # ---- RF pulse ----
            # Fp_new = ca2*Fp + sa2*conj(Fm)*e^{2ib} + i*casa*(Z*e^{ib})
            t2r, t2i = cmul_cj(Fm_re, Fm_im, c2b, s2b)
            zr, zi = cmul(Z_re, Z_im, cb, sb)
            Fp_nr = ca2 * Fp_re + sa2 * t2r - casa * zi
            Fp_ni = ca2 * Fp_im + sa2 * t2i + casa * zr

            # Fm_new = sa2*conj(Fp)*e^{-2ib} + ca2*Fm - i*casa*(Z*e^{-ib})
            u1r, u1i = cmul_cj(Fp_re, Fp_im, c2b, ns2b)
            wr, wi = cmul(Z_re, Z_im, cb, nsb)
            Fm_nr = sa2 * u1r + ca2 * Fm_re + casa * wi
            Fm_ni = sa2 * u1i + ca2 * Fm_im - casa * wr

            # Z_new = -i*casa*(Fp*e^{-ib} - Fm*e^{ib}) + (ca2 - sa2)*Z
            ar_, ai_ = cmul(Fp_re, Fp_im, cb, nsb)
            br_, bi_ = cmul(Fm_re, Fm_im, cb, sb)
            c2a = ca2 - sa2
            Z_nr = casa * (ai_ - bi_) + c2a * Z_re
            Z_ni = -casa * (ar_ - br_) + c2a * Z_im

            # ---- EPG shift: XLU roll + hoisted 0/1 mask multiply ----
            Fp_re = pltpu.roll(Fp_nr, 1, axis=1) * mask_fp
            Fp_im = pltpu.roll(Fp_ni, 1, axis=1) * mask_fp
            Fm_re = pltpu.roll(Fm_nr, L - 1, axis=1) * mask_fm
            Fm_im = pltpu.roll(Fm_ni, L - 1, axis=1) * mask_fm
            Z_re = Z_nr
            Z_im = Z_ni

            # ---- record state after pulse i: six lane-aligned stores ----
            out_ref[pl.ds(j, 1), 0 * L:1 * L] = Fp_re
            out_ref[pl.ds(j, 1), 1 * L:2 * L] = Fp_im
            out_ref[pl.ds(j, 1), 2 * L:3 * L] = Fm_re
            out_ref[pl.ds(j, 1), 3 * L:4 * L] = Fm_im
            out_ref[pl.ds(j, 1), 4 * L:5 * L] = Z_re
            out_ref[pl.ds(j, 1), 5 * L:6 * L] = Z_im

            return (Fp_re, Fp_im, Fm_re, Fm_im, Z_re, Z_im)

        init = (fp_re_s[...], fp_im_s[...], fm_re_s[...], fm_im_s[...],
                z_re_s[...], z_im_s[...])
        final = jax.lax.fori_loop(0, chunk, body, init, unroll=unroll)
        (fp_re_s[...], fp_im_s[...], fm_re_s[...], fm_im_s[...],
         z_re_s[...], z_im_s[...]) = final

    return kernel


def epg_simulation(flip_angles, phases, T1, T2, TR, TE, B0=0.0, B1=1.0,
                   n_states=21):
    """Returns list of (Fp, Fm, Z) complex64 (n_states,) tuples, one per pulse."""
    del TE  # unused by the reference forward pass as well
    N = int(flip_angles.shape[0])
    L = ((n_states + 127) // 128) * 128   # lane-padded state width

    # Pulse-chunk tiling of the history output.
    MAX_CHUNK = 256
    if N <= MAX_CHUNK:
        chunk = ((N + 7) // 8) * 8        # sublane-aligned block rows
    else:
        chunk = MAX_CHUNK
    n_chunks = -(-N // chunk)
    N_pad = n_chunks * chunk
    unroll = min(chunk, 8)

    # Host/XLA-side precompute (vectorized over N, off the serial kernel path).
    E1 = float(np.exp(-TR / T1))
    E2 = float(np.exp(-TR / T2))
    phi_b0 = float(2.0 * np.pi * B0 * TR / 1000.0)
    params = jnp.array([E2 * np.cos(phi_b0), E2 * np.sin(phi_b0),
                        E1, 1.0 - E1], dtype=jnp.float32)

    alpha = flip_angles.astype(jnp.float32) * jnp.float32(B1)
    beta = phases.astype(jnp.float32)
    pad = N_pad - N
    if pad:
        # alpha=0, beta=0 padding: identity RF pulses, outputs discarded.
        alpha = jnp.concatenate([alpha, jnp.zeros((pad,), jnp.float32)])
        beta = jnp.concatenate([beta, jnp.zeros((pad,), jnp.float32)])
    ca = jnp.cos(0.5 * alpha)
    sa = jnp.sin(0.5 * alpha)
    trig = jnp.stack(
        [ca * ca, sa * sa, ca * sa,
         jnp.cos(beta), jnp.sin(beta),
         jnp.cos(2.0 * beta), jnp.sin(2.0 * beta)], axis=0)   # (7, N_pad) f32

    smem = pl.BlockSpec(memory_space=pltpu.MemorySpace.SMEM)

    out = pl.pallas_call(
        _make_epg_kernel(n_states, L, chunk, unroll),
        out_shape=jax.ShapeDtypeStruct((N_pad, 6 * L), jnp.float32),
        grid=(n_chunks,),
        in_specs=[smem, smem],
        out_specs=pl.BlockSpec((chunk, 6 * L), lambda c: (c, 0)),
        scratch_shapes=[pltpu.VMEM((1, L), jnp.float32)] * 6,
        compiler_params=pltpu.CompilerParams(
            dimension_semantics=("arbitrary",)),
    )(trig, params)

    out = out[:N].reshape(N, 6, L)[:, :, :n_states]
    Fp = out[:, 0] + 1j * out[:, 1]
    Fm = out[:, 2] + 1j * out[:, 3]
    Z = out[:, 4] + 1j * out[:, 5]
    return [(Fp[i], Fm[i], Z[i]) for i in range(N)]


def _epg_reference_numpy(flip_angles, phases, T1, T2, TR, TE, B0, B1, n_states):
    Fp = np.zeros(n_states, dtype=np.complex128)
    Fm = np.zeros(n_states, dtype=np.complex128)
    Z = np.zeros(n_states, dtype=np.complex128)
    Z[0] = 1.0
    E1 = np.exp(-TR / T1)
    E2 = np.exp(-TR / T2)
    phi = 2.0 * np.pi * B0 * TR / 1000.0
    states = []
    for i in range(len(flip_angles)):
        Fp = E2 * Fp
        Fm = E2 * Fm
        Z = E1 * Z + (1.0 - E1)
        Fp = Fp * np.exp(1j * phi)
        Fm = Fm * np.exp(-1j * phi)
        alpha = flip_angles[i] * B1
        beta = phases[i]
        ca = np.cos(alpha / 2)
        sa = np.sin(alpha / 2)
        eib = np.exp(1j * beta)
        emib = np.exp(-1j * beta)
        Fp_n = ca**2 * Fp + sa**2 * np.conj(Fm) * eib**2 + 1j * ca * sa * (Z * eib)
        Fm_n = sa**2 * np.conj(Fp) * emib**2 + ca**2 * Fm - 1j * ca * sa * (Z * emib)
        Z_n = -1j * sa * ca * (Fp * emib - Fm * eib) + (ca**2 - sa**2) * Z
        Fp, Fm, Z = Fp_n, Fm_n, Z_n
        Fp = np.roll(Fp, 1)
        Fm = np.roll(Fm, -1)
        Fp[0] = 0
        Fm[-1] = 0
        states.append((Fp.copy(), Fm.copy(), Z.copy()))
    return states


if __name__ == "__main__":
    N = 8
    n_states = 21
    key = jax.random.PRNGKey(0)
    k1, k2 = jax.random.split(key)
    flip_angles = jax.random.uniform(k1, (N,), minval=0.1, maxval=np.pi,
                                     dtype=jnp.float32)
    phases = jax.random.uniform(k2, (N,), minval=-np.pi, maxval=np.pi,
                                dtype=jnp.float32)
    T1, T2, TR, TE = 1000.0, 80.0, 500.0, 20.0
    B0, B1 = 5.0, 0.95

    states = epg_simulation(flip_angles, phases, T1, T2, TR, TE, B0=B0, B1=B1,
                            n_states=n_states)
    jax.block_until_ready(states)

    ref = _epg_reference_numpy(np.asarray(flip_angles, dtype=np.float64),
                               np.asarray(phases, dtype=np.float64),
                               T1, T2, TR, TE, B0, B1, n_states)
    for i in range(N):
        for got, want in zip(states[i], ref[i]):
            np.testing.assert_allclose(np.asarray(got), want,
                                       rtol=1e-4, atol=1e-5)

    print("KERNEL_OK")
</pallas_src>

<mosaic_0001>
module attributes {stable_mosaic.version = 11 : i64} {
  func.func @kernel(%arg0: i32, %arg1: memref<7x8xf32, #tpu.memory_space<smem>>, %arg2: memref<4xf32, #tpu.memory_space<smem>>, %arg3: memref<8x768xf32, #tpu.memory_space<vmem>>, %arg4: memref<1x128xf32, #tpu.memory_space<vmem>>, %arg5: memref<1x128xf32, #tpu.memory_space<vmem>>, %arg6: memref<1x128xf32, #tpu.memory_space<vmem>>, %arg7: memref<1x128xf32, #tpu.memory_space<vmem>>, %arg8: memref<1x128xf32, #tpu.memory_space<vmem>>, %arg9: memref<1x128xf32, #tpu.memory_space<vmem>>) attributes {dimension_semantics = [#tpu.dimension_semantics<arbitrary>], iteration_bounds = array<i64: 1>, scalar_prefetch = 0 : i64, scratch_operands = 6 : i64, tpu.core_type = #tpu.core_type<tc>, window_params = [{transform_indices = @transform_0, window_bounds = array<i64: 7, 8>}, {transform_indices = @transform_1, window_bounds = array<i64: 4>}, {transform_indices = @transform_2, window_bounds = array<i64: 8, 768>}]} {
    %c8_i32 = arith.constant 8 : i32
    %0 = arith.muli %arg0, %c8_i32 : i32
    %1 = tpu.iota {dimensions = array<i32: 1>} : vector<1x128xi32>
    %c0_i32 = arith.constant 0 : i32
    %2 = vector.broadcast %c0_i32 : i32 to vector<1x128xi32>
    %3 = arith.cmpi ne, %1, %2 : vector<1x128xi32>
    %4 = arith.extui %3 : vector<1x128xi1> to vector<1x128xi32>
    %5 = arith.sitofp %4 : vector<1x128xi32> to vector<1x128xf32>
    %c20_i32 = arith.constant 20 : i32
    %6 = vector.broadcast %c20_i32 : i32 to vector<1x128xi32>
    %7 = arith.cmpi ne, %1, %6 : vector<1x128xi32>
    %8 = arith.extui %7 : vector<1x128xi1> to vector<1x128xi32>
    %9 = arith.sitofp %8 : vector<1x128xi32> to vector<1x128xf32>
    %c0 = arith.constant 0 : index
    %10 = memref.load %arg2[%c0] : memref<4xf32, #tpu.memory_space<smem>>
    %11 = vector.broadcast %10 : f32 to vector<1x128xf32>
    %c1 = arith.constant 1 : index
    %12 = memref.load %arg2[%c1] : memref<4xf32, #tpu.memory_space<smem>>
    %13 = vector.broadcast %12 : f32 to vector<1x128xf32>
    %c1_0 = arith.constant 1 : index
    %14 = memref.load %arg2[%c1_0] : memref<4xf32, #tpu.memory_space<smem>>
    %cst = arith.constant 0.000000e+00 : f32
    %15 = arith.subf %cst, %14 : f32
    %16 = vector.broadcast %15 : f32 to vector<1x128xf32>
    %c2 = arith.constant 2 : index
    %17 = memref.load %arg2[%c2] : memref<4xf32, #tpu.memory_space<smem>>
    %18 = vector.broadcast %17 : f32 to vector<1x128xf32>
    %c3 = arith.constant 3 : index
    %19 = memref.load %arg2[%c3] : memref<4xf32, #tpu.memory_space<smem>>
    %20 = vector.broadcast %19 : f32 to vector<1x128xf32>
    %c0_i32_1 = arith.constant 0 : i32
    %21 = arith.cmpi eq, %arg0, %c0_i32_1 : i32
    %22 = arith.extui %21 : i1 to i32
    %c0_i32_2 = arith.constant 0 : i32
    %23 = arith.cmpi ne, %22, %c0_i32_2 : i32
    scf.if %23 {
      %cst_180 = arith.constant 0.000000e+00 : f32
      %1300 = vector.broadcast %cst_180 : f32 to vector<1x128xf32>
      %c0_181 = arith.constant 0 : index
      %c0_182 = arith.constant 0 : index
      %1301 = vector.load %arg4[%c0_181, %c0_182] : memref<1x128xf32, #tpu.memory_space<vmem>>, vector<1x128xf32>
      tpu.vector_store %arg4[%c0_181, %c0_182], %1300 {strides = array<i32>} : memref<1x128xf32, #tpu.memory_space<vmem>>, vector<1x128xf32>,
      %c0_183 = arith.constant 0 : index
      %c0_184 = arith.constant 0 : index
      %1302 = vector.load %arg5[%c0_183, %c0_184] : memref<1x128xf32, #tpu.memory_space<vmem>>, vector<1x128xf32>
      tpu.vector_store %arg5[%c0_183, %c0_184], %1300 {strides = array<i32>} : memref<1x128xf32, #tpu.memory_space<vmem>>, vector<1x128xf32>,
      %c0_185 = arith.constant 0 : index
      %c0_186 = arith.constant 0 : index
      %1303 = vector.load %arg6[%c0_185, %c0_186] : memref<1x128xf32, #tpu.memory_space<vmem>>, vector<1x128xf32>
      tpu.vector_store %arg6[%c0_185, %c0_186], %1300 {strides = array<i32>} : memref<1x128xf32, #tpu.memory_space<vmem>>, vector<1x128xf32>,
      %c0_187 = arith.constant 0 : index
      %c0_188 = arith.constant 0 : index
      %1304 = vector.load %arg7[%c0_187, %c0_188] : memref<1x128xf32, #tpu.memory_space<vmem>>, vector<1x128xf32>
      tpu.vector_store %arg7[%c0_187, %c0_188], %1300 {strides = array<i32>} : memref<1x128xf32, #tpu.memory_space<vmem>>, vector<1x128xf32>,
      %c0_i32_189 = arith.constant 0 : i32
      %1305 = vector.broadcast %c0_i32_189 : i32 to vector<1x128xi32>
      %1306 = arith.cmpi eq, %1, %1305 : vector<1x128xi32>
      %1307 = arith.extui %1306 : vector<1x128xi1> to vector<1x128xi32>
      %1308 = arith.sitofp %1307 : vector<1x128xi32> to vector<1x128xf32>
      %c0_190 = arith.constant 0 : index
      %c0_191 = arith.constant 0 : index
      %1309 = vector.load %arg8[%c0_190, %c0_191] : memref<1x128xf32, #tpu.memory_space<vmem>>, vector<1x128xf32>
      tpu.vector_store %arg8[%c0_190, %c0_191], %1308 {strides = array<i32>} : memref<1x128xf32, #tpu.memory_space<vmem>>, vector<1x128xf32>,
      %c0_192 = arith.constant 0 : index
      %c0_193 = arith.constant 0 : index
      %1310 = vector.load %arg9[%c0_192, %c0_193] : memref<1x128xf32, #tpu.memory_space<vmem>>, vector<1x128xf32>
      tpu.vector_store %arg9[%c0_192, %c0_193], %1300 {strides = array<i32>} : memref<1x128xf32, #tpu.memory_space<vmem>>, vector<1x128xf32>,
    } else {
    }
    %c0_3 = arith.constant 0 : index
    %c0_4 = arith.constant 0 : index
    %24 = vector.load %arg4[%c0_3, %c0_4] : memref<1x128xf32, #tpu.memory_space<vmem>>, vector<1x128xf32>
    %c0_5 = arith.constant 0 : index
    %c0_6 = arith.constant 0 : index
    %25 = vector.load %arg5[%c0_5, %c0_6] : memref<1x128xf32, #tpu.memory_space<vmem>>, vector<1x128xf32>
    %c0_7 = arith.constant 0 : index
    %c0_8 = arith.constant 0 : index
    %26 = vector.load %arg6[%c0_7, %c0_8] : memref<1x128xf32, #tpu.memory_space<vmem>>, vector<1x128xf32>
    %c0_9 = arith.constant 0 : index
    %c0_10 = arith.constant 0 : index
    %27 = vector.load %arg7[%c0_9, %c0_10] : memref<1x128xf32, #tpu.memory_space<vmem>>, vector<1x128xf32>
    %c0_11 = arith.constant 0 : index
    %c0_12 = arith.constant 0 : index
    %28 = vector.load %arg8[%c0_11, %c0_12] : memref<1x128xf32, #tpu.memory_space<vmem>>, vector<1x128xf32>
    %c0_13 = arith.constant 0 : index
    %c0_14 = arith.constant 0 : index
    %29 = vector.load %arg9[%c0_13, %c0_14] : memref<1x128xf32, #tpu.memory_space<vmem>>, vector<1x128xf32>
    %c0_i32_15 = arith.constant 0 : i32
    %30 = arith.addi %0, %c0_i32_15 : i32
    %c0_16 = arith.constant 0 : index
    %31 = arith.index_cast %30 : i32 to index
    %32 = memref.load %arg1[%c0_16, %31] : memref<7x8xf32, #tpu.memory_space<smem>>
    %c1_17 = arith.constant 1 : index
    %33 = arith.index_cast %30 : i32 to index
    %34 = memref.load %arg1[%c1_17, %33] : memref<7x8xf32, #tpu.memory_space<smem>>
    %c2_18 = arith.constant 2 : index
    %35 = arith.index_cast %30 : i32 to index
    %36 = memref.load %arg1[%c2_18, %35] : memref<7x8xf32, #tpu.memory_space<smem>>
    %c3_19 = arith.constant 3 : index
    %37 = arith.index_cast %30 : i32 to index
    %38 = memref.load %arg1[%c3_19, %37] : memref<7x8xf32, #tpu.memory_space<smem>>
    %c4 = arith.constant 4 : index
    %39 = arith.index_cast %30 : i32 to index
    %40 = memref.load %arg1[%c4, %39] : memref<7x8xf32, #tpu.memory_space<smem>>
    %c5 = arith.constant 5 : index
    %41 = arith.index_cast %30 : i32 to index
    %42 = memref.load %arg1[%c5, %41] : memref<7x8xf32, #tpu.memory_space<smem>>
    %c6 = arith.constant 6 : index
    %43 = arith.index_cast %30 : i32 to index
    %44 = memref.load %arg1[%c6, %43] : memref<7x8xf32, #tpu.memory_space<smem>>
    %cst_20 = arith.constant 0.000000e+00 : f32
    %45 = arith.subf %cst_20, %40 : f32
    %cst_21 = arith.constant 0.000000e+00 : f32
    %46 = arith.subf %cst_21, %44 : f32
    %47 = arith.mulf %24, %11 : vector<1x128xf32>
    %48 = arith.mulf %25, %13 : vector<1x128xf32>
    %49 = arith.subf %47, %48 : vector<1x128xf32>
    %50 = arith.mulf %24, %13 : vector<1x128xf32>
    %51 = arith.mulf %25, %11 : vector<1x128xf32>
    %52 = arith.addf %50, %51 : vector<1x128xf32>
    %53 = arith.mulf %26, %11 : vector<1x128xf32>
    %54 = arith.mulf %27, %16 : vector<1x128xf32>
    %55 = arith.subf %53, %54 : vector<1x128xf32>
    %56 = arith.mulf %26, %16 : vector<1x128xf32>
    %57 = arith.mulf %27, %11 : vector<1x128xf32>
    %58 = arith.addf %56, %57 : vector<1x128xf32>
    %59 = arith.mulf %18, %28 : vector<1x128xf32>
    %60 = arith.addf %59, %20 : vector<1x128xf32>
    %61 = arith.mulf %18, %29 : vector<1x128xf32>
    %62 = vector.broadcast %42 : f32 to vector<1x128xf32>
    %63 = arith.mulf %55, %62 : vector<1x128xf32>
    %64 = vector.broadcast %44 : f32 to vector<1x128xf32>
    %65 = arith.mulf %58, %64 : vector<1x128xf32>
    %66 = arith.addf %63, %65 : vector<1x128xf32>
    %67 = vector.broadcast %44 : f32 to vector<1x128xf32>
    %68 = arith.mulf %55, %67 : vector<1x128xf32>
    %69 = vector.broadcast %42 : f32 to vector<1x128xf32>
    %70 = arith.mulf %58, %69 : vector<1x128xf32>
    %71 = arith.subf %68, %70 : vector<1x128xf32>
    %72 = vector.broadcast %38 : f32 to vector<1x128xf32>
    %73 = arith.mulf %60, %72 : vector<1x128xf32>
    %74 = vector.broadcast %40 : f32 to vector<1x128xf32>
    %75 = arith.mulf %61, %74 : vector<1x128xf32>
    %76 = arith.subf %73, %75 : vector<1x128xf32>
    %77 = vector.broadcast %40 : f32 to vector<1x128xf32>
    %78 = arith.mulf %60, %77 : vector<1x128xf32>
    %79 = vector.broadcast %38 : f32 to vector<1x128xf32>
    %80 = arith.mulf %61, %79 : vector<1x128xf32>
    %81 = arith.addf %78, %80 : vector<1x128xf32>
    %82 = vector.broadcast %32 : f32 to vector<1x128xf32>
    %83 = arith.mulf %82, %49 : vector<1x128xf32>
    %84 = vector.broadcast %34 : f32 to vector<1x128xf32>
    %85 = arith.mulf %84, %66 : vector<1x128xf32>
    %86 = arith.addf %83, %85 : vector<1x128xf32>
    %87 = vector.broadcast %36 : f32 to vector<1x128xf32>
    %88 = arith.mulf %87, %81 : vector<1x128xf32>
    %89 = arith.subf %86, %88 : vector<1x128xf32>
    %90 = vector.broadcast %32 : f32 to vector<1x128xf32>
    %91 = arith.mulf %90, %52 : vector<1x128xf32>
    %92 = vector.broadcast %34 : f32 to vector<1x128xf32>
    %93 = arith.mulf %92, %71 : vector<1x128xf32>
    %94 = arith.addf %91, %93 : vector<1x128xf32>
    %95 = vector.broadcast %36 : f32 to vector<1x128xf32>
    %96 = arith.mulf %95, %76 : vector<1x128xf32>
    %97 = arith.addf %94, %96 : vector<1x128xf32>
    %98 = vector.broadcast %42 : f32 to vector<1x128xf32>
    %99 = arith.mulf %49, %98 : vector<1x128xf32>
    %100 = vector.broadcast %46 : f32 to vector<1x128xf32>
    %101 = arith.mulf %52, %100 : vector<1x128xf32>
    %102 = arith.addf %99, %101 : vector<1x128xf32>
    %103 = vector.broadcast %46 : f32 to vector<1x128xf32>
    %104 = arith.mulf %49, %103 : vector<1x128xf32>
    %105 = vector.broadcast %42 : f32 to vector<1x128xf32>
    %106 = arith.mulf %52, %105 : vector<1x128xf32>
    %107 = arith.subf %104, %106 : vector<1x128xf32>
    %108 = vector.broadcast %38 : f32 to vector<1x128xf32>
    %109 = arith.mulf %60, %108 : vector<1x128xf32>
    %110 = vector.broadcast %45 : f32 to vector<1x128xf32>
    %111 = arith.mulf %61, %110 : vector<1x128xf32>
    %112 = arith.subf %109, %111 : vector<1x128xf32>
    %113 = vector.broadcast %45 : f32 to vector<1x128xf32>
    %114 = arith.mulf %60, %113 : vector<1x128xf32>
    %115 = vector.broadcast %38 : f32 to vector<1x128xf32>
    %116 = arith.mulf %61, %115 : vector<1x128xf32>
    %117 = arith.addf %114, %116 : vector<1x128xf32>
    %118 = vector.broadcast %34 : f32 to vector<1x128xf32>
    %119 = arith.mulf %118, %102 : vector<1x128xf32>
    %120 = vector.broadcast %32 : f32 to vector<1x128xf32>
    %121 = arith.mulf %120, %55 : vector<1x128xf32>
    %122 = arith.addf %119, %121 : vector<1x128xf32>
    %123 = vector.broadcast %36 : f32 to vector<1x128xf32>
    %124 = arith.mulf %123, %117 : vector<1x128xf32>
    %125 = arith.addf %122, %124 : vector<1x128xf32>
    %126 = vector.broadcast %34 : f32 to vector<1x128xf32>
    %127 = arith.mulf %126, %107 : vector<1x128xf32>
    %128 = vector.broadcast %32 : f32 to vector<1x128xf32>
    %129 = arith.mulf %128, %58 : vector<1x128xf32>
    %130 = arith.addf %127, %129 : vector<1x128xf32>
    %131 = vector.broadcast %36 : f32 to vector<1x128xf32>
    %132 = arith.mulf %131, %112 : vector<1x128xf32>
    %133 = arith.subf %130, %132 : vector<1x128xf32>
    %134 = vector.broadcast %38 : f32 to vector<1x128xf32>
    %135 = arith.mulf %49, %134 : vector<1x128xf32>
    %136 = vector.broadcast %45 : f32 to vector<1x128xf32>
    %137 = arith.mulf %52, %136 : vector<1x128xf32>
    %138 = arith.subf %135, %137 : vector<1x128xf32>
    %139 = vector.broadcast %45 : f32 to vector<1x128xf32>
    %140 = arith.mulf %49, %139 : vector<1x128xf32>
    %141 = vector.broadcast %38 : f32 to vector<1x128xf32>
    %142 = arith.mulf %52, %141 : vector<1x128xf32>
    %143 = arith.addf %140, %142 : vector<1x128xf32>
    %144 = vector.broadcast %38 : f32 to vector<1x128xf32>
    %145 = arith.mulf %55, %144 : vector<1x128xf32>
    %146 = vector.broadcast %40 : f32 to vector<1x128xf32>
    %147 = arith.mulf %58, %146 : vector<1x128xf32>
    %148 = arith.subf %145, %147 : vector<1x128xf32>
    %149 = vector.broadcast %40 : f32 to vector<1x128xf32>
    %150 = arith.mulf %55, %149 : vector<1x128xf32>
    %151 = vector.broadcast %38 : f32 to vector<1x128xf32>
    %152 = arith.mulf %58, %151 : vector<1x128xf32>
    %153 = arith.addf %150, %152 : vector<1x128xf32>
    %154 = arith.subf %32, %34 : f32
    %155 = arith.subf %143, %153 : vector<1x128xf32>
    %156 = vector.broadcast %36 : f32 to vector<1x128xf32>
    %157 = arith.mulf %156, %155 : vector<1x128xf32>
    %158 = vector.broadcast %154 : f32 to vector<1x128xf32>
    %159 = arith.mulf %158, %60 : vector<1x128xf32>
    %160 = arith.addf %157, %159 : vector<1x128xf32>
    %cst_22 = arith.constant 0.000000e+00 : f32
    %161 = arith.subf %cst_22, %36 : f32
    %162 = arith.subf %138, %148 : vector<1x128xf32>
    %163 = vector.broadcast %161 : f32 to vector<1x128xf32>
    %164 = arith.mulf %163, %162 : vector<1x128xf32>
    %165 = vector.broadcast %154 : f32 to vector<1x128xf32>
    %166 = arith.mulf %165, %61 : vector<1x128xf32>
    %167 = arith.addf %164, %166 : vector<1x128xf32>
    %c1_i32 = arith.constant 1 : i32
    %168 = tpu.dynamic_rotate %89 by %c1_i32 dim 1 : vector<1x128xf32>, i32 -> vector<1x128xf32>
    %169 = arith.mulf %168, %5 : vector<1x128xf32>
    %c1_i32_23 = arith.constant 1 : i32
    %170 = tpu.dynamic_rotate %97 by %c1_i32_23 dim 1 : vector<1x128xf32>, i32 -> vector<1x128xf32>
    %171 = arith.mulf %170, %5 : vector<1x128xf32>
    %c127_i32 = arith.constant 127 : i32
    %172 = tpu.dynamic_rotate %125 by %c127_i32 dim 1 : vector<1x128xf32>, i32 -> vector<1x128xf32>
    %173 = arith.mulf %172, %9 : vector<1x128xf32>
    %c127_i32_24 = arith.constant 127 : i32
    %174 = tpu.dynamic_rotate %133 by %c127_i32_24 dim 1 : vector<1x128xf32>, i32 -> vector<1x128xf32>
    %175 = arith.mulf %174, %9 : vector<1x128xf32>
    %176 = arith.index_cast %c0_i32_15 : i32 to index
    %c0_25 = arith.constant 0 : index
    %177 = vector.load %arg3[%176, %c0_25] : memref<8x768xf32, #tpu.memory_space<vmem>>, vector<1x128xf32>
    tpu.vector_store %arg3[%176, %c0_25], %169 {strides = array<i32>} : memref<8x768xf32, #tpu.memory_space<vmem>>, vector<1x128xf32>,
    %178 = arith.index_cast %c0_i32_15 : i32 to index
    %c128 = arith.constant 128 : index
    %179 = vector.load %arg3[%178, %c128] : memref<8x768xf32, #tpu.memory_space<vmem>>, vector<1x128xf32>
    tpu.vector_store %arg3[%178, %c128], %171 {strides = array<i32>} : memref<8x768xf32, #tpu.memory_space<vmem>>, vector<1x128xf32>,
    %180 = arith.index_cast %c0_i32_15 : i32 to index
    %c256 = arith.constant 256 : index
    %181 = vector.load %arg3[%180, %c256] : memref<8x768xf32, #tpu.memory_space<vmem>>, vector<1x128xf32>
    tpu.vector_store %arg3[%180, %c256], %173 {strides = array<i32>} : memref<8x768xf32, #tpu.memory_space<vmem>>, vector<1x128xf32>,
    %182 = arith.index_cast %c0_i32_15 : i32 to index
    %c384 = arith.constant 384 : index
    %183 = vector.load %arg3[%182, %c384] : memref<8x768xf32, #tpu.memory_space<vmem>>, vector<1x128xf32>
    tpu.vector_store %arg3[%182, %c384], %175 {strides = array<i32>} : memref<8x768xf32, #tpu.memory_space<vmem>>, vector<1x128xf32>,
    %184 = arith.index_cast %c0_i32_15 : i32 to index
    %c512 = arith.constant 512 : index
    %185 = vector.load %arg3[%184, %c512] : memref<8x768xf32, #tpu.memory_space<vmem>>, vector<1x128xf32>
    tpu.vector_store %arg3[%184, %c512], %160 {strides = array<i32>} : memref<8x768xf32, #tpu.memory_space<vmem>>, vector<1x128xf32>,
    %186 = arith.index_cast %c0_i32_15 : i32 to index
    %c640 = arith.constant 640 : index
    %187 = vector.load %arg3[%186, %c640] : memref<8x768xf32, #tpu.memory_space<vmem>>, vector<1x128xf32>
    tpu.vector_store %arg3[%186, %c640], %167 {strides = array<i32>} : memref<8x768xf32, #tpu.memory_space<vmem>>, vector<1x128xf32>,
    %c1_i32_26 = arith.constant 1 : i32
    %188 = arith.addi %0, %c1_i32_26 : i32
    %c0_27 = arith.constant 0 : index
    %189 = arith.index_cast %188 : i32 to index
    %190 = memref.load %arg1[%c0_27, %189] : memref<7x8xf32, #tpu.memory_space<smem>>
    %c1_28 = arith.constant 1 : index
    %191 = arith.index_cast %188 : i32 to index
    %192 = memref.load %arg1[%c1_28, %191] : memref<7x8xf32, #tpu.memory_space<smem>>
    %c2_29 = arith.constant 2 : index
    %193 = arith.index_cast %188 : i32 to index
    %194 = memref.load %arg1[%c2_29, %193] : memref<7x8xf32, #tpu.memory_space<smem>>
    %c3_30 = arith.constant 3 : index
    %195 = arith.index_cast %188 : i32 to index
    %196 = memref.load %arg1[%c3_30, %195] : memref<7x8xf32, #tpu.memory_space<smem>>
    %c4_31 = arith.constant 4 : index
    %197 = arith.index_cast %188 : i32 to index
    %198 = memref.load %arg1[%c4_31, %197] : memref<7x8xf32, #tpu.memory_space<smem>>
    %c5_32 = arith.constant 5 : index
    %199 = arith.index_cast %188 : i32 to index
    %200 = memref.load %arg1[%c5_32, %199] : memref<7x8xf32, #tpu.memory_space<smem>>
    %c6_33 = arith.constant 6 : index
    %201 = arith.index_cast %188 : i32 to index
    %202 = memref.load %arg1[%c6_33, %201] : memref<7x8xf32, #tpu.memory_space<smem>>
    %cst_34 = arith.constant 0.000000e+00 : f32
    %203 = arith.subf %cst_34, %198 : f32
    %cst_35 = arith.constant 0.000000e+00 : f32
    %204 = arith.subf %cst_35, %202 : f32
    %205 = arith.mulf %169, %11 : vector<1x128xf32>
    %206 = arith.mulf %171, %13 : vector<1x128xf32>
    %207 = arith.subf %205, %206 : vector<1x128xf32>
    %208 = arith.mulf %169, %13 : vector<1x128xf32>
    %209 = arith.mulf %171, %11 : vector<1x128xf32>
    %210 = arith.addf %208, %209 : vector<1x128xf32>
    %211 = arith.mulf %173, %11 : vector<1x128xf32>
    %212 = arith.mulf %175, %16 : vector<1x128xf32>
    %213 = arith.subf %211, %212 : vector<1x128xf32>
    %214 = arith.mulf %173, %16 : vector<1x128xf32>
    %215 = arith.mulf %175, %11 : vector<1x128xf32>
    %216 = arith.addf %214, %215 : vector<1x128xf32>
    %217 = arith.mulf %18, %160 : vector<1x128xf32>
    %218 = arith.addf %217, %20 : vector<1x128xf32>
    %219 = arith.mulf %18, %167 : vector<1x128xf32>
    %220 = vector.broadcast %200 : f32 to vector<1x128xf32>
    %221 = arith.mulf %213, %220 : vector<1x128xf32>
    %222 = vector.broadcast %202 : f32 to vector<1x128xf32>
    %223 = arith.mulf %216, %222 : vector<1x128xf32>
    %224 = arith.addf %221, %223 : vector<1x128xf32>
    %225 = vector.broadcast %202 : f32 to vector<1x128xf32>
    %226 = arith.mulf %213, %225 : vector<1x128xf32>
    %227 = vector.broadcast %200 : f32 to vector<1x128xf32>
    %228 = arith.mulf %216, %227 : vector<1x128xf32>
    %229 = arith.subf %226, %228 : vector<1x128xf32>
    %230 = vector.broadcast %196 : f32 to vector<1x128xf32>
    %231 = arith.mulf %218, %230 : vector<1x128xf32>
    %232 = vector.broadcast %198 : f32 to vector<1x128xf32>
    %233 = arith.mulf %219, %232 : vector<1x128xf32>
    %234 = arith.subf %231, %233 : vector<1x128xf32>
    %235 = vector.broadcast %198 : f32 to vector<1x128xf32>
    %236 = arith.mulf %218, %235 : vector<1x128xf32>
    %237 = vector.broadcast %196 : f32 to vector<1x128xf32>
    %238 = arith.mulf %219, %237 : vector<1x128xf32>
    %239 = arith.addf %236, %238 : vector<1x128xf32>
    %240 = vector.broadcast %190 : f32 to vector<1x128xf32>
    %241 = arith.mulf %240, %207 : vector<1x128xf32>
    %242 = vector.broadcast %192 : f32 to vector<1x128xf32>
    %243 = arith.mulf %242, %224 : vector<1x128xf32>
    %244 = arith.addf %241, %243 : vector<1x128xf32>
    %245 = vector.broadcast %194 : f32 to vector<1x128xf32>
    %246 = arith.mulf %245, %239 : vector<1x128xf32>
    %247 = arith.subf %244, %246 : vector<1x128xf32>
    %248 = vector.broadcast %190 : f32 to vector<1x128xf32>
    %249 = arith.mulf %248, %210 : vector<1x128xf32>
    %250 = vector.broadcast %192 : f32 to vector<1x128xf32>
    %251 = arith.mulf %250, %229 : vector<1x128xf32>
    %252 = arith.addf %249, %251 : vector<1x128xf32>
    %253 = vector.broadcast %194 : f32 to vector<1x128xf32>
    %254 = arith.mulf %253, %234 : vector<1x128xf32>
    %255 = arith.addf %252, %254 : vector<1x128xf32>
    %256 = vector.broadcast %200 : f32 to vector<1x128xf32>
    %257 = arith.mulf %207, %256 : vector<1x128xf32>
    %258 = vector.broadcast %204 : f32 to vector<1x128xf32>
    %259 = arith.mulf %210, %258 : vector<1x128xf32>
    %260 = arith.addf %257, %259 : vector<1x128xf32>
    %261 = vector.broadcast %204 : f32 to vector<1x128xf32>
    %262 = arith.mulf %207, %261 : vector<1x128xf32>
    %263 = vector.broadcast %200 : f32 to vector<1x128xf32>
    %264 = arith.mulf %210, %263 : vector<1x128xf32>
    %265 = arith.subf %262, %264 : vector<1x128xf32>
    %266 = vector.broadcast %196 : f32 to vector<1x128xf32>
    %267 = arith.mulf %218, %266 : vector<1x128xf32>
    %268 = vector.broadcast %203 : f32 to vector<1x128xf32>
    %269 = arith.mulf %219, %268 : vector<1x128xf32>
    %270 = arith.subf %267, %269 : vector<1x128xf32>
    %271 = vector.broadcast %203 : f32 to vector<1x128xf32>
    %272 = arith.mulf %218, %271 : vector<1x128xf32>
    %273 = vector.broadcast %196 : f32 to vector<1x128xf32>
    %274 = arith.mulf %219, %273 : vector<1x128xf32>
    %275 = arith.addf %272, %274 : vector<1x128xf32>
    %276 = vector.broadcast %192 : f32 to vector<1x128xf32>
    %277 = arith.mulf %276, %260 : vector<1x128xf32>
    %278 = vector.broadcast %190 : f32 to vector<1x128xf32>
    %279 = arith.mulf %278, %213 : vector<1x128xf32>
    %280 = arith.addf %277, %279 : vector<1x128xf32>
    %281 = vector.broadcast %194 : f32 to vector<1x128xf32>
    %282 = arith.mulf %281, %275 : vector<1x128xf32>
    %283 = arith.addf %280, %282 : vector<1x128xf32>
    %284 = vector.broadcast %192 : f32 to vector<1x128xf32>
    %285 = arith.mulf %284, %265 : vector<1x128xf32>
    %286 = vector.broadcast %190 : f32 to vector<1x128xf32>
    %287 = arith.mulf %286, %216 : vector<1x128xf32>
    %288 = arith.addf %285, %287 : vector<1x128xf32>
    %289 = vector.broadcast %194 : f32 to vector<1x128xf32>
    %290 = arith.mulf %289, %270 : vector<1x128xf32>
    %291 = arith.subf %288, %290 : vector<1x128xf32>
    %292 = vector.broadcast %196 : f32 to vector<1x128xf32>
    %293 = arith.mulf %207, %292 : vector<1x128xf32>
    %294 = vector.broadcast %203 : f32 to vector<1x128xf32>
    %295 = arith.mulf %210, %294 : vector<1x128xf32>
    %296 = arith.subf %293, %295 : vector<1x128xf32>
    %297 = vector.broadcast %203 : f32 to vector<1x128xf32>
    %298 = arith.mulf %207, %297 : vector<1x128xf32>
    %299 = vector.broadcast %196 : f32 to vector<1x128xf32>
    %300 = arith.mulf %210, %299 : vector<1x128xf32>
    %301 = arith.addf %298, %300 : vector<1x128xf32>
    %302 = vector.broadcast %196 : f32 to vector<1x128xf32>
    %303 = arith.mulf %213, %302 : vector<1x128xf32>
    %304 = vector.broadcast %198 : f32 to vector<1x128xf32>
    %305 = arith.mulf %216, %304 : vector<1x128xf32>
    %306 = arith.subf %303, %305 : vector<1x128xf32>
    %307 = vector.broadcast %198 : f32 to vector<1x128xf32>
    %308 = arith.mulf %213, %307 : vector<1x128xf32>
    %309 = vector.broadcast %196 : f32 to vector<1x128xf32>
    %310 = arith.mulf %216, %309 : vector<1x128xf32>
    %311 = arith.addf %308, %310 : vector<1x128xf32>
    %312 = arith.subf %190, %192 : f32
    %313 = arith.subf %301, %311 : vector<1x128xf32>
    %314 = vector.broadcast %194 : f32 to vector<1x128xf32>
    %315 = arith.mulf %314, %313 : vector<1x128xf32>
    %316 = vector.broadcast %312 : f32 to vector<1x128xf32>
    %317 = arith.mulf %316, %218 : vector<1x128xf32>
    %318 = arith.addf %315, %317 : vector<1x128xf32>
    %cst_36 = arith.constant 0.000000e+00 : f32
    %319 = arith.subf %cst_36, %194 : f32
    %320 = arith.subf %296, %306 : vector<1x128xf32>
    %321 = vector.broadcast %319 : f32 to vector<1x128xf32>
    %322 = arith.mulf %321, %320 : vector<1x128xf32>
    %323 = vector.broadcast %312 : f32 to vector<1x128xf32>
    %324 = arith.mulf %323, %219 : vector<1x128xf32>
    %325 = arith.addf %322, %324 : vector<1x128xf32>
    %c1_i32_37 = arith.constant 1 : i32
    %326 = tpu.dynamic_rotate %247 by %c1_i32_37 dim 1 : vector<1x128xf32>, i32 -> vector<1x128xf32>
    %327 = arith.mulf %326, %5 : vector<1x128xf32>
    %c1_i32_38 = arith.constant 1 : i32
    %328 = tpu.dynamic_rotate %255 by %c1_i32_38 dim 1 : vector<1x128xf32>, i32 -> vector<1x128xf32>
    %329 = arith.mulf %328, %5 : vector<1x128xf32>
    %c127_i32_39 = arith.constant 127 : i32
    %330 = tpu.dynamic_rotate %283 by %c127_i32_39 dim 1 : vector<1x128xf32>, i32 -> vector<1x128xf32>
    %331 = arith.mulf %330, %9 : vector<1x128xf32>
    %c127_i32_40 = arith.constant 127 : i32
    %332 = tpu.dynamic_rotate %291 by %c127_i32_40 dim 1 : vector<1x128xf32>, i32 -> vector<1x128xf32>
    %333 = arith.mulf %332, %9 : vector<1x128xf32>
    %334 = arith.index_cast %c1_i32_26 : i32 to index
    %c0_41 = arith.constant 0 : index
    %335 = vector.load %arg3[%334, %c0_41] : memref<8x768xf32, #tpu.memory_space<vmem>>, vector<1x128xf32>
    tpu.vector_store %arg3[%334, %c0_41], %327 {strides = array<i32>} : memref<8x768xf32, #tpu.memory_space<vmem>>, vector<1x128xf32>,
    %336 = arith.index_cast %c1_i32_26 : i32 to index
    %c128_42 = arith.constant 128 : index
    %337 = vector.load %arg3[%336, %c128_42] : memref<8x768xf32, #tpu.memory_space<vmem>>, vector<1x128xf32>
    tpu.vector_store %arg3[%336, %c128_42], %329 {strides = array<i32>} : memref<8x768xf32, #tpu.memory_space<vmem>>, vector<1x128xf32>,
    %338 = arith.index_cast %c1_i32_26 : i32 to index
    %c256_43 = arith.constant 256 : index
    %339 = vector.load %arg3[%338, %c256_43] : memref<8x768xf32, #tpu.memory_space<vmem>>, vector<1x128xf32>
    tpu.vector_store %arg3[%338, %c256_43], %331 {strides = array<i32>} : memref<8x768xf32, #tpu.memory_space<vmem>>, vector<1x128xf32>,
    %340 = arith.index_cast %c1_i32_26 : i32 to index
    %c384_44 = arith.constant 384 : index
    %341 = vector.load %arg3[%340, %c384_44] : memref<8x768xf32, #tpu.memory_space<vmem>>, vector<1x128xf32>
    tpu.vector_store %arg3[%340, %c384_44], %333 {strides = array<i32>} : memref<8x768xf32, #tpu.memory_space<vmem>>, vector<1x128xf32>,
    %342 = arith.index_cast %c1_i32_26 : i32 to index
    %c512_45 = arith.constant 512 : index
    %343 = vector.load %arg3[%342, %c512_45] : memref<8x768xf32, #tpu.memory_space<vmem>>, vector<1x128xf32>
    tpu.vector_store %arg3[%342, %c512_45], %318 {strides = array<i32>} : memref<8x768xf32, #tpu.memory_space<vmem>>, vector<1x128xf32>,
    %344 = arith.index_cast %c1_i32_26 : i32 to index
    %c640_46 = arith.constant 640 : index
    %345 = vector.load %arg3[%344, %c640_46] : memref<8x768xf32, #tpu.memory_space<vmem>>, vector<1x128xf32>
    tpu.vector_store %arg3[%344, %c640_46], %325 {strides = array<i32>} : memref<8x768xf32, #tpu.memory_space<vmem>>, vector<1x128xf32>,
    %c2_i32 = arith.constant 2 : i32
    %346 = arith.addi %0, %c2_i32 : i32
    %c0_47 = arith.constant 0 : index
    %347 = arith.index_cast %346 : i32 to index
    %348 = memref.load %arg1[%c0_47, %347] : memref<7x8xf32, #tpu.memory_space<smem>>
    %c1_48 = arith.constant 1 : index
    %349 = arith.index_cast %346 : i32 to index
    %350 = memref.load %arg1[%c1_48, %349] : memref<7x8xf32, #tpu.memory_space<smem>>
    %c2_49 = arith.constant 2 : index
    %351 = arith.index_cast %346 : i32 to index
    %352 = memref.load %arg1[%c2_49, %351] : memref<7x8xf32, #tpu.memory_space<smem>>
    %c3_50 = arith.constant 3 : index
    %353 = arith.index_cast %346 : i32 to index
    %354 = memref.load %arg1[%c3_50, %353] : memref<7x8xf32, #tpu.memory_space<smem>>
    %c4_51 = arith.constant 4 : index
    %355 = arith.index_cast %346 : i32 to index
    %356 = memref.load %arg1[%c4_51, %355] : memref<7x8xf32, #tpu.memory_space<smem>>
    %c5_52 = arith.constant 5 : index
    %357 = arith.index_cast %346 : i32 to index
    %358 = memref.load %arg1[%c5_52, %357] : memref<7x8xf32, #tpu.memory_space<smem>>
    %c6_53 = arith.constant 6 : index
    %359 = arith.index_cast %346 : i32 to index
    %360 = memref.load %arg1[%c6_53, %359] : memref<7x8xf32, #tpu.memory_space<smem>>
    %cst_54 = arith.constant 0.000000e+00 : f32
    %361 = arith.subf %cst_54, %356 : f32
    %cst_55 = arith.constant 0.000000e+00 : f32
    %362 = arith.subf %cst_55, %360 : f32
    %363 = arith.mulf %327, %11 : vector<1x128xf32>
    %364 = arith.mulf %329, %13 : vector<1x128xf32>
    %365 = arith.subf %363, %364 : vector<1x128xf32>
    %366 = arith.mulf %327, %13 : vector<1x128xf32>
    %367 = arith.mulf %329, %11 : vector<1x128xf32>
    %368 = arith.addf %366, %367 : vector<1x128xf32>
    %369 = arith.mulf %331, %11 : vector<1x128xf32>
    %370 = arith.mulf %333, %16 : vector<1x128xf32>
    %371 = arith.subf %369, %370 : vector<1x128xf32>
    %372 = arith.mulf %331, %16 : vector<1x128xf32>
    %373 = arith.mulf %333, %11 : vector<1x128xf32>
    %374 = arith.addf %372, %373 : vector<1x128xf32>
    %375 = arith.mulf %18, %318 : vector<1x128xf32>
    %376 = arith.addf %375, %20 : vector<1x128xf32>
    %377 = arith.mulf %18, %325 : vector<1x128xf32>
    %378 = vector.broadcast %358 : f32 to vector<1x128xf32>
    %379 = arith.mulf %371, %378 : vector<1x128xf32>
    %380 = vector.broadcast %360 : f32 to vector<1x128xf32>
    %381 = arith.mulf %374, %380 : vector<1x128xf32>
    %382 = arith.addf %379, %381 : vector<1x128xf32>
    %383 = vector.broadcast %360 : f32 to vector<1x128xf32>
    %384 = arith.mulf %371, %383 : vector<1x128xf32>
    %385 = vector.broadcast %358 : f32 to vector<1x128xf32>
    %386 = arith.mulf %374, %385 : vector<1x128xf32>
    %387 = arith.subf %384, %386 : vector<1x128xf32>
    %388 = vector.broadcast %354 : f32 to vector<1x128xf32>
    %389 = arith.mulf %376, %388 : vector<1x128xf32>
    %390 = vector.broadcast %356 : f32 to vector<1x128xf32>
    %391 = arith.mulf %377, %390 : vector<1x128xf32>
    %392 = arith.subf %389, %391 : vector<1x128xf32>
    %393 = vector.broadcast %356 : f32 to vector<1x128xf32>
    %394 = arith.mulf %376, %393 : vector<1x128xf32>
    %395 = vector.broadcast %354 : f32 to vector<1x128xf32>
    %396 = arith.mulf %377, %395 : vector<1x128xf32>
    %397 = arith.addf %394, %396 : vector<1x128xf32>
    %398 = vector.broadcast %348 : f32 to vector<1x128xf32>
    %399 = arith.mulf %398, %365 : vector<1x128xf32>
    %400 = vector.broadcast %350 : f32 to vector<1x128xf32>
    %401 = arith.mulf %400, %382 : vector<1x128xf32>
    %402 = arith.addf %399, %401 : vector<1x128xf32>
    %403 = vector.broadcast %352 : f32 to vector<1x128xf32>
    %404 = arith.mulf %403, %397 : vector<1x128xf32>
    %405 = arith.subf %402, %404 : vector<1x128xf32>
    %406 = vector.broadcast %348 : f32 to vector<1x128xf32>
    %407 = arith.mulf %406, %368 : vector<1x128xf32>
    %408 = vector.broadcast %350 : f32 to vector<1x128xf32>
    %409 = arith.mulf %408, %387 : vector<1x128xf32>
    %410 = arith.addf %407, %409 : vector<1x128xf32>
    %411 = vector.broadcast %352 : f32 to vector<1x128xf32>
    %412 = arith.mulf %411, %392 : vector<1x128xf32>
    %413 = arith.addf %410, %412 : vector<1x128xf32>
    %414 = vector.broadcast %358 : f32 to vector<1x128xf32>
    %415 = arith.mulf %365, %414 : vector<1x128xf32>
    %416 = vector.broadcast %362 : f32 to vector<1x128xf32>
    %417 = arith.mulf %368, %416 : vector<1x128xf32>
    %418 = arith.addf %415, %417 : vector<1x128xf32>
    %419 = vector.broadcast %362 : f32 to vector<1x128xf32>
    %420 = arith.mulf %365, %419 : vector<1x128xf32>
    %421 = vector.broadcast %358 : f32 to vector<1x128xf32>
    %422 = arith.mulf %368, %421 : vector<1x128xf32>
    %423 = arith.subf %420, %422 : vector<1x128xf32>
    %424 = vector.broadcast %354 : f32 to vector<1x128xf32>
    %425 = arith.mulf %376, %424 : vector<1x128xf32>
    %426 = vector.broadcast %361 : f32 to vector<1x128xf32>
    %427 = arith.mulf %377, %426 : vector<1x128xf32>
    %428 = arith.subf %425, %427 : vector<1x128xf32>
    %429 = vector.broadcast %361 : f32 to vector<1x128xf32>
    %430 = arith.mulf %376, %429 : vector<1x128xf32>
    %431 = vector.broadcast %354 : f32 to vector<1x128xf32>
    %432 = arith.mulf %377, %431 : vector<1x128xf32>
    %433 = arith.addf %430, %432 : vector<1x128xf32>
    %434 = vector.broadcast %350 : f32 to vector<1x128xf32>
    %435 = arith.mulf %434, %418 : vector<1x128xf32>
    %436 = vector.broadcast %348 : f32 to vector<1x128xf32>
    %437 = arith.mulf %436, %371 : vector<1x128xf32>
    %438 = arith.addf %435, %437 : vector<1x128xf32>
    %439 = vector.broadcast %352 : f32 to vector<1x128xf32>
    %440 = arith.mulf %439, %433 : vector<1x128xf32>
    %441 = arith.addf %438, %440 : vector<1x128xf32>
    %442 = vector.broadcast %350 : f32 to vector<1x128xf32>
    %443 = arith.mulf %442, %423 : vector<1x128xf32>
    %444 = vector.broadcast %348 : f32 to vector<1x128xf32>
    %445 = arith.mulf %444, %374 : vector<1x128xf32>
    %446 = arith.addf %443, %445 : vector<1x128xf32>
    %447 = vector.broadcast %352 : f32 to vector<1x128xf32>
    %448 = arith.mulf %447, %428 : vector<1x128xf32>
    %449 = arith.subf %446, %448 : vector<1x128xf32>
    %450 = vector.broadcast %354 : f32 to vector<1x128xf32>
    %451 = arith.mulf %365, %450 : vector<1x128xf32>
    %452 = vector.broadcast %361 : f32 to vector<1x128xf32>
    %453 = arith.mulf %368, %452 : vector<1x128xf32>
    %454 = arith.subf %451, %453 : vector<1x128xf32>
    %455 = vector.broadcast %361 : f32 to vector<1x128xf32>
    %456 = arith.mulf %365, %455 : vector<1x128xf32>
    %457 = vector.broadcast %354 : f32 to vector<1x128xf32>
    %458 = arith.mulf %368, %457 : vector<1x128xf32>
    %459 = arith.addf %456, %458 : vector<1x128xf32>
    %460 = vector.broadcast %354 : f32 to vector<1x128xf32>
    %461 = arith.mulf %371, %460 : vector<1x128xf32>
    %462 = vector.broadcast %356 : f32 to vector<1x128xf32>
    %463 = arith.mulf %374, %462 : vector<1x128xf32>
    %464 = arith.subf %461, %463 : vector<1x128xf32>
    %465 = vector.broadcast %356 : f32 to vector<1x128xf32>
    %466 = arith.mulf %371, %465 : vector<1x128xf32>
    %467 = vector.broadcast %354 : f32 to vector<1x128xf32>
    %468 = arith.mulf %374, %467 : vector<1x128xf32>
    %469 = arith.addf %466, %468 : vector<1x128xf32>
    %470 = arith.subf %348, %350 : f32
    %471 = arith.subf %459, %469 : vector<1x128xf32>
    %472 = vector.broadcast %352 : f32 to vector<1x128xf32>
    %473 = arith.mulf %472, %471 : vector<1x128xf32>
    %474 = vector.broadcast %470 : f32 to vector<1x128xf32>
    %475 = arith.mulf %474, %376 : vector<1x128xf32>
    %476 = arith.addf %473, %475 : vector<1x128xf32>
    %cst_56 = arith.constant 0.000000e+00 : f32
    %477 = arith.subf %cst_56, %352 : f32
    %478 = arith.subf %454, %464 : vector<1x128xf32>
    %479 = vector.broadcast %477 : f32 to vector<1x128xf32>
    %480 = arith.mulf %479, %478 : vector<1x128xf32>
    %481 = vector.broadcast %470 : f32 to vector<1x128xf32>
    %482 = arith.mulf %481, %377 : vector<1x128xf32>
    %483 = arith.addf %480, %482 : vector<1x128xf32>
    %c1_i32_57 = arith.constant 1 : i32
    %484 = tpu.dynamic_rotate %405 by %c1_i32_57 dim 1 : vector<1x128xf32>, i32 -> vector<1x128xf32>
    %485 = arith.mulf %484, %5 : vector<1x128xf32>
    %c1_i32_58 = arith.constant 1 : i32
    %486 = tpu.dynamic_rotate %413 by %c1_i32_58 dim 1 : vector<1x128xf32>, i32 -> vector<1x128xf32>
    %487 = arith.mulf %486, %5 : vector<1x128xf32>
    %c127_i32_59 = arith.constant 127 : i32
    %488 = tpu.dynamic_rotate %441 by %c127_i32_59 dim 1 : vector<1x128xf32>, i32 -> vector<1x128xf32>
    %489 = arith.mulf %488, %9 : vector<1x128xf32>
    %c127_i32_60 = arith.constant 127 : i32
    %490 = tpu.dynamic_rotate %449 by %c127_i32_60 dim 1 : vector<1x128xf32>, i32 -> vector<1x128xf32>
    %491 = arith.mulf %490, %9 : vector<1x128xf32>
    %492 = arith.index_cast %c2_i32 : i32 to index
    %c0_61 = arith.constant 0 : index
    %493 = vector.load %arg3[%492, %c0_61] : memref<8x768xf32, #tpu.memory_space<vmem>>, vector<1x128xf32>
    tpu.vector_store %arg3[%492, %c0_61], %485 {strides = array<i32>} : memref<8x768xf32, #tpu.memory_space<vmem>>, vector<1x128xf32>,
    %494 = arith.index_cast %c2_i32 : i32 to index
    %c128_62 = arith.constant 128 : index
    %495 = vector.load %arg3[%494, %c128_62] : memref<8x768xf32, #tpu.memory_space<vmem>>, vector<1x128xf32>
    tpu.vector_store %arg3[%494, %c128_62], %487 {strides = array<i32>} : memref<8x768xf32, #tpu.memory_space<vmem>>, vector<1x128xf32>,
    %496 = arith.index_cast %c2_i32 : i32 to index
    %c256_63 = arith.constant 256 : index
    %497 = vector.load %arg3[%496, %c256_63] : memref<8x768xf32, #tpu.memory_space<vmem>>, vector<1x128xf32>
    tpu.vector_store %arg3[%496, %c256_63], %489 {strides = array<i32>} : memref<8x768xf32, #tpu.memory_space<vmem>>, vector<1x128xf32>,
    %498 = arith.index_cast %c2_i32 : i32 to index
    %c384_64 = arith.constant 384 : index
    %499 = vector.load %arg3[%498, %c384_64] : memref<8x768xf32, #tpu.memory_space<vmem>>, vector<1x128xf32>
    tpu.vector_store %arg3[%498, %c384_64], %491 {strides = array<i32>} : memref<8x768xf32, #tpu.memory_space<vmem>>, vector<1x128xf32>,
    %500 = arith.index_cast %c2_i32 : i32 to index
    %c512_65 = arith.constant 512 : index
    %501 = vector.load %arg3[%500, %c512_65] : memref<8x768xf32, #tpu.memory_space<vmem>>, vector<1x128xf32>
    tpu.vector_store %arg3[%500, %c512_65], %476 {strides = array<i32>} : memref<8x768xf32, #tpu.memory_space<vmem>>, vector<1x128xf32>,
    %502 = arith.index_cast %c2_i32 : i32 to index
    %c640_66 = arith.constant 640 : index
    %503 = vector.load %arg3[%502, %c640_66] : memref<8x768xf32, #tpu.memory_space<vmem>>, vector<1x128xf32>
    tpu.vector_store %arg3[%502, %c640_66], %483 {strides = array<i32>} : memref<8x768xf32, #tpu.memory_space<vmem>>, vector<1x128xf32>,
    %c3_i32 = arith.constant 3 : i32
    %504 = arith.addi %0, %c3_i32 : i32
    %c0_67 = arith.constant 0 : index
    %505 = arith.index_cast %504 : i32 to index
    %506 = memref.load %arg1[%c0_67, %505] : memref<7x8xf32, #tpu.memory_space<smem>>
    %c1_68 = arith.constant 1 : index
    %507 = arith.index_cast %504 : i32 to index
    %508 = memref.load %arg1[%c1_68, %507] : memref<7x8xf32, #tpu.memory_space<smem>>
    %c2_69 = arith.constant 2 : index
    %509 = arith.index_cast %504 : i32 to index
    %510 = memref.load %arg1[%c2_69, %509] : memref<7x8xf32, #tpu.memory_space<smem>>
    %c3_70 = arith.constant 3 : index
    %511 = arith.index_cast %504 : i32 to index
    %512 = memref.load %arg1[%c3_70, %511] : memref<7x8xf32, #tpu.memory_space<smem>>
    %c4_71 = arith.constant 4 : index
    %513 = arith.index_cast %504 : i32 to index
    %514 = memref.load %arg1[%c4_71, %513] : memref<7x8xf32, #tpu.memory_space<smem>>
    %c5_72 = arith.constant 5 : index
    %515 = arith.index_cast %504 : i32 to index
    %516 = memref.load %arg1[%c5_72, %515] : memref<7x8xf32, #tpu.memory_space<smem>>
    %c6_73 = arith.constant 6 : index
    %517 = arith.index_cast %504 : i32 to index
    %518 = memref.load %arg1[%c6_73, %517] : memref<7x8xf32, #tpu.memory_space<smem>>
    %cst_74 = arith.constant 0.000000e+00 : f32
    %519 = arith.subf %cst_74, %514 : f32
    %cst_75 = arith.constant 0.000000e+00 : f32
    %520 = arith.subf %cst_75, %518 : f32
    %521 = arith.mulf %485, %11 : vector<1x128xf32>
    %522 = arith.mulf %487, %13 : vector<1x128xf32>
    %523 = arith.subf %521, %522 : vector<1x128xf32>
    %524 = arith.mulf %485, %13 : vector<1x128xf32>
    %525 = arith.mulf %487, %11 : vector<1x128xf32>
    %526 = arith.addf %524, %525 : vector<1x128xf32>
    %527 = arith.mulf %489, %11 : vector<1x128xf32>
    %528 = arith.mulf %491, %16 : vector<1x128xf32>
    %529 = arith.subf %527, %528 : vector<1x128xf32>
    %530 = arith.mulf %489, %16 : vector<1x128xf32>
    %531 = arith.mulf %491, %11 : vector<1x128xf32>
    %532 = arith.addf %530, %531 : vector<1x128xf32>
    %533 = arith.mulf %18, %476 : vector<1x128xf32>
    %534 = arith.addf %533, %20 : vector<1x128xf32>
    %535 = arith.mulf %18, %483 : vector<1x128xf32>
    %536 = vector.broadcast %516 : f32 to vector<1x128xf32>
    %537 = arith.mulf %529, %536 : vector<1x128xf32>
    %538 = vector.broadcast %518 : f32 to vector<1x128xf32>
    %539 = arith.mulf %532, %538 : vector<1x128xf32>
    %540 = arith.addf %537, %539 : vector<1x128xf32>
    %541 = vector.broadcast %518 : f32 to vector<1x128xf32>
    %542 = arith.mulf %529, %541 : vector<1x128xf32>
    %543 = vector.broadcast %516 : f32 to vector<1x128xf32>
    %544 = arith.mulf %532, %543 : vector<1x128xf32>
    %545 = arith.subf %542, %544 : vector<1x128xf32>
    %546 = vector.broadcast %512 : f32 to vector<1x128xf32>
    %547 = arith.mulf %534, %546 : vector<1x128xf32>
    %548 = vector.broadcast %514 : f32 to vector<1x128xf32>
    %549 = arith.mulf %535, %548 : vector<1x128xf32>
    %550 = arith.subf %547, %549 : vector<1x128xf32>
    %551 = vector.broadcast %514 : f32 to vector<1x128xf32>
    %552 = arith.mulf %534, %551 : vector<1x128xf32>
    %553 = vector.broadcast %512 : f32 to vector<1x128xf32>
    %554 = arith.mulf %535, %553 : vector<1x128xf32>
    %555 = arith.addf %552, %554 : vector<1x128xf32>
    %556 = vector.broadcast %506 : f32 to vector<1x128xf32>
    %557 = arith.mulf %556, %523 : vector<1x128xf32>
    %558 = vector.broadcast %508 : f32 to vector<1x128xf32>
    %559 = arith.mulf %558, %540 : vector<1x128xf32>
    %560 = arith.addf %557, %559 : vector<1x128xf32>
    %561 = vector.broadcast %510 : f32 to vector<1x128xf32>
    %562 = arith.mulf %561, %555 : vector<1x128xf32>
    %563 = arith.subf %560, %562 : vector<1x128xf32>
    %564 = vector.broadcast %506 : f32 to vector<1x128xf32>
    %565 = arith.mulf %564, %526 : vector<1x128xf32>
    %566 = vector.broadcast %508 : f32 to vector<1x128xf32>
    %567 = arith.mulf %566, %545 : vector<1x128xf32>
    %568 = arith.addf %565, %567 : vector<1x128xf32>
    %569 = vector.broadcast %510 : f32 to vector<1x128xf32>
    %570 = arith.mulf %569, %550 : vector<1x128xf32>
    %571 = arith.addf %568, %570 : vector<1x128xf32>
    %572 = vector.broadcast %516 : f32 to vector<1x128xf32>
    %573 = arith.mulf %523, %572 : vector<1x128xf32>
    %574 = vector.broadcast %520 : f32 to vector<1x128xf32>
    %575 = arith.mulf %526, %574 : vector<1x128xf32>
    %576 = arith.addf %573, %575 : vector<1x128xf32>
    %577 = vector.broadcast %520 : f32 to vector<1x128xf32>
    %578 = arith.mulf %523, %577 : vector<1x128xf32>
    %579 = vector.broadcast %516 : f32 to vector<1x128xf32>
    %580 = arith.mulf %526, %579 : vector<1x128xf32>
    %581 = arith.subf %578, %580 : vector<1x128xf32>
    %582 = vector.broadcast %512 : f32 to vector<1x128xf32>
    %583 = arith.mulf %534, %582 : vector<1x128xf32>
    %584 = vector.broadcast %519 : f32 to vector<1x128xf32>
    %585 = arith.mulf %535, %584 : vector<1x128xf32>
    %586 = arith.subf %583, %585 : vector<1x128xf32>
    %587 = vector.broadcast %519 : f32 to vector<1x128xf32>
    %588 = arith.mulf %534, %587 : vector<1x128xf32>
    %589 = vector.broadcast %512 : f32 to vector<1x128xf32>
    %590 = arith.mulf %535, %589 : vector<1x128xf32>
    %591 = arith.addf %588, %590 : vector<1x128xf32>
    %592 = vector.broadcast %508 : f32 to vector<1x128xf32>
    %593 = arith.mulf %592, %576 : vector<1x128xf32>
    %594 = vector.broadcast %506 : f32 to vector<1x128xf32>
    %595 = arith.mulf %594, %529 : vector<1x128xf32>
    %596 = arith.addf %593, %595 : vector<1x128xf32>
    %597 = vector.broadcast %510 : f32 to vector<1x128xf32>
    %598 = arith.mulf %597, %591 : vector<1x128xf32>
    %599 = arith.addf %596, %598 : vector<1x128xf32>
    %600 = vector.broadcast %508 : f32 to vector<1x128xf32>
    %601 = arith.mulf %600, %581 : vector<1x128xf32>
    %602 = vector.broadcast %506 : f32 to vector<1x128xf32>
    %603 = arith.mulf %602, %532 : vector<1x128xf32>
    %604 = arith.addf %601, %603 : vector<1x128xf32>
    %605 = vector.broadcast %510 : f32 to vector<1x128xf32>
    %606 = arith.mulf %605, %586 : vector<1x128xf32>
    %607 = arith.subf %604, %606 : vector<1x128xf32>
    %608 = vector.broadcast %512 : f32 to vector<1x128xf32>
    %609 = arith.mulf %523, %608 : vector<1x128xf32>
    %610 = vector.broadcast %519 : f32 to vector<1x128xf32>
    %611 = arith.mulf %526, %610 : vector<1x128xf32>
    %612 = arith.subf %609, %611 : vector<1x128xf32>
    %613 = vector.broadcast %519 : f32 to vector<1x128xf32>
    %614 = arith.mulf %523, %613 : vector<1x128xf32>
    %615 = vector.broadcast %512 : f32 to vector<1x128xf32>
    %616 = arith.mulf %526, %615 : vector<1x128xf32>
    %617 = arith.addf %614, %616 : vector<1x128xf32>
    %618 = vector.broadcast %512 : f32 to vector<1x128xf32>
    %619 = arith.mulf %529, %618 : vector<1x128xf32>
    %620 = vector.broadcast %514 : f32 to vector<1x128xf32>
    %621 = arith.mulf %532, %620 : vector<1x128xf32>
    %622 = arith.subf %619, %621 : vector<1x128xf32>
    %623 = vector.broadcast %514 : f32 to vector<1x128xf32>
    %624 = arith.mulf %529, %623 : vector<1x128xf32>
    %625 = vector.broadcast %512 : f32 to vector<1x128xf32>
    %626 = arith.mulf %532, %625 : vector<1x128xf32>
    %627 = arith.addf %624, %626 : vector<1x128xf32>
    %628 = arith.subf %506, %508 : f32
    %629 = arith.subf %617, %627 : vector<1x128xf32>
    %630 = vector.broadcast %510 : f32 to vector<1x128xf32>
    %631 = arith.mulf %630, %629 : vector<1x128xf32>
    %632 = vector.broadcast %628 : f32 to vector<1x128xf32>
    %633 = arith.mulf %632, %534 : vector<1x128xf32>
    %634 = arith.addf %631, %633 : vector<1x128xf32>
    %cst_76 = arith.constant 0.000000e+00 : f32
    %635 = arith.subf %cst_76, %510 : f32
    %636 = arith.subf %612, %622 : vector<1x128xf32>
    %637 = vector.broadcast %635 : f32 to vector<1x128xf32>
    %638 = arith.mulf %637, %636 : vector<1x128xf32>
    %639 = vector.broadcast %628 : f32 to vector<1x128xf32>
    %640 = arith.mulf %639, %535 : vector<1x128xf32>
    %641 = arith.addf %638, %640 : vector<1x128xf32>
    %c1_i32_77 = arith.constant 1 : i32
    %642 = tpu.dynamic_rotate %563 by %c1_i32_77 dim 1 : vector<1x128xf32>, i32 -> vector<1x128xf32>
    %643 = arith.mulf %642, %5 : vector<1x128xf32>
    %c1_i32_78 = arith.constant 1 : i32
    %644 = tpu.dynamic_rotate %571 by %c1_i32_78 dim 1 : vector<1x128xf32>, i32 -> vector<1x128xf32>
    %645 = arith.mulf %644, %5 : vector<1x128xf32>
    %c127_i32_79 = arith.constant 127 : i32
    %646 = tpu.dynamic_rotate %599 by %c127_i32_79 dim 1 : vector<1x128xf32>, i32 -> vector<1x128xf32>
    %647 = arith.mulf %646, %9 : vector<1x128xf32>
    %c127_i32_80 = arith.constant 127 : i32
    %648 = tpu.dynamic_rotate %607 by %c127_i32_80 dim 1 : vector<1x128xf32>, i32 -> vector<1x128xf32>
    %649 = arith.mulf %648, %9 : vector<1x128xf32>
    %650 = arith.index_cast %c3_i32 : i32 to index
    %c0_81 = arith.constant 0 : index
    %651 = vector.load %arg3[%650, %c0_81] : memref<8x768xf32, #tpu.memory_space<vmem>>, vector<1x128xf32>
    tpu.vector_store %arg3[%650, %c0_81], %643 {strides = array<i32>} : memref<8x768xf32, #tpu.memory_space<vmem>>, vector<1x128xf32>,
    %652 = arith.index_cast %c3_i32 : i32 to index
    %c128_82 = arith.constant 128 : index
    %653 = vector.load %arg3[%652, %c128_82] : memref<8x768xf32, #tpu.memory_space<vmem>>, vector<1x128xf32>
    tpu.vector_store %arg3[%652, %c128_82], %645 {strides = array<i32>} : memref<8x768xf32, #tpu.memory_space<vmem>>, vector<1x128xf32>,
    %654 = arith.index_cast %c3_i32 : i32 to index
    %c256_83 = arith.constant 256 : index
    %655 = vector.load %arg3[%654, %c256_83] : memref<8x768xf32, #tpu.memory_space<vmem>>, vector<1x128xf32>
    tpu.vector_store %arg3[%654, %c256_83], %647 {strides = array<i32>} : memref<8x768xf32, #tpu.memory_space<vmem>>, vector<1x128xf32>,
    %656 = arith.index_cast %c3_i32 : i32 to index
    %c384_84 = arith.constant 384 : index
    %657 = vector.load %arg3[%656, %c384_84] : memref<8x768xf32, #tpu.memory_space<vmem>>, vector<1x128xf32>
    tpu.vector_store %arg3[%656, %c384_84], %649 {strides = array<i32>} : memref<8x768xf32, #tpu.memory_space<vmem>>, vector<1x128xf32>,
    %658 = arith.index_cast %c3_i32 : i32 to index
    %c512_85 = arith.constant 512 : index
    %659 = vector.load %arg3[%658, %c512_85] : memref<8x768xf32, #tpu.memory_space<vmem>>, vector<1x128xf32>
    tpu.vector_store %arg3[%658, %c512_85], %634 {strides = array<i32>} : memref<8x768xf32, #tpu.memory_space<vmem>>, vector<1x128xf32>,
    %660 = arith.index_cast %c3_i32 : i32 to index
    %c640_86 = arith.constant 640 : index
    %661 = vector.load %arg3[%660, %c640_86] : memref<8x768xf32, #tpu.memory_space<vmem>>, vector<1x128xf32>
    tpu.vector_store %arg3[%660, %c640_86], %641 {strides = array<i32>} : memref<8x768xf32, #tpu.memory_space<vmem>>, vector<1x128xf32>,
    %c4_i32 = arith.constant 4 : i32
    %662 = arith.addi %0, %c4_i32 : i32
    %c0_87 = arith.constant 0 : index
    %663 = arith.index_cast %662 : i32 to index
    %664 = memref.load %arg1[%c0_87, %663] : memref<7x8xf32, #tpu.memory_space<smem>>
    %c1_88 = arith.constant 1 : index
    %665 = arith.index_cast %662 : i32 to index
    %666 = memref.load %arg1[%c1_88, %665] : memref<7x8xf32, #tpu.memory_space<smem>>
    %c2_89 = arith.constant 2 : index
    %667 = arith.index_cast %662 : i32 to index
    %668 = memref.load %arg1[%c2_89, %667] : memref<7x8xf32, #tpu.memory_space<smem>>
    %c3_90 = arith.constant 3 : index
    %669 = arith.index_cast %662 : i32 to index
    %670 = memref.load %arg1[%c3_90, %669] : memref<7x8xf32, #tpu.memory_space<smem>>
    %c4_91 = arith.constant 4 : index
    %671 = arith.index_cast %662 : i32 to index
    %672 = memref.load %arg1[%c4_91, %671] : memref<7x8xf32, #tpu.memory_space<smem>>
    %c5_92 = arith.constant 5 : index
    %673 = arith.index_cast %662 : i32 to index
    %674 = memref.load %arg1[%c5_92, %673] : memref<7x8xf32, #tpu.memory_space<smem>>
    %c6_93 = arith.constant 6 : index
    %675 = arith.index_cast %662 : i32 to index
    %676 = memref.load %arg1[%c6_93, %675] : memref<7x8xf32, #tpu.memory_space<smem>>
    %cst_94 = arith.constant 0.000000e+00 : f32
    %677 = arith.subf %cst_94, %672 : f32
    %cst_95 = arith.constant 0.000000e+00 : f32
    %678 = arith.subf %cst_95, %676 : f32
    %679 = arith.mulf %643, %11 : vector<1x128xf32>
    %680 = arith.mulf %645, %13 : vector<1x128xf32>
    %681 = arith.subf %679, %680 : vector<1x128xf32>
    %682 = arith.mulf %643, %13 : vector<1x128xf32>
    %683 = arith.mulf %645, %11 : vector<1x128xf32>
    %684 = arith.addf %682, %683 : vector<1x128xf32>
    %685 = arith.mulf %647, %11 : vector<1x128xf32>
    %686 = arith.mulf %649, %16 : vector<1x128xf32>
    %687 = arith.subf %685, %686 : vector<1x128xf32>
    %688 = arith.mulf %647, %16 : vector<1x128xf32>
    %689 = arith.mulf %649, %11 : vector<1x128xf32>
    %690 = arith.addf %688, %689 : vector<1x128xf32>
    %691 = arith.mulf %18, %634 : vector<1x128xf32>
    %692 = arith.addf %691, %20 : vector<1x128xf32>
    %693 = arith.mulf %18, %641 : vector<1x128xf32>
    %694 = vector.broadcast %674 : f32 to vector<1x128xf32>
    %695 = arith.mulf %687, %694 : vector<1x128xf32>
    %696 = vector.broadcast %676 : f32 to vector<1x128xf32>
    %697 = arith.mulf %690, %696 : vector<1x128xf32>
    %698 = arith.addf %695, %697 : vector<1x128xf32>
    %699 = vector.broadcast %676 : f32 to vector<1x128xf32>
    %700 = arith.mulf %687, %699 : vector<1x128xf32>
    %701 = vector.broadcast %674 : f32 to vector<1x128xf32>
    %702 = arith.mulf %690, %701 : vector<1x128xf32>
    %703 = arith.subf %700, %702 : vector<1x128xf32>
    %704 = vector.broadcast %670 : f32 to vector<1x128xf32>
    %705 = arith.mulf %692, %704 : vector<1x128xf32>
    %706 = vector.broadcast %672 : f32 to vector<1x128xf32>
    %707 = arith.mulf %693, %706 : vector<1x128xf32>
    %708 = arith.subf %705, %707 : vector<1x128xf32>
    %709 = vector.broadcast %672 : f32 to vector<1x128xf32>
    %710 = arith.mulf %692, %709 : vector<1x128xf32>
    %711 = vector.broadcast %670 : f32 to vector<1x128xf32>
    %712 = arith.mulf %693, %711 : vector<1x128xf32>
    %713 = arith.addf %710, %712 : vector<1x128xf32>
    %714 = vector.broadcast %664 : f32 to vector<1x128xf32>
    %715 = arith.mulf %714, %681 : vector<1x128xf32>
    %716 = vector.broadcast %666 : f32 to vector<1x128xf32>
    %717 = arith.mulf %716, %698 : vector<1x128xf32>
    %718 = arith.addf %715, %717 : vector<1x128xf32>
    %719 = vector.broadcast %668 : f32 to vector<1x128xf32>
    %720 = arith.mulf %719, %713 : vector<1x128xf32>
    %721 = arith.subf %718, %720 : vector<1x128xf32>
    %722 = vector.broadcast %664 : f32 to vector<1x128xf32>
    %723 = arith.mulf %722, %684 : vector<1x128xf32>
    %724 = vector.broadcast %666 : f32 to vector<1x128xf32>
    %725 = arith.mulf %724, %703 : vector<1x128xf32>
    %726 = arith.addf %723, %725 : vector<1x128xf32>
    %727 = vector.broadcast %668 : f32 to vector<1x128xf32>
    %728 = arith.mulf %727, %708 : vector<1x128xf32>
    %729 = arith.addf %726, %728 : vector<1x128xf32>
    %730 = vector.broadcast %674 : f32 to vector<1x128xf32>
    %731 = arith.mulf %681, %730 : vector<1x128xf32>
    %732 = vector.broadcast %678 : f32 to vector<1x128xf32>
    %733 = arith.mulf %684, %732 : vector<1x128xf32>
    %734 = arith.addf %731, %733 : vector<1x128xf32>
    %735 = vector.broadcast %678 : f32 to vector<1x128xf32>
    %736 = arith.mulf %681, %735 : vector<1x128xf32>
    %737 = vector.broadcast %674 : f32 to vector<1x128xf32>
    %738 = arith.mulf %684, %737 : vector<1x128xf32>
    %739 = arith.subf %736, %738 : vector<1x128xf32>
    %740 = vector.broadcast %670 : f32 to vector<1x128xf32>
    %741 = arith.mulf %692, %740 : vector<1x128xf32>
    %742 = vector.broadcast %677 : f32 to vector<1x128xf32>
    %743 = arith.mulf %693, %742 : vector<1x128xf32>
    %744 = arith.subf %741, %743 : vector<1x128xf32>
    %745 = vector.broadcast %677 : f32 to vector<1x128xf32>
    %746 = arith.mulf %692, %745 : vector<1x128xf32>
    %747 = vector.broadcast %670 : f32 to vector<1x128xf32>
    %748 = arith.mulf %693, %747 : vector<1x128xf32>
    %749 = arith.addf %746, %748 : vector<1x128xf32>
    %750 = vector.broadcast %666 : f32 to vector<1x128xf32>
    %751 = arith.mulf %750, %734 : vector<1x128xf32>
    %752 = vector.broadcast %664 : f32 to vector<1x128xf32>
    %753 = arith.mulf %752, %687 : vector<1x128xf32>
    %754 = arith.addf %751, %753 : vector<1x128xf32>
    %755 = vector.broadcast %668 : f32 to vector<1x128xf32>
    %756 = arith.mulf %755, %749 : vector<1x128xf32>
    %757 = arith.addf %754, %756 : vector<1x128xf32>
    %758 = vector.broadcast %666 : f32 to vector<1x128xf32>
    %759 = arith.mulf %758, %739 : vector<1x128xf32>
    %760 = vector.broadcast %664 : f32 to vector<1x128xf32>
    %761 = arith.mulf %760, %690 : vector<1x128xf32>
    %762 = arith.addf %759, %761 : vector<1x128xf32>
    %763 = vector.broadcast %668 : f32 to vector<1x128xf32>
    %764 = arith.mulf %763, %744 : vector<1x128xf32>
    %765 = arith.subf %762, %764 : vector<1x128xf32>
    %766 = vector.broadcast %670 : f32 to vector<1x128xf32>
    %767 = arith.mulf %681, %766 : vector<1x128xf32>
    %768 = vector.broadcast %677 : f32 to vector<1x128xf32>
    %769 = arith.mulf %684, %768 : vector<1x128xf32>
    %770 = arith.subf %767, %769 : vector<1x128xf32>
    %771 = vector.broadcast %677 : f32 to vector<1x128xf32>
    %772 = arith.mulf %681, %771 : vector<1x128xf32>
    %773 = vector.broadcast %670 : f32 to vector<1x128xf32>
    %774 = arith.mulf %684, %773 : vector<1x128xf32>
    %775 = arith.addf %772, %774 : vector<1x128xf32>
    %776 = vector.broadcast %670 : f32 to vector<1x128xf32>
    %777 = arith.mulf %687, %776 : vector<1x128xf32>
    %778 = vector.broadcast %672 : f32 to vector<1x128xf32>
    %779 = arith.mulf %690, %778 : vector<1x128xf32>
    %780 = arith.subf %777, %779 : vector<1x128xf32>
    %781 = vector.broadcast %672 : f32 to vector<1x128xf32>
    %782 = arith.mulf %687, %781 : vector<1x128xf32>
    %783 = vector.broadcast %670 : f32 to vector<1x128xf32>
    %784 = arith.mulf %690, %783 : vector<1x128xf32>
    %785 = arith.addf %782, %784 : vector<1x128xf32>
    %786 = arith.subf %664, %666 : f32
    %787 = arith.subf %775, %785 : vector<1x128xf32>
    %788 = vector.broadcast %668 : f32 to vector<1x128xf32>
    %789 = arith.mulf %788, %787 : vector<1x128xf32>
    %790 = vector.broadcast %786 : f32 to vector<1x128xf32>
    %791 = arith.mulf %790, %692 : vector<1x128xf32>
    %792 = arith.addf %789, %791 : vector<1x128xf32>
    %cst_96 = arith.constant 0.000000e+00 : f32
    %793 = arith.subf %cst_96, %668 : f32
    %794 = arith.subf %770, %780 : vector<1x128xf32>
    %795 = vector.broadcast %793 : f32 to vector<1x128xf32>
    %796 = arith.mulf %795, %794 : vector<1x128xf32>
    %797 = vector.broadcast %786 : f32 to vector<1x128xf32>
    %798 = arith.mulf %797, %693 : vector<1x128xf32>
    %799 = arith.addf %796, %798 : vector<1x128xf32>
    %c1_i32_97 = arith.constant 1 : i32
    %800 = tpu.dynamic_rotate %721 by %c1_i32_97 dim 1 : vector<1x128xf32>, i32 -> vector<1x128xf32>
    %801 = arith.mulf %800, %5 : vector<1x128xf32>
    %c1_i32_98 = arith.constant 1 : i32
    %802 = tpu.dynamic_rotate %729 by %c1_i32_98 dim 1 : vector<1x128xf32>, i32 -> vector<1x128xf32>
    %803 = arith.mulf %802, %5 : vector<1x128xf32>
    %c127_i32_99 = arith.constant 127 : i32
    %804 = tpu.dynamic_rotate %757 by %c127_i32_99 dim 1 : vector<1x128xf32>, i32 -> vector<1x128xf32>
    %805 = arith.mulf %804, %9 : vector<1x128xf32>
    %c127_i32_100 = arith.constant 127 : i32
    %806 = tpu.dynamic_rotate %765 by %c127_i32_100 dim 1 : vector<1x128xf32>, i32 -> vector<1x128xf32>
    %807 = arith.mulf %806, %9 : vector<1x128xf32>
    %808 = arith.index_cast %c4_i32 : i32 to index
    %c0_101 = arith.constant 0 : index
    %809 = vector.load %arg3[%808, %c0_101] : memref<8x768xf32, #tpu.memory_space<vmem>>, vector<1x128xf32>
    tpu.vector_store %arg3[%808, %c0_101], %801 {strides = array<i32>} : memref<8x768xf32, #tpu.memory_space<vmem>>, vector<1x128xf32>,
    %810 = arith.index_cast %c4_i32 : i32 to index
    %c128_102 = arith.constant 128 : index
    %811 = vector.load %arg3[%810, %c128_102] : memref<8x768xf32, #tpu.memory_space<vmem>>, vector<1x128xf32>
    tpu.vector_store %arg3[%810, %c128_102], %803 {strides = array<i32>} : memref<8x768xf32, #tpu.memory_space<vmem>>, vector<1x128xf32>,
    %812 = arith.index_cast %c4_i32 : i32 to index
    %c256_103 = arith.constant 256 : index
    %813 = vector.load %arg3[%812, %c256_103] : memref<8x768xf32, #tpu.memory_space<vmem>>, vector<1x128xf32>
    tpu.vector_store %arg3[%812, %c256_103], %805 {strides = array<i32>} : memref<8x768xf32, #tpu.memory_space<vmem>>, vector<1x128xf32>,
    %814 = arith.index_cast %c4_i32 : i32 to index
    %c384_104 = arith.constant 384 : index
    %815 = vector.load %arg3[%814, %c384_104] : memref<8x768xf32, #tpu.memory_space<vmem>>, vector<1x128xf32>
    tpu.vector_store %arg3[%814, %c384_104], %807 {strides = array<i32>} : memref<8x768xf32, #tpu.memory_space<vmem>>, vector<1x128xf32>,
    %816 = arith.index_cast %c4_i32 : i32 to index
    %c512_105 = arith.constant 512 : index
    %817 = vector.load %arg3[%816, %c512_105] : memref<8x768xf32, #tpu.memory_space<vmem>>, vector<1x128xf32>
    tpu.vector_store %arg3[%816, %c512_105], %792 {strides = array<i32>} : memref<8x768xf32, #tpu.memory_space<vmem>>, vector<1x128xf32>,
    %818 = arith.index_cast %c4_i32 : i32 to index
    %c640_106 = arith.constant 640 : index
    %819 = vector.load %arg3[%818, %c640_106] : memref<8x768xf32, #tpu.memory_space<vmem>>, vector<1x128xf32>
    tpu.vector_store %arg3[%818, %c640_106], %799 {strides = array<i32>} : memref<8x768xf32, #tpu.memory_space<vmem>>, vector<1x128xf32>,
    %c5_i32 = arith.constant 5 : i32
    %820 = arith.addi %0, %c5_i32 : i32
    %c0_107 = arith.constant 0 : index
    %821 = arith.index_cast %820 : i32 to index
    %822 = memref.load %arg1[%c0_107, %821] : memref<7x8xf32, #tpu.memory_space<smem>>
    %c1_108 = arith.constant 1 : index
    %823 = arith.index_cast %820 : i32 to index
    %824 = memref.load %arg1[%c1_108, %823] : memref<7x8xf32, #tpu.memory_space<smem>>
    %c2_109 = arith.constant 2 : index
    %825 = arith.index_cast %820 : i32 to index
    %826 = memref.load %arg1[%c2_109, %825] : memref<7x8xf32, #tpu.memory_space<smem>>
    %c3_110 = arith.constant 3 : index
    %827 = arith.index_cast %820 : i32 to index
    %828 = memref.load %arg1[%c3_110, %827] : memref<7x8xf32, #tpu.memory_space<smem>>
    %c4_111 = arith.constant 4 : index
    %829 = arith.index_cast %820 : i32 to index
    %830 = memref.load %arg1[%c4_111, %829] : memref<7x8xf32, #tpu.memory_space<smem>>
    %c5_112 = arith.constant 5 : index
    %831 = arith.index_cast %820 : i32 to index
    %832 = memref.load %arg1[%c5_112, %831] : memref<7x8xf32, #tpu.memory_space<smem>>
    %c6_113 = arith.constant 6 : index
    %833 = arith.index_cast %820 : i32 to index
    %834 = memref.load %arg1[%c6_113, %833] : memref<7x8xf32, #tpu.memory_space<smem>>
    %cst_114 = arith.constant 0.000000e+00 : f32
    %835 = arith.subf %cst_114, %830 : f32
    %cst_115 = arith.constant 0.000000e+00 : f32
    %836 = arith.subf %cst_115, %834 : f32
    %837 = arith.mulf %801, %11 : vector<1x128xf32>
    %838 = arith.mulf %803, %13 : vector<1x128xf32>
    %839 = arith.subf %837, %838 : vector<1x128xf32>
    %840 = arith.mulf %801, %13 : vector<1x128xf32>
    %841 = arith.mulf %803, %11 : vector<1x128xf32>
    %842 = arith.addf %840, %841 : vector<1x128xf32>
    %843 = arith.mulf %805, %11 : vector<1x128xf32>
    %844 = arith.mulf %807, %16 : vector<1x128xf32>
    %845 = arith.subf %843, %844 : vector<1x128xf32>
    %846 = arith.mulf %805, %16 : vector<1x128xf32>
    %847 = arith.mulf %807, %11 : vector<1x128xf32>
    %848 = arith.addf %846, %847 : vector<1x128xf32>
    %849 = arith.mulf %18, %792 : vector<1x128xf32>
    %850 = arith.addf %849, %20 : vector<1x128xf32>
    %851 = arith.mulf %18, %799 : vector<1x128xf32>
    %852 = vector.broadcast %832 : f32 to vector<1x128xf32>
    %853 = arith.mulf %845, %852 : vector<1x128xf32>
    %854 = vector.broadcast %834 : f32 to vector<1x128xf32>
    %855 = arith.mulf %848, %854 : vector<1x128xf32>
    %856 = arith.addf %853, %855 : vector<1x128xf32>
    %857 = vector.broadcast %834 : f32 to vector<1x128xf32>
    %858 = arith.mulf %845, %857 : vector<1x128xf32>
    %859 = vector.broadcast %832 : f32 to vector<1x128xf32>
    %860 = arith.mulf %848, %859 : vector<1x128xf32>
    %861 = arith.subf %858, %860 : vector<1x128xf32>
    %862 = vector.broadcast %828 : f32 to vector<1x128xf32>
    %863 = arith.mulf %850, %862 : vector<1x128xf32>
    %864 = vector.broadcast %830 : f32 to vector<1x128xf32>
    %865 = arith.mulf %851, %864 : vector<1x128xf32>
    %866 = arith.subf %863, %865 : vector<1x128xf32>
    %867 = vector.broadcast %830 : f32 to vector<1x128xf32>
    %868 = arith.mulf %850, %867 : vector<1x128xf32>
    %869 = vector.broadcast %828 : f32 to vector<1x128xf32>
    %870 = arith.mulf %851, %869 : vector<1x128xf32>
    %871 = arith.addf %868, %870 : vector<1x128xf32>
    %872 = vector.broadcast %822 : f32 to vector<1x128xf32>
    %873 = arith.mulf %872, %839 : vector<1x128xf32>
    %874 = vector.broadcast %824 : f32 to vector<1x128xf32>
    %875 = arith.mulf %874, %856 : vector<1x128xf32>
    %876 = arith.addf %873, %875 : vector<1x128xf32>
    %877 = vector.broadcast %826 : f32 to vector<1x128xf32>
    %878 = arith.mulf %877, %871 : vector<1x128xf32>
    %879 = arith.subf %876, %878 : vector<1x128xf32>
    %880 = vector.broadcast %822 : f32 to vector<1x128xf32>
    %881 = arith.mulf %880, %842 : vector<1x128xf32>
    %882 = vector.broadcast %824 : f32 to vector<1x128xf32>
    %883 = arith.mulf %882, %861 : vector<1x128xf32>
    %884 = arith.addf %881, %883 : vector<1x128xf32>
    %885 = vector.broadcast %826 : f32 to vector<1x128xf32>
    %886 = arith.mulf %885, %866 : vector<1x128xf32>
    %887 = arith.addf %884, %886 : vector<1x128xf32>
    %888 = vector.broadcast %832 : f32 to vector<1x128xf32>
    %889 = arith.mulf %839, %888 : vector<1x128xf32>
    %890 = vector.broadcast %836 : f32 to vector<1x128xf32>
    %891 = arith.mulf %842, %890 : vector<1x128xf32>
    %892 = arith.addf %889, %891 : vector<1x128xf32>
    %893 = vector.broadcast %836 : f32 to vector<1x128xf32>
    %894 = arith.mulf %839, %893 : vector<1x128xf32>
    %895 = vector.broadcast %832 : f32 to vector<1x128xf32>
    %896 = arith.mulf %842, %895 : vector<1x128xf32>
    %897 = arith.subf %894, %896 : vector<1x128xf32>
    %898 = vector.broadcast %828 : f32 to vector<1x128xf32>
    %899 = arith.mulf %850, %898 : vector<1x128xf32>
    %900 = vector.broadcast %835 : f32 to vector<1x128xf32>
    %901 = arith.mulf %851, %900 : vector<1x128xf32>
    %902 = arith.subf %899, %901 : vector<1x128xf32>
    %903 = vector.broadcast %835 : f32 to vector<1x128xf32>
    %904 = arith.mulf %850, %903 : vector<1x128xf32>
    %905 = vector.broadcast %828 : f32 to vector<1x128xf32>
    %906 = arith.mulf %851, %905 : vector<1x128xf32>
    %907 = arith.addf %904, %906 : vector<1x128xf32>
    %908 = vector.broadcast %824 : f32 to vector<1x128xf32>
    %909 = arith.mulf %908, %892 : vector<1x128xf32>
    %910 = vector.broadcast %822 : f32 to vector<1x128xf32>
    %911 = arith.mulf %910, %845 : vector<1x128xf32>
    %912 = arith.addf %909, %911 : vector<1x128xf32>
    %913 = vector.broadcast %826 : f32 to vector<1x128xf32>
    %914 = arith.mulf %913, %907 : vector<1x128xf32>
    %915 = arith.addf %912, %914 : vector<1x128xf32>
    %916 = vector.broadcast %824 : f32 to vector<1x128xf32>
    %917 = arith.mulf %916, %897 : vector<1x128xf32>
    %918 = vector.broadcast %822 : f32 to vector<1x128xf32>
    %919 = arith.mulf %918, %848 : vector<1x128xf32>
    %920 = arith.addf %917, %919 : vector<1x128xf32>
    %921 = vector.broadcast %826 : f32 to vector<1x128xf32>
    %922 = arith.mulf %921, %902 : vector<1x128xf32>
    %923 = arith.subf %920, %922 : vector<1x128xf32>
    %924 = vector.broadcast %828 : f32 to vector<1x128xf32>
    %925 = arith.mulf %839, %924 : vector<1x128xf32>
    %926 = vector.broadcast %835 : f32 to vector<1x128xf32>
    %927 = arith.mulf %842, %926 : vector<1x128xf32>
    %928 = arith.subf %925, %927 : vector<1x128xf32>
    %929 = vector.broadcast %835 : f32 to vector<1x128xf32>
    %930 = arith.mulf %839, %929 : vector<1x128xf32>
    %931 = vector.broadcast %828 : f32 to vector<1x128xf32>
    %932 = arith.mulf %842, %931 : vector<1x128xf32>
    %933 = arith.addf %930, %932 : vector<1x128xf32>
    %934 = vector.broadcast %828 : f32 to vector<1x128xf32>
    %935 = arith.mulf %845, %934 : vector<1x128xf32>
    %936 = vector.broadcast %830 : f32 to vector<1x128xf32>
    %937 = arith.mulf %848, %936 : vector<1x128xf32>
    %938 = arith.subf %935, %937 : vector<1x128xf32>
    %939 = vector.broadcast %830 : f32 to vector<1x128xf32>
    %940 = arith.mulf %845, %939 : vector<1x128xf32>
    %941 = vector.broadcast %828 : f32 to vector<1x128xf32>
    %942 = arith.mulf %848, %941 : vector<1x128xf32>
    %943 = arith.addf %940, %942 : vector<1x128xf32>
    %944 = arith.subf %822, %824 : f32
    %945 = arith.subf %933, %943 : vector<1x128xf32>
    %946 = vector.broadcast %826 : f32 to vector<1x128xf32>
    %947 = arith.mulf %946, %945 : vector<1x128xf32>
    %948 = vector.broadcast %944 : f32 to vector<1x128xf32>
    %949 = arith.mulf %948, %850 : vector<1x128xf32>
    %950 = arith.addf %947, %949 : vector<1x128xf32>
    %cst_116 = arith.constant 0.000000e+00 : f32
    %951 = arith.subf %cst_116, %826 : f32
    %952 = arith.subf %928, %938 : vector<1x128xf32>
    %953 = vector.broadcast %951 : f32 to vector<1x128xf32>
    %954 = arith.mulf %953, %952 : vector<1x128xf32>
    %955 = vector.broadcast %944 : f32 to vector<1x128xf32>
    %956 = arith.mulf %955, %851 : vector<1x128xf32>
    %957 = arith.addf %954, %956 : vector<1x128xf32>
    %c1_i32_117 = arith.constant 1 : i32
    %958 = tpu.dynamic_rotate %879 by %c1_i32_117 dim 1 : vector<1x128xf32>, i32 -> vector<1x128xf32>
    %959 = arith.mulf %958, %5 : vector<1x128xf32>
    %c1_i32_118 = arith.constant 1 : i32
    %960 = tpu.dynamic_rotate %887 by %c1_i32_118 dim 1 : vector<1x128xf32>, i32 -> vector<1x128xf32>
    %961 = arith.mulf %960, %5 : vector<1x128xf32>
    %c127_i32_119 = arith.constant 127 : i32
    %962 = tpu.dynamic_rotate %915 by %c127_i32_119 dim 1 : vector<1x128xf32>, i32 -> vector<1x128xf32>
    %963 = arith.mulf %962, %9 : vector<1x128xf32>
    %c127_i32_120 = arith.constant 127 : i32
    %964 = tpu.dynamic_rotate %923 by %c127_i32_120 dim 1 : vector<1x128xf32>, i32 -> vector<1x128xf32>
    %965 = arith.mulf %964, %9 : vector<1x128xf32>
    %966 = arith.index_cast %c5_i32 : i32 to index
    %c0_121 = arith.constant 0 : index
    %967 = vector.load %arg3[%966, %c0_121] : memref<8x768xf32, #tpu.memory_space<vmem>>, vector<1x128xf32>
    tpu.vector_store %arg3[%966, %c0_121], %959 {strides = array<i32>} : memref<8x768xf32, #tpu.memory_space<vmem>>, vector<1x128xf32>,
    %968 = arith.index_cast %c5_i32 : i32 to index
    %c128_122 = arith.constant 128 : index
    %969 = vector.load %arg3[%968, %c128_122] : memref<8x768xf32, #tpu.memory_space<vmem>>, vector<1x128xf32>
    tpu.vector_store %arg3[%968, %c128_122], %961 {strides = array<i32>} : memref<8x768xf32, #tpu.memory_space<vmem>>, vector<1x128xf32>,
    %970 = arith.index_cast %c5_i32 : i32 to index
    %c256_123 = arith.constant 256 : index
    %971 = vector.load %arg3[%970, %c256_123] : memref<8x768xf32, #tpu.memory_space<vmem>>, vector<1x128xf32>
    tpu.vector_store %arg3[%970, %c256_123], %963 {strides = array<i32>} : memref<8x768xf32, #tpu.memory_space<vmem>>, vector<1x128xf32>,
    %972 = arith.index_cast %c5_i32 : i32 to index
    %c384_124 = arith.constant 384 : index
    %973 = vector.load %arg3[%972, %c384_124] : memref<8x768xf32, #tpu.memory_space<vmem>>, vector<1x128xf32>
    tpu.vector_store %arg3[%972, %c384_124], %965 {strides = array<i32>} : memref<8x768xf32, #tpu.memory_space<vmem>>, vector<1x128xf32>,
    %974 = arith.index_cast %c5_i32 : i32 to index
    %c512_125 = arith.constant 512 : index
    %975 = vector.load %arg3[%974, %c512_125] : memref<8x768xf32, #tpu.memory_space<vmem>>, vector<1x128xf32>
    tpu.vector_store %arg3[%974, %c512_125], %950 {strides = array<i32>} : memref<8x768xf32, #tpu.memory_space<vmem>>, vector<1x128xf32>,
    %976 = arith.index_cast %c5_i32 : i32 to index
    %c640_126 = arith.constant 640 : index
    %977 = vector.load %arg3[%976, %c640_126] : memref<8x768xf32, #tpu.memory_space<vmem>>, vector<1x128xf32>
    tpu.vector_store %arg3[%976, %c640_126], %957 {strides = array<i32>} : memref<8x768xf32, #tpu.memory_space<vmem>>, vector<1x128xf32>,
    %c6_i32 = arith.constant 6 : i32
    %978 = arith.addi %0, %c6_i32 : i32
    %c0_127 = arith.constant 0 : index
    %979 = arith.index_cast %978 : i32 to index
    %980 = memref.load %arg1[%c0_127, %979] : memref<7x8xf32, #tpu.memory_space<smem>>
    %c1_128 = arith.constant 1 : index
    %981 = arith.index_cast %978 : i32 to index
    %982 = memref.load %arg1[%c1_128, %981] : memref<7x8xf32, #tpu.memory_space<smem>>
    %c2_129 = arith.constant 2 : index
    %983 = arith.index_cast %978 : i32 to index
    %984 = memref.load %arg1[%c2_129, %983] : memref<7x8xf32, #tpu.memory_space<smem>>
    %c3_130 = arith.constant 3 : index
    %985 = arith.index_cast %978 : i32 to index
    %986 = memref.load %arg1[%c3_130, %985] : memref<7x8xf32, #tpu.memory_space<smem>>
    %c4_131 = arith.constant 4 : index
    %987 = arith.index_cast %978 : i32 to index
    %988 = memref.load %arg1[%c4_131, %987] : memref<7x8xf32, #tpu.memory_space<smem>>
    %c5_132 = arith.constant 5 : index
    %989 = arith.index_cast %978 : i32 to index
    %990 = memref.load %arg1[%c5_132, %989] : memref<7x8xf32, #tpu.memory_space<smem>>
    %c6_133 = arith.constant 6 : index
    %991 = arith.index_cast %978 : i32 to index
    %992 = memref.load %arg1[%c6_133, %991] : memref<7x8xf32, #tpu.memory_space<smem>>
    %cst_134 = arith.constant 0.000000e+00 : f32
    %993 = arith.subf %cst_134, %988 : f32
    %cst_135 = arith.constant 0.000000e+00 : f32
    %994 = arith.subf %cst_135, %992 : f32
    %995 = arith.mulf %959, %11 : vector<1x128xf32>
    %996 = arith.mulf %961, %13 : vector<1x128xf32>
    %997 = arith.subf %995, %996 : vector<1x128xf32>
    %998 = arith.mulf %959, %13 : vector<1x128xf32>
    %999 = arith.mulf %961, %11 : vector<1x128xf32>
    %1000 = arith.addf %998, %999 : vector<1x128xf32>
    %1001 = arith.mulf %963, %11 : vector<1x128xf32>
    %1002 = arith.mulf %965, %16 : vector<1x128xf32>
    %1003 = arith.subf %1001, %1002 : vector<1x128xf32>
    %1004 = arith.mulf %963, %16 : vector<1x128xf32>
    %1005 = arith.mulf %965, %11 : vector<1x128xf32>
    %1006 = arith.addf %1004, %1005 : vector<1x128xf32>
    %1007 = arith.mulf %18, %950 : vector<1x128xf32>
    %1008 = arith.addf %1007, %20 : vector<1x128xf32>
    %1009 = arith.mulf %18, %957 : vector<1x128xf32>
    %1010 = vector.broadcast %990 : f32 to vector<1x128xf32>
    %1011 = arith.mulf %1003, %1010 : vector<1x128xf32>
    %1012 = vector.broadcast %992 : f32 to vector<1x128xf32>
    %1013 = arith.mulf %1006, %1012 : vector<1x128xf32>
    %1014 = arith.addf %1011, %1013 : vector<1x128xf32>
    %1015 = vector.broadcast %992 : f32 to vector<1x128xf32>
    %1016 = arith.mulf %1003, %1015 : vector<1x128xf32>
    %1017 = vector.broadcast %990 : f32 to vector<1x128xf32>
    %1018 = arith.mulf %1006, %1017 : vector<1x128xf32>
    %1019 = arith.subf %1016, %1018 : vector<1x128xf32>
    %1020 = vector.broadcast %986 : f32 to vector<1x128xf32>
    %1021 = arith.mulf %1008, %1020 : vector<1x128xf32>
    %1022 = vector.broadcast %988 : f32 to vector<1x128xf32>
    %1023 = arith.mulf %1009, %1022 : vector<1x128xf32>
    %1024 = arith.subf %1021, %1023 : vector<1x128xf32>
    %1025 = vector.broadcast %988 : f32 to vector<1x128xf32>
    %1026 = arith.mulf %1008, %1025 : vector<1x128xf32>
    %1027 = vector.broadcast %986 : f32 to vector<1x128xf32>
    %1028 = arith.mulf %1009, %1027 : vector<1x128xf32>
    %1029 = arith.addf %1026, %1028 : vector<1x128xf32>
    %1030 = vector.broadcast %980 : f32 to vector<1x128xf32>
    %1031 = arith.mulf %1030, %997 : vector<1x128xf32>
    %1032 = vector.broadcast %982 : f32 to vector<1x128xf32>
    %1033 = arith.mulf %1032, %1014 : vector<1x128xf32>
    %1034 = arith.addf %1031, %1033 : vector<1x128xf32>
    %1035 = vector.broadcast %984 : f32 to vector<1x128xf32>
    %1036 = arith.mulf %1035, %1029 : vector<1x128xf32>
    %1037 = arith.subf %1034, %1036 : vector<1x128xf32>
    %1038 = vector.broadcast %980 : f32 to vector<1x128xf32>
    %1039 = arith.mulf %1038, %1000 : vector<1x128xf32>
    %1040 = vector.broadcast %982 : f32 to vector<1x128xf32>
    %1041 = arith.mulf %1040, %1019 : vector<1x128xf32>
    %1042 = arith.addf %1039, %1041 : vector<1x128xf32>
    %1043 = vector.broadcast %984 : f32 to vector<1x128xf32>
    %1044 = arith.mulf %1043, %1024 : vector<1x128xf32>
    %1045 = arith.addf %1042, %1044 : vector<1x128xf32>
    %1046 = vector.broadcast %990 : f32 to vector<1x128xf32>
    %1047 = arith.mulf %997, %1046 : vector<1x128xf32>
    %1048 = vector.broadcast %994 : f32 to vector<1x128xf32>
    %1049 = arith.mulf %1000, %1048 : vector<1x128xf32>
    %1050 = arith.addf %1047, %1049 : vector<1x128xf32>
    %1051 = vector.broadcast %994 : f32 to vector<1x128xf32>
    %1052 = arith.mulf %997, %1051 : vector<1x128xf32>
    %1053 = vector.broadcast %990 : f32 to vector<1x128xf32>
    %1054 = arith.mulf %1000, %1053 : vector<1x128xf32>
    %1055 = arith.subf %1052, %1054 : vector<1x128xf32>
    %1056 = vector.broadcast %986 : f32 to vector<1x128xf32>
    %1057 = arith.mulf %1008, %1056 : vector<1x128xf32>
    %1058 = vector.broadcast %993 : f32 to vector<1x128xf32>
    %1059 = arith.mulf %1009, %1058 : vector<1x128xf32>
    %1060 = arith.subf %1057, %1059 : vector<1x128xf32>
    %1061 = vector.broadcast %993 : f32 to vector<1x128xf32>
    %1062 = arith.mulf %1008, %1061 : vector<1x128xf32>
    %1063 = vector.broadcast %986 : f32 to vector<1x128xf32>
    %1064 = arith.mulf %1009, %1063 : vector<1x128xf32>
    %1065 = arith.addf %1062, %1064 : vector<1x128xf32>
    %1066 = vector.broadcast %982 : f32 to vector<1x128xf32>
    %1067 = arith.mulf %1066, %1050 : vector<1x128xf32>
    %1068 = vector.broadcast %980 : f32 to vector<1x128xf32>
    %1069 = arith.mulf %1068, %1003 : vector<1x128xf32>
    %1070 = arith.addf %1067, %1069 : vector<1x128xf32>
    %1071 = vector.broadcast %984 : f32 to vector<1x128xf32>
    %1072 = arith.mulf %1071, %1065 : vector<1x128xf32>
    %1073 = arith.addf %1070, %1072 : vector<1x128xf32>
    %1074 = vector.broadcast %982 : f32 to vector<1x128xf32>
    %1075 = arith.mulf %1074, %1055 : vector<1x128xf32>
    %1076 = vector.broadcast %980 : f32 to vector<1x128xf32>
    %1077 = arith.mulf %1076, %1006 : vector<1x128xf32>
    %1078 = arith.addf %1075, %1077 : vector<1x128xf32>
    %1079 = vector.broadcast %984 : f32 to vector<1x128xf32>
    %1080 = arith.mulf %1079, %1060 : vector<1x128xf32>
    %1081 = arith.subf %1078, %1080 : vector<1x128xf32>
    %1082 = vector.broadcast %986 : f32 to vector<1x128xf32>
    %1083 = arith.mulf %997, %1082 : vector<1x128xf32>
    %1084 = vector.broadcast %993 : f32 to vector<1x128xf32>
    %1085 = arith.mulf %1000, %1084 : vector<1x128xf32>
    %1086 = arith.subf %1083, %1085 : vector<1x128xf32>
    %1087 = vector.broadcast %993 : f32 to vector<1x128xf32>
    %1088 = arith.mulf %997, %1087 : vector<1x128xf32>
    %1089 = vector.broadcast %986 : f32 to vector<1x128xf32>
    %1090 = arith.mulf %1000, %1089 : vector<1x128xf32>
    %1091 = arith.addf %1088, %1090 : vector<1x128xf32>
    %1092 = vector.broadcast %986 : f32 to vector<1x128xf32>
    %1093 = arith.mulf %1003, %1092 : vector<1x128xf32>
    %1094 = vector.broadcast %988 : f32 to vector<1x128xf32>
    %1095 = arith.mulf %1006, %1094 : vector<1x128xf32>
    %1096 = arith.subf %1093, %1095 : vector<1x128xf32>
    %1097 = vector.broadcast %988 : f32 to vector<1x128xf32>
    %1098 = arith.mulf %1003, %1097 : vector<1x128xf32>
    %1099 = vector.broadcast %986 : f32 to vector<1x128xf32>
    %1100 = arith.mulf %1006, %1099 : vector<1x128xf32>
    %1101 = arith.addf %1098, %1100 : vector<1x128xf32>
    %1102 = arith.subf %980, %982 : f32
    %1103 = arith.subf %1091, %1101 : vector<1x128xf32>
    %1104 = vector.broadcast %984 : f32 to vector<1x128xf32>
    %1105 = arith.mulf %1104, %1103 : vector<1x128xf32>
    %1106 = vector.broadcast %1102 : f32 to vector<1x128xf32>
    %1107 = arith.mulf %1106, %1008 : vector<1x128xf32>
    %1108 = arith.addf %1105, %1107 : vector<1x128xf32>
    %cst_136 = arith.constant 0.000000e+00 : f32
    %1109 = arith.subf %cst_136, %984 : f32
    %1110 = arith.subf %1086, %1096 : vector<1x128xf32>
    %1111 = vector.broadcast %1109 : f32 to vector<1x128xf32>
    %1112 = arith.mulf %1111, %1110 : vector<1x128xf32>
    %1113 = vector.broadcast %1102 : f32 to vector<1x128xf32>
    %1114 = arith.mulf %1113, %1009 : vector<1x128xf32>
    %1115 = arith.addf %1112, %1114 : vector<1x128xf32>
    %c1_i32_137 = arith.constant 1 : i32
    %1116 = tpu.dynamic_rotate %1037 by %c1_i32_137 dim 1 : vector<1x128xf32>, i32 -> vector<1x128xf32>
    %1117 = arith.mulf %1116, %5 : vector<1x128xf32>
    %c1_i32_138 = arith.constant 1 : i32
    %1118 = tpu.dynamic_rotate %1045 by %c1_i32_138 dim 1 : vector<1x128xf32>, i32 -> vector<1x128xf32>
    %1119 = arith.mulf %1118, %5 : vector<1x128xf32>
    %c127_i32_139 = arith.constant 127 : i32
    %1120 = tpu.dynamic_rotate %1073 by %c127_i32_139 dim 1 : vector<1x128xf32>, i32 -> vector<1x128xf32>
    %1121 = arith.mulf %1120, %9 : vector<1x128xf32>
    %c127_i32_140 = arith.constant 127 : i32
    %1122 = tpu.dynamic_rotate %1081 by %c127_i32_140 dim 1 : vector<1x128xf32>, i32 -> vector<1x128xf32>
    %1123 = arith.mulf %1122, %9 : vector<1x128xf32>
    %1124 = arith.index_cast %c6_i32 : i32 to index
    %c0_141 = arith.constant 0 : index
    %1125 = vector.load %arg3[%1124, %c0_141] : memref<8x768xf32, #tpu.memory_space<vmem>>, vector<1x128xf32>
    tpu.vector_store %arg3[%1124, %c0_141], %1117 {strides = array<i32>} : memref<8x768xf32, #tpu.memory_space<vmem>>, vector<1x128xf32>,
    %1126 = arith.index_cast %c6_i32 : i32 to index
    %c128_142 = arith.constant 128 : index
    %1127 = vector.load %arg3[%1126, %c128_142] : memref<8x768xf32, #tpu.memory_space<vmem>>, vector<1x128xf32>
    tpu.vector_store %arg3[%1126, %c128_142], %1119 {strides = array<i32>} : memref<8x768xf32, #tpu.memory_space<vmem>>, vector<1x128xf32>,
    %1128 = arith.index_cast %c6_i32 : i32 to index
    %c256_143 = arith.constant 256 : index
    %1129 = vector.load %arg3[%1128, %c256_143] : memref<8x768xf32, #tpu.memory_space<vmem>>, vector<1x128xf32>
    tpu.vector_store %arg3[%1128, %c256_143], %1121 {strides = array<i32>} : memref<8x768xf32, #tpu.memory_space<vmem>>, vector<1x128xf32>,
    %1130 = arith.index_cast %c6_i32 : i32 to index
    %c384_144 = arith.constant 384 : index
    %1131 = vector.load %arg3[%1130, %c384_144] : memref<8x768xf32, #tpu.memory_space<vmem>>, vector<1x128xf32>
    tpu.vector_store %arg3[%1130, %c384_144], %1123 {strides = array<i32>} : memref<8x768xf32, #tpu.memory_space<vmem>>, vector<1x128xf32>,
    %1132 = arith.index_cast %c6_i32 : i32 to index
    %c512_145 = arith.constant 512 : index
    %1133 = vector.load %arg3[%1132, %c512_145] : memref<8x768xf32, #tpu.memory_space<vmem>>, vector<1x128xf32>
    tpu.vector_store %arg3[%1132, %c512_145], %1108 {strides = array<i32>} : memref<8x768xf32, #tpu.memory_space<vmem>>, vector<1x128xf32>,
    %1134 = arith.index_cast %c6_i32 : i32 to index
    %c640_146 = arith.constant 640 : index
    %1135 = vector.load %arg3[%1134, %c640_146] : memref<8x768xf32, #tpu.memory_space<vmem>>, vector<1x128xf32>
    tpu.vector_store %arg3[%1134, %c640_146], %1115 {strides = array<i32>} : memref<8x768xf32, #tpu.memory_space<vmem>>, vector<1x128xf32>,
    %c7_i32 = arith.constant 7 : i32
    %1136 = arith.addi %0, %c7_i32 : i32
    %c0_147 = arith.constant 0 : index
    %1137 = arith.index_cast %1136 : i32 to index
    %1138 = memref.load %arg1[%c0_147, %1137] : memref<7x8xf32, #tpu.memory_space<smem>>
    %c1_148 = arith.constant 1 : index
    %1139 = arith.index_cast %1136 : i32 to index
    %1140 = memref.load %arg1[%c1_148, %1139] : memref<7x8xf32, #tpu.memory_space<smem>>
    %c2_149 = arith.constant 2 : index
    %1141 = arith.index_cast %1136 : i32 to index
    %1142 = memref.load %arg1[%c2_149, %1141] : memref<7x8xf32, #tpu.memory_space<smem>>
    %c3_150 = arith.constant 3 : index
    %1143 = arith.index_cast %1136 : i32 to index
    %1144 = memref.load %arg1[%c3_150, %1143] : memref<7x8xf32, #tpu.memory_space<smem>>
    %c4_151 = arith.constant 4 : index
    %1145 = arith.index_cast %1136 : i32 to index
    %1146 = memref.load %arg1[%c4_151, %1145] : memref<7x8xf32, #tpu.memory_space<smem>>
    %c5_152 = arith.constant 5 : index
    %1147 = arith.index_cast %1136 : i32 to index
    %1148 = memref.load %arg1[%c5_152, %1147] : memref<7x8xf32, #tpu.memory_space<smem>>
    %c6_153 = arith.constant 6 : index
    %1149 = arith.index_cast %1136 : i32 to index
    %1150 = memref.load %arg1[%c6_153, %1149] : memref<7x8xf32, #tpu.memory_space<smem>>
    %cst_154 = arith.constant 0.000000e+00 : f32
    %1151 = arith.subf %cst_154, %1146 : f32
    %cst_155 = arith.constant 0.000000e+00 : f32
    %1152 = arith.subf %cst_155, %1150 : f32
    %1153 = arith.mulf %1117, %11 : vector<1x128xf32>
    %1154 = arith.mulf %1119, %13 : vector<1x128xf32>
    %1155 = arith.subf %1153, %1154 : vector<1x128xf32>
    %1156 = arith.mulf %1117, %13 : vector<1x128xf32>
    %1157 = arith.mulf %1119, %11 : vector<1x128xf32>
    %1158 = arith.addf %1156, %1157 : vector<1x128xf32>
    %1159 = arith.mulf %1121, %11 : vector<1x128xf32>
    %1160 = arith.mulf %1123, %16 : vector<1x128xf32>
    %1161 = arith.subf %1159, %1160 : vector<1x128xf32>
    %1162 = arith.mulf %1121, %16 : vector<1x128xf32>
    %1163 = arith.mulf %1123, %11 : vector<1x128xf32>
    %1164 = arith.addf %1162, %1163 : vector<1x128xf32>
    %1165 = arith.mulf %18, %1108 : vector<1x128xf32>
    %1166 = arith.addf %1165, %20 : vector<1x128xf32>
    %1167 = arith.mulf %18, %1115 : vector<1x128xf32>
    %1168 = vector.broadcast %1148 : f32 to vector<1x128xf32>
    %1169 = arith.mulf %1161, %1168 : vector<1x128xf32>
    %1170 = vector.broadcast %1150 : f32 to vector<1x128xf32>
    %1171 = arith.mulf %1164, %1170 : vector<1x128xf32>
    %1172 = arith.addf %1169, %1171 : vector<1x128xf32>
    %1173 = vector.broadcast %1150 : f32 to vector<1x128xf32>
    %1174 = arith.mulf %1161, %1173 : vector<1x128xf32>
    %1175 = vector.broadcast %1148 : f32 to vector<1x128xf32>
    %1176 = arith.mulf %1164, %1175 : vector<1x128xf32>
    %1177 = arith.subf %1174, %1176 : vector<1x128xf32>
    %1178 = vector.broadcast %1144 : f32 to vector<1x128xf32>
    %1179 = arith.mulf %1166, %1178 : vector<1x128xf32>
    %1180 = vector.broadcast %1146 : f32 to vector<1x128xf32>
    %1181 = arith.mulf %1167, %1180 : vector<1x128xf32>
    %1182 = arith.subf %1179, %1181 : vector<1x128xf32>
    %1183 = vector.broadcast %1146 : f32 to vector<1x128xf32>
    %1184 = arith.mulf %1166, %1183 : vector<1x128xf32>
    %1185 = vector.broadcast %1144 : f32 to vector<1x128xf32>
    %1186 = arith.mulf %1167, %1185 : vector<1x128xf32>
    %1187 = arith.addf %1184, %1186 : vector<1x128xf32>
    %1188 = vector.broadcast %1138 : f32 to vector<1x128xf32>
    %1189 = arith.mulf %1188, %1155 : vector<1x128xf32>
    %1190 = vector.broadcast %1140 : f32 to vector<1x128xf32>
    %1191 = arith.mulf %1190, %1172 : vector<1x128xf32>
    %1192 = arith.addf %1189, %1191 : vector<1x128xf32>
    %1193 = vector.broadcast %1142 : f32 to vector<1x128xf32>
    %1194 = arith.mulf %1193, %1187 : vector<1x128xf32>
    %1195 = arith.subf %1192, %1194 : vector<1x128xf32>
    %1196 = vector.broadcast %1138 : f32 to vector<1x128xf32>
    %1197 = arith.mulf %1196, %1158 : vector<1x128xf32>
    %1198 = vector.broadcast %1140 : f32 to vector<1x128xf32>
    %1199 = arith.mulf %1198, %1177 : vector<1x128xf32>
    %1200 = arith.addf %1197, %1199 : vector<1x128xf32>
    %1201 = vector.broadcast %1142 : f32 to vector<1x128xf32>
    %1202 = arith.mulf %1201, %1182 : vector<1x128xf32>
    %1203 = arith.addf %1200, %1202 : vector<1x128xf32>
    %1204 = vector.broadcast %1148 : f32 to vector<1x128xf32>
    %1205 = arith.mulf %1155, %1204 : vector<1x128xf32>
    %1206 = vector.broadcast %1152 : f32 to vector<1x128xf32>
    %1207 = arith.mulf %1158, %1206 : vector<1x128xf32>
    %1208 = arith.addf %1205, %1207 : vector<1x128xf32>
    %1209 = vector.broadcast %1152 : f32 to vector<1x128xf32>
    %1210 = arith.mulf %1155, %1209 : vector<1x128xf32>
    %1211 = vector.broadcast %1148 : f32 to vector<1x128xf32>
    %1212 = arith.mulf %1158, %1211 : vector<1x128xf32>
    %1213 = arith.subf %1210, %1212 : vector<1x128xf32>
    %1214 = vector.broadcast %1144 : f32 to vector<1x128xf32>
    %1215 = arith.mulf %1166, %1214 : vector<1x128xf32>
    %1216 = vector.broadcast %1151 : f32 to vector<1x128xf32>
    %1217 = arith.mulf %1167, %1216 : vector<1x128xf32>
    %1218 = arith.subf %1215, %1217 : vector<1x128xf32>
    %1219 = vector.broadcast %1151 : f32 to vector<1x128xf32>
    %1220 = arith.mulf %1166, %1219 : vector<1x128xf32>
    %1221 = vector.broadcast %1144 : f32 to vector<1x128xf32>
    %1222 = arith.mulf %1167, %1221 : vector<1x128xf32>
    %1223 = arith.addf %1220, %1222 : vector<1x128xf32>
    %1224 = vector.broadcast %1140 : f32 to vector<1x128xf32>
    %1225 = arith.mulf %1224, %1208 : vector<1x128xf32>
    %1226 = vector.broadcast %1138 : f32 to vector<1x128xf32>
    %1227 = arith.mulf %1226, %1161 : vector<1x128xf32>
    %1228 = arith.addf %1225, %1227 : vector<1x128xf32>
    %1229 = vector.broadcast %1142 : f32 to vector<1x128xf32>
    %1230 = arith.mulf %1229, %1223 : vector<1x128xf32>
    %1231 = arith.addf %1228, %1230 : vector<1x128xf32>
    %1232 = vector.broadcast %1140 : f32 to vector<1x128xf32>
    %1233 = arith.mulf %1232, %1213 : vector<1x128xf32>
    %1234 = vector.broadcast %1138 : f32 to vector<1x128xf32>
    %1235 = arith.mulf %1234, %1164 : vector<1x128xf32>
    %1236 = arith.addf %1233, %1235 : vector<1x128xf32>
    %1237 = vector.broadcast %1142 : f32 to vector<1x128xf32>
    %1238 = arith.mulf %1237, %1218 : vector<1x128xf32>
    %1239 = arith.subf %1236, %1238 : vector<1x128xf32>
    %1240 = vector.broadcast %1144 : f32 to vector<1x128xf32>
    %1241 = arith.mulf %1155, %1240 : vector<1x128xf32>
    %1242 = vector.broadcast %1151 : f32 to vector<1x128xf32>
    %1243 = arith.mulf %1158, %1242 : vector<1x128xf32>
    %1244 = arith.subf %1241, %1243 : vector<1x128xf32>
    %1245 = vector.broadcast %1151 : f32 to vector<1x128xf32>
    %1246 = arith.mulf %1155, %1245 : vector<1x128xf32>
    %1247 = vector.broadcast %1144 : f32 to vector<1x128xf32>
    %1248 = arith.mulf %1158, %1247 : vector<1x128xf32>
    %1249 = arith.addf %1246, %1248 : vector<1x128xf32>
    %1250 = vector.broadcast %1144 : f32 to vector<1x128xf32>
    %1251 = arith.mulf %1161, %1250 : vector<1x128xf32>
    %1252 = vector.broadcast %1146 : f32 to vector<1x128xf32>
    %1253 = arith.mulf %1164, %1252 : vector<1x128xf32>
    %1254 = arith.subf %1251, %1253 : vector<1x128xf32>
    %1255 = vector.broadcast %1146 : f32 to vector<1x128xf32>
    %1256 = arith.mulf %1161, %1255 : vector<1x128xf32>
    %1257 = vector.broadcast %1144 : f32 to vector<1x128xf32>
    %1258 = arith.mulf %1164, %1257 : vector<1x128xf32>
    %1259 = arith.addf %1256, %1258 : vector<1x128xf32>
    %1260 = arith.subf %1138, %1140 : f32
    %1261 = arith.subf %1249, %1259 : vector<1x128xf32>
    %1262 = vector.broadcast %1142 : f32 to vector<1x128xf32>
    %1263 = arith.mulf %1262, %1261 : vector<1x128xf32>
    %1264 = vector.broadcast %1260 : f32 to vector<1x128xf32>
    %1265 = arith.mulf %1264, %1166 : vector<1x128xf32>
    %1266 = arith.addf %1263, %1265 : vector<1x128xf32>
    %cst_156 = arith.constant 0.000000e+00 : f32
    %1267 = arith.subf %cst_156, %1142 : f32
    %1268 = arith.subf %1244, %1254 : vector<1x128xf32>
    %1269 = vector.broadcast %1267 : f32 to vector<1x128xf32>
    %1270 = arith.mulf %1269, %1268 : vector<1x128xf32>
    %1271 = vector.broadcast %1260 : f32 to vector<1x128xf32>
    %1272 = arith.mulf %1271, %1167 : vector<1x128xf32>
    %1273 = arith.addf %1270, %1272 : vector<1x128xf32>
    %c1_i32_157 = arith.constant 1 : i32
    %1274 = tpu.dynamic_rotate %1195 by %c1_i32_157 dim 1 : vector<1x128xf32>, i32 -> vector<1x128xf32>
    %1275 = arith.mulf %1274, %5 : vector<1x128xf32>
    %c1_i32_158 = arith.constant 1 : i32
    %1276 = tpu.dynamic_rotate %1203 by %c1_i32_158 dim 1 : vector<1x128xf32>, i32 -> vector<1x128xf32>
    %1277 = arith.mulf %1276, %5 : vector<1x128xf32>
    %c127_i32_159 = arith.constant 127 : i32
    %1278 = tpu.dynamic_rotate %1231 by %c127_i32_159 dim 1 : vector<1x128xf32>, i32 -> vector<1x128xf32>
    %1279 = arith.mulf %1278, %9 : vector<1x128xf32>
    %c127_i32_160 = arith.constant 127 : i32
    %1280 = tpu.dynamic_rotate %1239 by %c127_i32_160 dim 1 : vector<1x128xf32>, i32 -> vector<1x128xf32>
    %1281 = arith.mulf %1280, %9 : vector<1x128xf32>
    %1282 = arith.index_cast %c7_i32 : i32 to index
    %c0_161 = arith.constant 0 : index
    %1283 = vector.load %arg3[%1282, %c0_161] : memref<8x768xf32, #tpu.memory_space<vmem>>, vector<1x128xf32>
    tpu.vector_store %arg3[%1282, %c0_161], %1275 {strides = array<i32>} : memref<8x768xf32, #tpu.memory_space<vmem>>, vector<1x128xf32>,
    %1284 = arith.index_cast %c7_i32 : i32 to index
    %c128_162 = arith.constant 128 : index
    %1285 = vector.load %arg3[%1284, %c128_162] : memref<8x768xf32, #tpu.memory_space<vmem>>, vector<1x128xf32>
    tpu.vector_store %arg3[%1284, %c128_162], %1277 {strides = array<i32>} : memref<8x768xf32, #tpu.memory_space<vmem>>, vector<1x128xf32>,
    %1286 = arith.index_cast %c7_i32 : i32 to index
    %c256_163 = arith.constant 256 : index
    %1287 = vector.load %arg3[%1286, %c256_163] : memref<8x768xf32, #tpu.memory_space<vmem>>, vector<1x128xf32>
    tpu.vector_store %arg3[%1286, %c256_163], %1279 {strides = array<i32>} : memref<8x768xf32, #tpu.memory_space<vmem>>, vector<1x128xf32>,
    %1288 = arith.index_cast %c7_i32 : i32 to index
    %c384_164 = arith.constant 384 : index
    %1289 = vector.load %arg3[%1288, %c384_164] : memref<8x768xf32, #tpu.memory_space<vmem>>, vector<1x128xf32>
    tpu.vector_store %arg3[%1288, %c384_164], %1281 {strides = array<i32>} : memref<8x768xf32, #tpu.memory_space<vmem>>, vector<1x128xf32>,
    %1290 = arith.index_cast %c7_i32 : i32 to index
    %c512_165 = arith.constant 512 : index
    %1291 = vector.load %arg3[%1290, %c512_165] : memref<8x768xf32, #tpu.memory_space<vmem>>, vector<1x128xf32>
    tpu.vector_store %arg3[%1290, %c512_165], %1266 {strides = array<i32>} : memref<8x768xf32, #tpu.memory_space<vmem>>, vector<1x128xf32>,
    %1292 = arith.index_cast %c7_i32 : i32 to index
    %c640_166 = arith.constant 640 : index
    %1293 = vector.load %arg3[%1292, %c640_166] : memref<8x768xf32, #tpu.memory_space<vmem>>, vector<1x128xf32>
    tpu.vector_store %arg3[%1292, %c640_166], %1273 {strides = array<i32>} : memref<8x768xf32, #tpu.memory_space<vmem>>, vector<1x128xf32>,
    %c8_i32_167 = arith.constant 8 : i32
    %c0_168 = arith.constant 0 : index
    %c0_169 = arith.constant 0 : index
    %1294 = vector.load %arg4[%c0_168, %c0_169] : memref<1x128xf32, #tpu.memory_space<vmem>>, vector<1x128xf32>
    tpu.vector_store %arg4[%c0_168, %c0_169], %1275 {strides = array<i32>} : memref<1x128xf32, #tpu.memory_space<vmem>>, vector<1x128xf32>,
    %c0_170 = arith.constant 0 : index
    %c0_171 = arith.constant 0 : index
    %1295 = vector.load %arg5[%c0_170, %c0_171] : memref<1x128xf32, #tpu.memory_space<vmem>>, vector<1x128xf32>
    tpu.vector_store %arg5[%c0_170, %c0_171], %1277 {strides = array<i32>} : memref<1x128xf32, #tpu.memory_space<vmem>>, vector<1x128xf32>,
    %c0_172 = arith.constant 0 : index
    %c0_173 = arith.constant 0 : index
    %1296 = vector.load %arg6[%c0_172, %c0_173] : memref<1x128xf32, #tpu.memory_space<vmem>>, vector<1x128xf32>
    tpu.vector_store %arg6[%c0_172, %c0_173], %1279 {strides = array<i32>} : memref<1x128xf32, #tpu.memory_space<vmem>>, vector<1x128xf32>,
    %c0_174 = arith.constant 0 : index
    %c0_175 = arith.constant 0 : index
    %1297 = vector.load %arg7[%c0_174, %c0_175] : memref<1x128xf32, #tpu.memory_space<vmem>>, vector<1x128xf32>
    tpu.vector_store %arg7[%c0_174, %c0_175], %1281 {strides = array<i32>} : memref<1x128xf32, #tpu.memory_space<vmem>>, vector<1x128xf32>,
    %c0_176 = arith.constant 0 : index
    %c0_177 = arith.constant 0 : index
    %1298 = vector.load %arg8[%c0_176, %c0_177] : memref<1x128xf32, #tpu.memory_space<vmem>>, vector<1x128xf32>
    tpu.vector_store %arg8[%c0_176, %c0_177], %1266 {strides = array<i32>} : memref<1x128xf32, #tpu.memory_space<vmem>>, vector<1x128xf32>,
    %c0_178 = arith.constant 0 : index
    %c0_179 = arith.constant 0 : index
    %1299 = vector.load %arg9[%c0_178, %c0_179] : memref<1x128xf32, #tpu.memory_space<vmem>>, vector<1x128xf32>
    tpu.vector_store %arg9[%c0_178, %c0_179], %1273 {strides = array<i32>} : memref<1x128xf32, #tpu.memory_space<vmem>>, vector<1x128xf32>,
    return
  }
  func.func @transform_0(%arg0: i32) -> (i32, i32) {
    %c0_i32 = arith.constant 0 : i32
    %c0_i32_0 = arith.constant 0 : i32
    %c0_i32_1 = arith.constant 0 : i32
    return %c0_i32, %c0_i32_0 : i32, i32
  }
  func.func @transform_1(%arg0: i32) -> i32 {
    %c0_i32 = arith.constant 0 : i32
    %c0_i32_0 = arith.constant 0 : i32
    return %c0_i32 : i32
  }
  func.func @transform_2(%arg0: i32) -> (i32, i32) {
    %c0_i32 = arith.constant 0 : i32
    %c0_i32_0 = arith.constant 0 : i32
    return %arg0, %c0_i32 : i32, i32
  }
}

</mosaic_0001>

<bundles_post_ra>
// kernel: tpu_custom_call.1
= control target key start
LH: loop header
LB: loop body
LE: loop exit
PB: predicated region body
PF: predicated region fallthrough
CT: control target
= control target key end

     0   :  { %7 = vsyncpa [#allocation10], 0  ;;  %s2065_s0 = inlined_call_operand.hbm [shape: f32[7,8], index: 0, kind: input, shape index: {}]   ;;  %s2066_s1 = inlined_call_operand.vmem [shape: f32[4], index: 1, kind: input, shape index: {}]   ;;  %s2067_s2 = inlined_call_operand.hbm [shape: f32[8,768], index: 2, kind: output, shape index: {}]  }
   0x1   :  { %8 = vsyncpa [#allocation11], 0 }
   0x2   :  { %9 = vsyncpa [#allocation9], 0  ;;  %s24_s11 = sshll.u32 %s2066_s1, 4  ;;  %s1327_s12 = smov [#allocation8]   ;;  %s25_s11 = int_to_ptr.vmem [resolvable:$true] %s24_s11 }
   0x3   :  { %17 = dma.hbm_to_smem %s2065_s0, 128, %s1327_s12, [#allocation10]  }
   0x4   :  { %s1289_s15 = scalar_lea.vmem %s25_s11, 16  ;;  %p1294_p1 = scmp.lt.s32.totalorder %s25_s11, %s25_s11 }
   0x5   :  { %p1290_p0 = scmp.ne.s32.totalorder %s25_s11, %s1289_s15  ;;  %p1295_p2 = scmp.lt.s32.totalorder %s1289_s15, %s1289_s15 }
   0x7   :  { %p1296_p3 = por %p1295_p2, %p1294_p1 }
   0x9   :  { %p1297_p4 = pnand %p1296_p3, %p1290_p0 }
   0xb   :  { %1300 = shalt.err (!%p1297_p4)
}
   0xc   :  { %s1328_s16 = smov [#allocation12]  }
   0xd   :  { %27 = dma.vmem_to_smem %s25_s11, 16, %s1328_s16, [#allocation11]  }
   0xe   :  { %1321 = dma.done.wait [#allocation10], 128  }
   0xf   :  { %1322 = vsyncadd [#allocation10], 4294967168 }
  0x10   :  { %1323 = dma.done.wait [#allocation11], 16  }
  0x11   :  { %1324 = vsyncadd [#allocation11], 4294967280 }
  0x12   :  { %34 = sfence }
  0x13   :  { %v36_v0 = vlaneseq  ;;  %s44_s1 = sld [smem:[#allocation12]]  ;;  %v1329_v1 = vmov 0.0   ;;  %s1330_s5 = smov 1  }
  0x14   :  { %s1216_s17 = sld [smem:[#allocation12 + $0x1]]  ;;  %58 = vst [vmem:[#allocation2] sm:$0x1] %v1329_v1  ;;  %59 = vst [vmem:[#allocation3] sm:$0x1] %v1329_v1  ;;  %s1331_s6 = smov 127  }
  0x15   :  { %60 = vst [vmem:[#allocation4] sm:$0x1] %v1329_v1  ;;  %61 = vst [vmem:[#allocation5] sm:$0x1] %v1329_v1  ;;  %v37_v2 = vand.u32 127, %v36_v0  ;;  %s1217_s0 = sld [smem:[#allocation12 + $0x2]] }
  0x16   :  { %66 = vst [vmem:[#allocation7] sm:$0x1] %v1329_v1  ;;  %s1354_s18 = sld [smem:[#allocation12 + $0x3]] }
  0x17   :  { %vm62_vm0 = vcmp.eq.s32.totalorder %v37_v2, 0  ;;  %s1356_s19 = sld [smem:[#allocation8]]  ;;  %vm38_vm1 = vcmp.ne.s32.totalorder %v37_v2, 0  ;;  %vm41_vm2 = vcmp.ne.s32.totalorder %v37_v2, 20 }
  0x18   :  { %v1219_v3 = vsel %vm62_vm0, 1.0, %v1329_v1  ;;  %s1358_s20 = sld [smem:[#allocation8 + $0x80]]  ;;  %v1360_v4 = vsel %vm38_vm1, 1.0, %v1329_v1  ;;  %v1362_v5 = vsel %vm41_vm2, 1.0, %v1329_v1 }
  0x19   :  { %v1364_v6 = vstv %s44_s1  ;;  %65 = vst [vmem:[#allocation6] sm:$0x1] %v1219_v3  ;;  %s1366_s21 = sld [smem:[#allocation8 + $0x100]] }
  0x1a   :  { %v1368_v7 = vstv %s1216_s17  ;;  %s48_s22 = ssub.f32 0.0, %s1216_s17 }
  0x1b   :  { %v67_v8 = vld [vmem:[#allocation2] sm:$0x1]  ;;  %v68_v9 = vld [vmem:[#allocation3] sm:$0x1]  ;;  %s1222_s23 = sld [smem:[#allocation8 + $0x180]]  ;;  %v1380_v20 = vstv %s1217_s0 }
  0x1c   :  { %v69_v10 = vld [vmem:[#allocation4] sm:$0x1]  ;;  %v1370_v11 = vstv %s48_s22  ;;  %v70_v12 = vld [vmem:[#allocation5] sm:$0x1]  ;;  %v104_v14 = vmul.f32 %v67_v8, %v1364_v6  ;;  %v105_v15 = vmul.f32 %v68_v9, %v1368_v7  ;;  %s1374_s24 = sld [smem:[#allocation8 + $0x200]]  ;;  %v107_v16 = vmul.f32 %v67_v8, %v1368_v7 }
  0x1d   :  { %v72_v13 = vld [vmem:[#allocation7] sm:$0x1]  ;;  %v108_v17 = vmul.f32 %v68_v9, %v1364_v6  ;;  %v110_v18 = vmul.f32 %v69_v10, %v1364_v6  ;;  %v111_v19 = vmul.f32 %v70_v12, %v1370_v11  ;;  %s1224_s25 = sld [smem:[#allocation8 + $0x280]]  ;;  %v1383_v21 = vstv %s1356_s19 }
  0x1e   :  { %s1385_s26 = sld [smem:[#allocation8 + $0x300]]  ;;  %v106_v22 = vsub.f32 %v104_v14, %v105_v15  ;;  %v1388_v24 = vmul.f32 %v72_v13, %v1380_v20  ;;  %v113_v25 = vmul.f32 %v69_v10, %v1370_v11  ;;  %v1392_v26 = vstv %s1354_s18 }
  0x1f   :  { %v112_v23 = vsub.f32 %v110_v18, %v111_v19  ;;  %v109_v28 = vadd.f32 %v108_v17, %v107_v16  ;;  %v1395_v29 = vstv %s1358_s20  ;;  %s182_s27 = ssub.f32 %s1356_s19, %s1358_s20  ;;  %v114_v30 = vmul.f32 %v70_v12, %v1364_v6 }
  0x20   :  { %v71_v27 = vld [vmem:[#allocation6] sm:$0x1]  ;;  %v1402_v32 = vstv %s1366_s21  ;;  %s188_s28 = ssub.f32 0.0, %s1366_s21  ;;  %v136_v34 = vmul.f32 %v1383_v21, %v106_v22 }
  0x21   :  { %v116_v31 = vmul.f32 %v71_v27, %v1380_v20  ;;  %v161_v33 = vmul.f32 %v1383_v21, %v112_v23  ;;  %v127_v35 = vstv %s1222_s23  ;;  %v1407_v36 = vstv %s182_s27  ;;  %s1420_s3 = sld [smem:[#allocation8 + $0x201]] }
  0x22   :  { %v115_v37 = vadd.f32 %v114_v30, %v113_v25  ;;  %v1410_v38 = vmul.f32 %v1383_v21, %v109_v28  ;;  %s102_s29 = ssub.f32 0.0, %s1374_s24  ;;  %v133_v40 = vmul.f32 %v127_v35, %v1388_v24  ;;  %v170_v41 = vmul.f32 %v127_v35, %v106_v22 }
  0x23   :  { %v117_v39 = vadd.f32 %v116_v31, %v1392_v26  ;;  %v174_v42 = vmul.f32 %v127_v35, %v109_v28  ;;  %v119_v43 = vstv %s1224_s25  ;;  %v190_v44 = vstv %s188_s28  ;;  %s1229_s4 = sld [smem:[#allocation8 + $0x181]] }
  0x24   :  { %v129_v45 = vstv %s1374_s24  ;;  %v176_v46 = vmul.f32 %v127_v35, %v112_v23  ;;  %s103_s30 = ssub.f32 0.0, %s1385_s26  ;;  %v148_v47 = vmul.f32 %v119_v43, %v106_v22  ;;  %v155_v48 = vstv %s102_s29 }
  0x25   :  { %v186_v49 = vmul.f32 %v1407_v36, %v117_v39  ;;  %v120_v50 = vmul.f32 %v119_v43, %v112_v23  ;;  %v158_v51 = vmul.f32 %v155_v48, %v117_v39  ;;  %v171_v52 = vmul.f32 %v155_v48, %v109_v28  ;;  %s1465_s8 = sld [smem:[#allocation8 + $0x301]] }
  0x26   :  { %v173_v53 = vmul.f32 %v155_v48, %v106_v22  ;;  %v121_v54 = vstv %s1385_s26  ;;  %v149_v55 = vstv %s103_s30  ;;  %v132_v58 = vmul.f32 %v129_v45, %v117_v39  ;;  %s1467_s9 = sld [smem:[#allocation8 + $0x1]] }
  0x27   :  { %v122_v56 = vmul.f32 %v121_v54, %v115_v37  ;;  %v124_v57 = vmul.f32 %v121_v54, %v112_v23  ;;  %v150_v59 = vmul.f32 %v149_v55, %v109_v28  ;;  %v152_v60 = vmul.f32 %v149_v55, %v106_v22  ;;  %s242_s7 = ssub.f32 0.0, %s1420_s3 }
  0x28   :  { %v159_v61 = vadd.f32 %v158_v51, %v133_v40  ;;  %v172_v62 = vsub.f32 %v170_v41, %v171_v52  ;;  %v175_v63 = vadd.f32 %v174_v42, %v173_v53  ;;  %v134_v1 = vadd.f32 %v133_v40, %v132_v58  ;;  %s1231_s10 = sld [smem:[#allocation8 + $0x281]] }
  0x29   :  { %v123_v0 = vadd.f32 %v122_v56, %v120_v50  ;;  %v177_v2 = vmul.f32 %v129_v45, %v115_v37  ;;  %v151_v3 = vadd.f32 %v150_v59, %v148_v47  ;;  %v179_v9 = vmul.f32 %v129_v45, %v112_v23  ;;  %s1469_s11 = sld [smem:[#allocation8 + $0x81]] }
  0x2a   :  { %v163_v8 = vmul.f32 %v159_v61, %v1402_v32  ;;  %v180_v10 = vmul.f32 %v127_v35, %v115_v37  ;;  %v141_v13 = vmul.f32 %v1402_v32, %v134_v1  ;;  %v128_v15 = vmul.f32 %v127_v35, %v117_v39  ;;  %s1471_s12 = sld [smem:[#allocation8 + $0x101]] }
  0x2b   :  { %v138_v12 = vmul.f32 %v1395_v29, %v123_v0  ;;  %v178_v14 = vsub.f32 %v176_v46, %v177_v2  ;;  %v160_v16 = vmul.f32 %v151_v3, %v1395_v29  ;;  %v153_v18 = vmul.f32 %v119_v43, %v109_v28  ;;  %s243_s13 = ssub.f32 0.0, %s1465_s8 }
  0x2c   :  { %v181_v17 = vadd.f32 %v180_v10, %v179_v9  ;;  %v156_v19 = vmul.f32 %v155_v48, %v1388_v24  ;;  %v166_v27 = vmul.f32 %v1383_v21, %v115_v37  ;;  %v125_v23 = vmul.f32 %v119_v43, %v115_v37  ;;  %s1506_s16 = sld [smem:[#allocation8 + $0x202]] }
  0x2d   :  { %v139_v22 = vadd.f32 %v138_v12, %v136_v34  ;;  %v189_v25 = vsub.f32 %v172_v62, %v178_v14  ;;  %v162_v30 = vadd.f32 %v161_v33, %v160_v16  ;;  %v154_v40 = vsub.f32 %v152_v60, %v153_v18  ;;  %s1236_s1 = sld [smem:[#allocation8 + $0x182]] }
  0x2e   :  { %v183_v31 = vsub.f32 %v175_v63, %v181_v17  ;;  %v157_v41 = vsub.f32 %v128_v15, %v156_v19  ;;  %v126_v35 = vsub.f32 %v124_v57, %v125_v23  ;;  %v130_v39 = vmul.f32 %v129_v45, %v1388_v24  ;;  %s1558_s0 = sld [smem:[#allocation8 + $0x302]] }
  0x2f   :  { %v142_v42 = vsub.f32 %v139_v22, %v141_v13  ;;  %v191_v47 = vmul.f32 %v190_v44, %v189_v25  ;;  %v164_v46 = vadd.f32 %v163_v8, %v162_v30  ;;  %v165_v34 = vmul.f32 %v154_v40, %v1395_v29  ;;  %s322_s14 = ssub.f32 %s1467_s9, %s1469_s11 }
  0x30   :  { %v184_v28 = vmul.f32 %v183_v31, %v1402_v32  ;;  %v168_v48 = vmul.f32 %v157_v41, %v1402_v32  ;;  %v131_v21 = vsub.f32 %v128_v15, %v130_v39  ;;  %v144_v33 = vmul.f32 %v1395_v29, %v126_v35  ;;  %s328_s15 = ssub.f32 0.0, %s1471_s12 }
  0x31   :  { %194 = vrot.lane.b32.xlu0 %v142_v42, %s1330_s5  ;;  %v192_v37 = vmul.f32 %v1407_v36, %v1388_v24  ;;  %200 = vrot.lane.b32.xlu1 %v164_v46, %s1331_s6  ;;  %v167_v43 = vadd.f32 %v166_v27, %v165_v34  ;;  %v1450_v54 = vstv %s242_s7  ;;  %v259_v12 = vstv %s1231_s10  ;;  %s1560_s18 = sld [smem:[#allocation8 + $0x2]] }
  0x32   :  { %v187_v44 = vadd.f32 %v186_v49, %v184_v28  ;;  %v145_v45 = vadd.f32 %v144_v33, %v1410_v38  ;;  %v146_v50 = vmul.f32 %v1402_v32, %v131_v21  ;;  %v1447_v49 = vstv %s1229_s4  ;;  %s382_s17 = ssub.f32 0.0, %s1506_s16 }
  0x33   :  { %v193_v51 = vadd.f32 %v192_v37, %v191_v47  ;;  %v169_v52 = vsub.f32 %v167_v43, %v168_v48  ;;  %v269_v38 = vstv %s1420_s3  ;;  %v261_v13 = vstv %s1465_s8  ;;  %s1562_s19 = sld [smem:[#allocation8 + $0x82]] }
  0x34   :  { %210 = vst [vmem:[#allocation13 + $0x20] sm:$0x1] %v187_v44  ;;  %v256_v53 = vmul.f32 %v187_v44, %v1380_v20  ;;  %v147_v29 = vadd.f32 %v146_v50, %v145_v45  ;;  %v1481_v14 = vstv %s1467_s9  ;;  %v1488_v18 = vstv %s1471_s12  ;;  %s1238_s20 = sld [smem:[#allocation8 + $0x282]] }
  0x35   :  { %211 = vst [vmem:[#allocation13 + $0x28] sm:$0x1] %v193_v51  ;;  %v1441_v24 = vmul.f32 %v193_v51, %v1380_v20  ;;  %203 = vrot.lane.b32.xlu1 %v169_v52, %s1331_s6  ;;  %v277_v31 = vstv %s1469_s11  ;;  %v289_v40 = vstv %s243_s13  ;;  %v325_v47 = vstv %s322_s14  ;;  %s1565_s21 = sld [smem:[#allocation8 + $0x102]] }
  0x36   :  { %v1445_v36 = vadd.f32 %v256_v53, %v1392_v26  ;;  %197 = vrot.lane.b32.xlu0 %v147_v29, %s1330_s5  ;;  %v330_v35 = vstv %s328_s15  ;;  %s383_s22 = ssub.f32 0.0, %s1558_s0 }
  0x37   :  { %v270_v32 = vmul.f32 %v269_v38, %v1441_v24  ;;  %v273_v55 = vmul.f32 %v1447_v49, %v1441_v24  ;;  %v296_v56 = vmul.f32 %v1450_v54, %v1441_v24  ;;  %s1590_s24 = sld [smem:[#allocation8 + $0x203]] }
  0x38   :  { %v268_v57 = vmul.f32 %v1447_v49, %v1445_v36  ;;  %v272_v58 = vmul.f32 %v269_v38, %v1445_v36  ;;  %v298_v59 = vmul.f32 %v1450_v54, %v1445_v36  ;;  %v326_v50 = vmul.f32 %v325_v47, %v1445_v36  ;;  %s1243_s26 = sld [smem:[#allocation8 + $0x183]] }
  0x39   :  { %s462_s23 = ssub.f32 %s1560_s18, %s1562_s19 }
  0x3a   :  { %v271_v60 = vsub.f32 %v268_v57, %v270_v32  ;;  %v274_v61 = vadd.f32 %v273_v55, %v272_v58  ;;  %v297_v62 = vsub.f32 %v268_v57, %v296_v56  ;;  %v1463_v63 = vadd.f32 %v298_v59, %v273_v55  ;;  %s1644_s28 = sld [smem:[#allocation8 + $0x3]] }
  0x3b   :  { %s468_s25 = ssub.f32 0.0, %s1565_s21 }
  0x3c   :  { %v286_v28 = vmul.f32 %v1488_v18, %v271_v60  ;;  %v281_v34 = vmul.f32 %v1488_v18, %v274_v61  ;;  %v308_v37 = vmul.f32 %v297_v62, %v1488_v18  ;;  %s1646_s29 = sld [smem:[#allocation8 + $0x303]] }
  0x3d   :  { %s522_s27 = ssub.f32 0.0, %s1590_s24 }
  0x3e   :  { %s1648_s30 = sld [smem:[#allocation8 + $0x83]] }
  0x3f   :  { %s1245_s3 = sld [smem:[#allocation8 + $0x283]] }
  0x40   :  { %s1650_s4 = sld [smem:[#allocation8 + $0x103]] }
  0x41   :  { %s1679_s9 = sld [smem:[#allocation8 + $0x204]] }
  0x42   :  { %s523_s7 = ssub.f32 0.0, %s1646_s29 }
  0x43   :  { %s1250_s11 = sld [smem:[#allocation8 + $0x184]] }
  0x44   :  { %s602_s8 = ssub.f32 %s1644_s28, %s1648_s30 }
  0x45   :  { %s1735_s13 = sld [smem:[#allocation8 + $0x4]] }
  0x46   :  { %s608_s10 = ssub.f32 0.0, %s1650_s4 }
  0x47   :  { %s662_s12 = ssub.f32 0.0, %s1679_s9 }
  0x48   :  { %s1737_s14 = sld [smem:[#allocation8 + $0x304]] }
  0x49   :  { %s1739_s15 = sld [smem:[#allocation8 + $0x84]] }
  0xa3   :  { %v195_v0 = vpop.permute.xlu0 %194  ;;  %v201_v1 = vpop.permute.xlu1 %200 }
  0xa4   :  { %v196_v2 = vmul.f32 %v1360_v4, %v195_v0  ;;  %v202_v3 = vmul.f32 %v1362_v5, %v201_v1 }
  0xa6   :  { %206 = vst [vmem:[#allocation13] sm:$0x1] %v196_v2  ;;  %208 = vst [vmem:[#allocation13 + $0x10] sm:$0x1] %v202_v3  ;;  %v244_v15 = vmul.f32 %v196_v2, %v1364_v6  ;;  %v247_v16 = vmul.f32 %v196_v2, %v1368_v7  ;;  %v250_v19 = vmul.f32 %v202_v3, %v1364_v6 }
  0xa7   :  { %v204_v8 = vpop.permute.xlu1 %203  ;;  %v253_v22 = vmul.f32 %v202_v3, %v1370_v11 }
  0xa8   :  { %v205_v9 = vmul.f32 %v1362_v5, %v204_v8  ;;  %v198_v10 = vpop.permute.xlu0 %197 }
  0xa9   :  { %v199_v17 = vmul.f32 %v1360_v4, %v198_v10 }
  0xaa   :  { %209 = vst [vmem:[#allocation13 + $0x18] sm:$0x1] %v205_v9  ;;  %v251_v25 = vmul.f32 %v205_v9, %v1370_v11  ;;  %v254_v27 = vmul.f32 %v205_v9, %v1364_v6 }
  0xab   :  { %207 = vst [vmem:[#allocation13 + $0x8] sm:$0x1] %v199_v17  ;;  %v245_v23 = vmul.f32 %v199_v17, %v1368_v7  ;;  %v248_v30 = vmul.f32 %v199_v17, %v1364_v6 }
  0xac   :  { %v252_v41 = vsub.f32 %v250_v19, %v251_v25  ;;  %v255_v42 = vadd.f32 %v254_v27, %v253_v22  ;;  %v303_v27 = vmul.f32 %v1463_v63, %v1488_v18 }
  0xad   :  { %v246_v39 = vsub.f32 %v244_v15, %v245_v23  ;;  %v249_v46 = vadd.f32 %v248_v30, %v247_v16 }
  0xae   :  { %v264_v48 = vmul.f32 %v261_v13, %v252_v41  ;;  %v265_v21 = vmul.f32 %v259_v12, %v255_v42  ;;  %v319_v33 = vmul.f32 %v269_v38, %v252_v41  ;;  %v317_v43 = vmul.f32 %v269_v38, %v255_v42 }
  0xaf   :  { %v320_v44 = vmul.f32 %v1447_v49, %v255_v42  ;;  %v260_v45 = vmul.f32 %v259_v12, %v252_v41  ;;  %v314_v52 = vmul.f32 %v1447_v49, %v249_v46  ;;  %v262_v53 = vmul.f32 %v261_v13, %v255_v42 }
  0xb0   :  { %v266_v51 = vsub.f32 %v264_v48, %v265_v21  ;;  %v292_v29 = vmul.f32 %v289_v40, %v246_v39  ;;  %v283_v32 = vmul.f32 %v1481_v14, %v249_v46  ;;  %v293_v56 = vmul.f32 %v259_v12, %v249_v46 }
  0xb1   :  { %v321_v55 = vadd.f32 %v320_v44, %v319_v33  ;;  %v311_v57 = vmul.f32 %v1450_v54, %v249_v46  ;;  %v263_v59 = vadd.f32 %v262_v53, %v260_v45  ;;  %v313_v38 = vmul.f32 %v1450_v54, %v246_v39 }
  0xb2   :  { %v284_v58 = vmul.f32 %v277_v31, %v266_v51  ;;  %v288_v60 = vmul.f32 %v259_v12, %v246_v39  ;;  %v276_v36 = vmul.f32 %v1481_v14, %v246_v39  ;;  %v294_v61 = vsub.f32 %v292_v29, %v293_v56 }
  0xb3   :  { %v290_v62 = vmul.f32 %v289_v40, %v249_v46  ;;  %v310_v0 = vmul.f32 %v1447_v49, %v246_v39  ;;  %v278_v2 = vmul.f32 %v277_v31, %v263_v59  ;;  %v315_v3 = vadd.f32 %v314_v52, %v313_v38 }
  0xb4   :  { %v285_v1 = vadd.f32 %v284_v58, %v283_v32  ;;  %v316_v8 = vmul.f32 %v1447_v49, %v252_v41  ;;  %v305_v9 = vmul.f32 %v294_v61, %v277_v31  ;;  %v306_v10 = vmul.f32 %v1481_v14, %v255_v42 }
  0xb5   :  { %v291_v13 = vadd.f32 %v290_v62, %v288_v60  ;;  %v312_v15 = vsub.f32 %v310_v0, %v311_v57  ;;  %v279_v12 = vadd.f32 %v278_v2, %v276_v36  ;;  %v323_v16 = vsub.f32 %v315_v3, %v321_v55 }
  0xb6   :  { %v287_v54 = vadd.f32 %v286_v28, %v285_v1  ;;  %v318_v17 = vsub.f32 %v316_v8, %v317_v43  ;;  %v307_v19 = vadd.f32 %v306_v10, %v305_v9  ;;  %v301_v25 = vmul.f32 %v1481_v14, %v252_v41 }
  0xb7   :  { %v300_v22 = vmul.f32 %v291_v13, %v277_v31  ;;  %v282_v49 = vsub.f32 %v279_v12, %v281_v34  ;;  %v324_v23 = vmul.f32 %v323_v16, %v1488_v18  ;;  %v332_v40 = vmul.f32 %v325_v47, %v1441_v24 }
  0xb8   :  { %337 = vrot.lane.b32.xlu1 %v287_v54, %s1330_s5  ;;  %v329_v30 = vsub.f32 %v312_v15, %v318_v17  ;;  %v309_v39 = vsub.f32 %v307_v19, %v308_v37  ;;  %v1522_v28 = vstv %s1236_s1  ;;  %v1525_v18 = vstv %s1506_s16  ;;  %s1252_s16 = sld [smem:[#allocation8 + $0x284]] }
  0xb9   :  { %v302_v42 = vadd.f32 %v301_v25, %v300_v22  ;;  %334 = vrot.lane.b32.xlu0 %v282_v49, %s1330_s5  ;;  %v327_v46 = vadd.f32 %v326_v50, %v324_v23  ;;  %v429_v36 = vstv %s383_s22  ;;  %v399_v0 = vstv %s1238_s20  ;;  %s1741_s1 = sld [smem:[#allocation8 + $0x104]] }
  0xba   :  { %v331_v31 = vmul.f32 %v330_v35, %v329_v30  ;;  %v435_v35 = vstv %s382_s17  ;;  %v465_v9 = vstv %s462_s23  ;;  %v420_v15 = vstv %s1565_s21  ;;  %s663_s17 = ssub.f32 0.0, %s1737_s14 }
  0xbb   :  { %v304_v14 = vadd.f32 %v303_v27, %v302_v42  ;;  %350 = vst [vmem:[#allocation13 + $0x21] sm:$0x1] %v327_v46  ;;  %v396_v41 = vmul.f32 %v327_v46, %v1380_v20  ;;  %v401_v12 = vstv %s1558_s0  ;;  %v415_v16 = vstv %s1560_s18  ;;  %s742_s0 = ssub.f32 %s1735_s13, %s1739_s15 }
  0xbc   :  { %343 = vrot.lane.b32.xlu1 %v309_v39, %s1331_s6  ;;  %v333_v63 = vadd.f32 %v332_v40, %v331_v31  ;;  %v417_v23 = vstv %s1562_s19  ;;  %s1770_s18 = sld [smem:[#allocation8 + $0x205]] }
  0xbd   :  { %340 = vrot.lane.b32.xlu0 %v304_v14, %s1331_s6  ;;  %v1529_v24 = vadd.f32 %v396_v41, %v1392_v26  ;;  %s1257_s20 = sld [smem:[#allocation8 + $0x185]] }
  0xbe   :  { %351 = vst [vmem:[#allocation13 + $0x29] sm:$0x1] %v333_v63  ;;  %v1532_v47 = vmul.f32 %v333_v63, %v1380_v20  ;;  %s1826_s22 = sld [smem:[#allocation8 + $0x5]] }
  0xbf   :  { %v1536_v34 = vmul.f32 %v1522_v28, %v1529_v24  ;;  %v412_v21 = vmul.f32 %v1525_v18, %v1529_v24  ;;  %v438_v43 = vmul.f32 %v435_v35, %v1529_v24  ;;  %s748_s19 = ssub.f32 0.0, %s1741_s1 }
  0xc0   :  { %v1540_v48 = vmul.f32 %v1525_v18, %v1532_v47  ;;  %v413_v33 = vmul.f32 %v1522_v28, %v1532_v47  ;;  %v1547_v37 = vmul.f32 %v435_v35, %v1532_v47  ;;  %s1828_s23 = sld [smem:[#allocation8 + $0x305]] }
  0xc2   :  { %v411_v44 = vsub.f32 %v1536_v34, %v1540_v48  ;;  %v1552_v45 = vadd.f32 %v413_v33, %v412_v21  ;;  %v437_v50 = vsub.f32 %v1536_v34, %v1547_v37  ;;  %v1556_v51 = vadd.f32 %v438_v43, %v413_v33  ;;  %s802_s21 = ssub.f32 0.0, %s1770_s18 }
  0xc3   :  { %v1617_v37 = vstv %s522_s27 }
  0xc4   :  { %v443_v48 = vmul.f32 %v1556_v51, %v420_v15 }
  0xc6   :  { %s803_s27 = ssub.f32 0.0, %s1828_s23 }
 0x12a   :  { %v338_v52 = vpop.permute.xlu1 %337 }
 0x12b   :  { %v339_v53 = vmul.f32 %v1360_v4, %v338_v52  ;;  %v335_v29 = vpop.permute.xlu0 %334 }
 0x12c   :  { %v336_v56 = vmul.f32 %v1360_v4, %v335_v29 }
 0x12d   :  { %347 = vst [vmem:[#allocation13 + $0x9] sm:$0x1] %v339_v53  ;;  %v385_v32 = vmul.f32 %v339_v53, %v1368_v7  ;;  %v388_v55 = vmul.f32 %v339_v53, %v1364_v6 }
 0x12e   :  { %v344_v57 = vpop.permute.xlu1 %343  ;;  %346 = vst [vmem:[#allocation13 + $0x1] sm:$0x1] %v336_v56  ;;  %v384_v58 = vmul.f32 %v336_v56, %v1364_v6  ;;  %v387_v59 = vmul.f32 %v336_v56, %v1368_v7 }
 0x12f   :  { %v345_v38 = vmul.f32 %v1362_v5, %v344_v57  ;;  %v341_v60 = vpop.permute.xlu0 %340 }
 0x130   :  { %v386_v61 = vsub.f32 %v384_v58, %v385_v32  ;;  %v389_v62 = vadd.f32 %v388_v55, %v387_v59  ;;  %v342_v3 = vmul.f32 %v1362_v5, %v341_v60 }
 0x131   :  { %349 = vst [vmem:[#allocation13 + $0x19] sm:$0x1] %v345_v38  ;;  %v391_v1 = vmul.f32 %v345_v38, %v1370_v11  ;;  %v394_v2 = vmul.f32 %v345_v38, %v1364_v6 }
 0x132   :  { %v432_v8 = vmul.f32 %v429_v36, %v386_v61  ;;  %348 = vst [vmem:[#allocation13 + $0x11] sm:$0x1] %v342_v3  ;;  %v390_v10 = vmul.f32 %v342_v3, %v1364_v6  ;;  %v393_v13 = vmul.f32 %v342_v3, %v1370_v11  ;;  %v433_v54 = vmul.f32 %v399_v0, %v389_v62 }
 0x133   :  { %v428_v17 = vmul.f32 %v399_v0, %v386_v61  ;;  %v430_v19 = vmul.f32 %v429_v36, %v389_v62  ;;  %v454_v27 = vmul.f32 %v1522_v28, %v389_v62  ;;  %v453_v49 = vmul.f32 %v435_v35, %v386_v61 }
 0x134   :  { %v392_v22 = vsub.f32 %v390_v10, %v391_v1  ;;  %v395_v25 = vadd.f32 %v394_v2, %v393_v13  ;;  %v434_v30 = vsub.f32 %v432_v8, %v433_v54  ;;  %v451_v40 = vmul.f32 %v435_v35, %v389_v62 }
 0x135   :  { %v450_v42 = vmul.f32 %v1522_v28, %v386_v61  ;;  %v431_v14 = vadd.f32 %v430_v19, %v428_v17  ;;  %v423_v52 = vmul.f32 %v415_v16, %v389_v62  ;;  %v416_v53 = vmul.f32 %v415_v16, %v386_v61 }
 0x136   :  { %v404_v39 = vmul.f32 %v401_v12, %v392_v22  ;;  %v405_v46 = vmul.f32 %v399_v0, %v395_v25  ;;  %v459_v31 = vmul.f32 %v1525_v18, %v392_v22  ;;  %v457_v63 = vmul.f32 %v1525_v18, %v395_v25 }
 0x137   :  { %v460_v41 = vmul.f32 %v1522_v28, %v395_v25  ;;  %v400_v21 = vmul.f32 %v399_v0, %v392_v22  ;;  %v402_v33 = vmul.f32 %v401_v12, %v395_v25  ;;  %v455_v29 = vadd.f32 %v454_v27, %v453_v49 }
 0x138   :  { %v406_v43 = vsub.f32 %v404_v39, %v405_v46  ;;  %v452_v55 = vsub.f32 %v450_v42, %v451_v40  ;;  %v456_v56 = vmul.f32 %v1522_v28, %v392_v22  ;;  %v445_v58 = vmul.f32 %v434_v30, %v417_v23 }
 0x139   :  { %v461_v35 = vadd.f32 %v460_v41, %v459_v31  ;;  %v403_v32 = vadd.f32 %v402_v33, %v400_v21  ;;  %v446_v59 = vmul.f32 %v415_v16, %v395_v25  ;;  %v440_v18 = vmul.f32 %v431_v14, %v417_v23 }
 0x13a   :  { %v424_v57 = vmul.f32 %v417_v23, %v406_v43  ;;  %v441_v36 = vmul.f32 %v415_v16, %v392_v22  ;;  %v458_v0 = vsub.f32 %v456_v56, %v457_v63  ;;  %v426_v61 = vmul.f32 %v420_v15, %v411_v44 }
 0x13b   :  { %v418_v38 = vmul.f32 %v417_v23, %v403_v32  ;;  %v463_v60 = vsub.f32 %v455_v29, %v461_v35  ;;  %v466_v62 = vmul.f32 %v465_v9, %v1529_v24  ;;  %v470_v2 = vstv %s468_s25  ;;  %s1259_s25 = sld [smem:[#allocation8 + $0x285]] }
 0x13c   :  { %v425_v1 = vadd.f32 %v424_v57, %v423_v52  ;;  %v421_v28 = vmul.f32 %v420_v15, %v1552_v45  ;;  %v469_v10 = vsub.f32 %v452_v55, %v458_v0  ;;  %v447_v54 = vadd.f32 %v446_v59, %v445_v58 }
 0x13d   :  { %v419_v3 = vadd.f32 %v418_v38, %v416_v53  ;;  %v464_v8 = vmul.f32 %v463_v60, %v420_v15  ;;  %v472_v12 = vmul.f32 %v465_v9, %v1532_v47  ;;  %v442_v17 = vadd.f32 %v441_v36, %v440_v18 }
 0x13e   :  { %v427_v13 = vadd.f32 %v426_v61, %v425_v1  ;;  %v471_v22 = vmul.f32 %v470_v2, %v469_v10  ;;  %v448_v24 = vmul.f32 %v437_v50, %v420_v15  ;;  %v1608_v9 = vstv %s1243_s26  ;;  %s1832_s26 = sld [smem:[#allocation8 + $0x105]] }
 0x13f   :  { %v422_v16 = vsub.f32 %v419_v3, %v421_v28  ;;  %v467_v19 = vadd.f32 %v466_v62, %v464_v8  ;;  %v1611_v25 = vstv %s1590_s24  ;;  %v444_v27 = vadd.f32 %v443_v48, %v442_v17  ;;  %s1830_s24 = sld [smem:[#allocation8 + $0x85]] }
 0x140   :  { %477 = vrot.lane.b32.xlu1 %v427_v13, %s1330_s5  ;;  %v473_v44 = vadd.f32 %v472_v12, %v471_v22  ;;  %v449_v47 = vsub.f32 %v447_v54, %v448_v24  ;;  %v539_v55 = vstv %s1245_s3  ;;  %v569_v59 = vstv %s523_s7  ;;  %s1264_s3 = sld [smem:[#allocation8 + $0x186]] }
 0x141   :  { %474 = vrot.lane.b32.xlu0 %v422_v16, %s1330_s5  ;;  %490 = vst [vmem:[#allocation13 + $0x22] sm:$0x1] %v467_v19  ;;  %v536_v45 = vmul.f32 %v467_v19, %v1380_v20  ;;  %v1665_v60 = vstv %s602_s8  ;;  %v555_v1 = vstv %s1644_s28  ;;  %v560_v61 = vstv %s1650_s4  ;;  %s1917_s7 = sld [smem:[#allocation8 + $0x6]] }
 0x142   :  { %491 = vst [vmem:[#allocation13 + $0x2a] sm:$0x1] %v473_v44  ;;  %v1615_v34 = vmul.f32 %v473_v44, %v1380_v20  ;;  %v541_v62 = vstv %s1646_s29  ;;  %v557_v2 = vstv %s1648_s30  ;;  %s1861_s29 = sld [smem:[#allocation8 + $0x206]] }
 0x143   :  { %v537_v49 = vadd.f32 %v536_v45, %v1392_v26  ;;  %s1919_s8 = sld [smem:[#allocation8 + $0x306]] }
 0x144   :  { %483 = vrot.lane.b32.xlu1 %v449_v47, %s1331_s6  ;;  %v1626_v51 = vmul.f32 %v1611_v25, %v1615_v34  ;;  %v553_v23 = vmul.f32 %v1608_v9, %v1615_v34  ;;  %v1633_v30 = vmul.f32 %v1617_v37, %v1615_v34  ;;  %s888_s30 = ssub.f32 0.0, %s1832_s26 }
 0x145   :  { %480 = vrot.lane.b32.xlu0 %v444_v27, %s1331_s6  ;;  %v1622_v50 = vmul.f32 %v1608_v9, %v537_v49  ;;  %v552_v15 = vmul.f32 %v1611_v25, %v537_v49  ;;  %v578_v40 = vmul.f32 %v1617_v37, %v537_v49  ;;  %v606_v54 = vmul.f32 %v1665_v60, %v537_v49  ;;  %s882_s28 = ssub.f32 %s1826_s22, %s1830_s24 }
 0x147   :  { %v551_v42 = vsub.f32 %v1622_v50, %v1626_v51  ;;  %v1638_v39 = vadd.f32 %v553_v23, %v552_v15  ;;  %v577_v46 = vsub.f32 %v1622_v50, %v1633_v30  ;;  %v1642_v31 = vadd.f32 %v578_v40, %v553_v23 }
 0x148   :  { %v1703_v50 = vstv %s1679_s9  ;;  %v1705_v30 = vstv %s662_s12  ;;  %s942_s4 = ssub.f32 0.0, %s1861_s29 }
 0x149   :  { %v588_v51 = vmul.f32 %v577_v46, %v560_v61  ;;  %s1921_s9 = sld [smem:[#allocation8 + $0x86]] }
 0x14a   :  { %s943_s12 = ssub.f32 0.0, %s1919_s8 }
 0x1b2   :  { %v478_v14 = vpop.permute.xlu1 %477 }
 0x1b3   :  { %v479_v63 = vmul.f32 %v1360_v4, %v478_v14  ;;  %v475_v41 = vpop.permute.xlu0 %474 }
 0x1b4   :  { %v476_v21 = vmul.f32 %v1360_v4, %v475_v41 }
 0x1b5   :  { %487 = vst [vmem:[#allocation13 + $0xa] sm:$0x1] %v479_v63  ;;  %v525_v33 = vmul.f32 %v479_v63, %v1368_v7  ;;  %v528_v43 = vmul.f32 %v479_v63, %v1364_v6 }
 0x1b6   :  { %486 = vst [vmem:[#allocation13 + $0x2] sm:$0x1] %v476_v21  ;;  %v524_v52 = vmul.f32 %v476_v21, %v1364_v6  ;;  %v527_v53 = vmul.f32 %v476_v21, %v1368_v7  ;;  %v484_v29 = vpop.permute.xlu1 %483 }
 0x1b7   :  { %v485_v35 = vmul.f32 %v1362_v5, %v484_v29  ;;  %v481_v32 = vpop.permute.xlu0 %480 }
 0x1b8   :  { %v526_v56 = vsub.f32 %v524_v52, %v525_v33  ;;  %v529_v57 = vadd.f32 %v528_v43, %v527_v53  ;;  %v482_v58 = vmul.f32 %v1362_v5, %v481_v32 }
 0x1b9   :  { %489 = vst [vmem:[#allocation13 + $0x1a] sm:$0x1] %v485_v35  ;;  %v531_v18 = vmul.f32 %v485_v35, %v1370_v11  ;;  %v534_v38 = vmul.f32 %v485_v35, %v1364_v6 }
 0x1ba   :  { %488 = vst [vmem:[#allocation13 + $0x12] sm:$0x1] %v482_v58  ;;  %v530_v36 = vmul.f32 %v482_v58, %v1364_v6  ;;  %v533_v0 = vmul.f32 %v482_v58, %v1370_v11  ;;  %v572_v3 = vmul.f32 %v569_v59, %v526_v56  ;;  %v573_v28 = vmul.f32 %v539_v55, %v529_v57 }
 0x1bb   :  { %v568_v13 = vmul.f32 %v539_v55, %v526_v56  ;;  %v563_v12 = vmul.f32 %v555_v1, %v529_v57  ;;  %v594_v16 = vmul.f32 %v1608_v9, %v529_v57  ;;  %v593_v17 = vmul.f32 %v1617_v37, %v526_v56 }
 0x1bc   :  { %v532_v8 = vsub.f32 %v530_v36, %v531_v18  ;;  %v535_v10 = vadd.f32 %v534_v38, %v533_v0  ;;  %v570_v19 = vmul.f32 %v569_v59, %v529_v57  ;;  %v574_v44 = vsub.f32 %v572_v3, %v573_v28 }
 0x1bd   :  { %v591_v15 = vmul.f32 %v1617_v37, %v529_v57  ;;  %v590_v14 = vmul.f32 %v1608_v9, %v526_v56  ;;  %v556_v21 = vmul.f32 %v555_v1, %v526_v56  ;;  %v595_v33 = vadd.f32 %v594_v16, %v593_v17 }
 0x1be   :  { %v544_v22 = vmul.f32 %v541_v62, %v532_v8  ;;  %v545_v24 = vmul.f32 %v539_v55, %v535_v10  ;;  %v599_v48 = vmul.f32 %v1611_v25, %v532_v8  ;;  %v600_v45 = vmul.f32 %v1608_v9, %v535_v10 }
 0x1bf   :  { %v540_v47 = vmul.f32 %v539_v55, %v532_v8  ;;  %v542_v27 = vmul.f32 %v541_v62, %v535_v10  ;;  %v597_v23 = vmul.f32 %v1611_v25, %v535_v10  ;;  %v571_v40 = vadd.f32 %v570_v19, %v568_v13 }
 0x1c0   :  { %v546_v49 = vsub.f32 %v544_v22, %v545_v24  ;;  %v601_v63 = vadd.f32 %v600_v45, %v599_v48  ;;  %v585_v52 = vmul.f32 %v574_v44, %v557_v2  ;;  %v586_v53 = vmul.f32 %v555_v1, %v535_v10 }
 0x1c1   :  { %v543_v41 = vadd.f32 %v542_v27, %v540_v47  ;;  %v596_v29 = vmul.f32 %v1608_v9, %v532_v8  ;;  %v580_v32 = vmul.f32 %v571_v40, %v557_v2  ;;  %v581_v55 = vmul.f32 %v555_v1, %v532_v8 }
 0x1c2   :  { %v564_v43 = vmul.f32 %v557_v2, %v546_v49  ;;  %v603_v35 = vsub.f32 %v595_v33, %v601_v63  ;;  %v566_v57 = vmul.f32 %v560_v61, %v551_v42  ;;  %v592_v58 = vsub.f32 %v590_v14, %v591_v15 }
 0x1c3   :  { %v558_v37 = vmul.f32 %v557_v2, %v543_v41  ;;  %v598_v56 = vsub.f32 %v596_v29, %v597_v23  ;;  %v561_v18 = vmul.f32 %v560_v61, %v1638_v39  ;;  %v610_v36 = vstv %s608_s10  ;;  %s1266_s10 = sld [smem:[#allocation8 + $0x286]] }
 0x1c4   :  { %v565_v25 = vadd.f32 %v564_v43, %v563_v12  ;;  %v604_v38 = vmul.f32 %v603_v35, %v560_v61  ;;  %v587_v9 = vadd.f32 %v586_v53, %v585_v52  ;;  %v582_v28 = vadd.f32 %v581_v55, %v580_v32 }
 0x1c5   :  { %v559_v59 = vadd.f32 %v558_v37, %v556_v21  ;;  %v609_v62 = vsub.f32 %v592_v58, %v598_v56  ;;  %v612_v39 = vmul.f32 %v1665_v60, %v1615_v34  ;;  %v583_v1 = vmul.f32 %v1642_v31, %v560_v61 }
 0x1c6   :  { %v567_v0 = vadd.f32 %v566_v57, %v565_v25  ;;  %v607_v2 = vadd.f32 %v606_v54, %v604_v38  ;;  %v589_v10 = vsub.f32 %v587_v9, %v588_v51  ;;  %v1699_v54 = vstv %s1250_s11  ;;  %s1923_s11 = sld [smem:[#allocation8 + $0x106]] }
 0x1c7   :  { %v562_v3 = vsub.f32 %v559_v59, %v561_v18  ;;  %v611_v42 = vmul.f32 %v610_v36, %v609_v62  ;;  %v584_v12 = vadd.f32 %v583_v1, %v582_v28  ;;  %v679_v33 = vstv %s1252_s16  ;;  %s1271_s16 = sld [smem:[#allocation8 + $0x187]] }
 0x1c8   :  { %617 = vrot.lane.b32.xlu1 %v567_v0, %s1330_s5  ;;  %630 = vst [vmem:[#allocation13 + $0x23] sm:$0x1] %v607_v2  ;;  %v676_v8 = vmul.f32 %v607_v2, %v1380_v20  ;;  %v709_v29 = vstv %s663_s17  ;;  %v1756_v32 = vstv %s742_s0  ;;  %v695_v57 = vstv %s1735_s13  ;;  %s1022_s13 = ssub.f32 %s1917_s7, %s1921_s9 }
 0x1c9   :  { %614 = vrot.lane.b32.xlu0 %v562_v3, %s1330_s5  ;;  %v613_v13 = vadd.f32 %v612_v39, %v611_v42  ;;  %v700_v58 = vstv %s1741_s1  ;;  %v681_v56 = vstv %s1737_s14  ;;  %v697_v59 = vstv %s1739_s15  ;;  %s1952_s14 = sld [smem:[#allocation8 + $0x207]] }
 0x1ca   :  { %v677_v16 = vadd.f32 %v676_v8, %v1392_v26  ;;  %s2004_s17 = sld [smem:[#allocation8 + $0x7]] }
 0x1cb   :  { %631 = vst [vmem:[#allocation13 + $0x2b] sm:$0x1] %v613_v13  ;;  %v1709_v34 = vmul.f32 %v613_v13, %v1380_v20  ;;  %s2006_s0 = sld [smem:[#allocation8 + $0x87]] }
 0x1cc   :  { %623 = vrot.lane.b32.xlu1 %v589_v10, %s1331_s6  ;;  %v1713_v46 = vmul.f32 %v1699_v54, %v677_v16  ;;  %v692_v31 = vmul.f32 %v1703_v50, %v677_v16  ;;  %v718_v60 = vmul.f32 %v1705_v30, %v677_v16  ;;  %v746_v62 = vmul.f32 %v1756_v32, %v677_v16  ;;  %s1028_s15 = ssub.f32 0.0, %s1923_s11 }
 0x1cd   :  { %620 = vrot.lane.b32.xlu0 %v584_v12, %s1331_s6  ;;  %v1719_v61 = vmul.f32 %v1703_v50, %v1709_v34  ;;  %v693_v17 = vmul.f32 %v1699_v54, %v1709_v34  ;;  %v1725_v19 = vmul.f32 %v1705_v30, %v1709_v34 }
 0x1cf   :  { %v691_v22 = vsub.f32 %v1713_v46, %v1719_v61  ;;  %v1729_v24 = vadd.f32 %v693_v17, %v692_v31  ;;  %v717_v48 = vsub.f32 %v1713_v46, %v1725_v19  ;;  %v1733_v44 = vadd.f32 %v718_v60, %v693_v17  ;;  %s1082_s1 = ssub.f32 0.0, %s1952_s14 }
 0x1d0   :  { %v1794_v46 = vstv %s1770_s18  ;;  %v1796_v19 = vstv %s802_s21  ;;  %s2008_s18 = sld [smem:[#allocation8 + $0x307]] }
 0x1d1   :  { %v728_v61 = vmul.f32 %v717_v48, %v700_v58  ;;  %s1162_s21 = ssub.f32 %s2004_s17, %s2006_s0 }
 0x23a   :  { %v618_v45 = vpop.permute.xlu1 %617 }
 0x23b   :  { %v619_v47 = vmul.f32 %v1360_v4, %v618_v45  ;;  %v615_v27 = vpop.permute.xlu0 %614 }
 0x23c   :  { %v616_v15 = vmul.f32 %v1360_v4, %v615_v27 }
 0x23d   :  { %627 = vst [vmem:[#allocation13 + $0xb] sm:$0x1] %v619_v47  ;;  %v665_v49 = vmul.f32 %v619_v47, %v1368_v7  ;;  %v668_v23 = vmul.f32 %v619_v47, %v1364_v6 }
 0x23e   :  { %626 = vst [vmem:[#allocation13 + $0x3] sm:$0x1] %v616_v15  ;;  %v664_v40 = vmul.f32 %v616_v15, %v1364_v6  ;;  %v667_v14 = vmul.f32 %v616_v15, %v1368_v7  ;;  %v624_v63 = vpop.permute.xlu1 %623 }
 0x23f   :  { %v625_v41 = vmul.f32 %v1362_v5, %v624_v63  ;;  %v621_v21 = vpop.permute.xlu0 %620 }
 0x240   :  { %v666_v43 = vsub.f32 %v664_v40, %v665_v49  ;;  %v669_v52 = vadd.f32 %v668_v23, %v667_v14  ;;  %v622_v53 = vmul.f32 %v1362_v5, %v621_v21 }
 0x241   :  { %629 = vst [vmem:[#allocation13 + $0x1b] sm:$0x1] %v625_v41  ;;  %v671_v37 = vmul.f32 %v625_v41, %v1370_v11  ;;  %v674_v35 = vmul.f32 %v625_v41, %v1364_v6 }
 0x242   :  { %628 = vst [vmem:[#allocation13 + $0x13] sm:$0x1] %v622_v53  ;;  %v670_v55 = vmul.f32 %v622_v53, %v1364_v6  ;;  %v673_v25 = vmul.f32 %v622_v53, %v1370_v11  ;;  %v712_v18 = vmul.f32 %v709_v29, %v666_v43  ;;  %v713_v38 = vmul.f32 %v679_v33, %v669_v52 }
 0x243   :  { %v708_v9 = vmul.f32 %v679_v33, %v666_v43  ;;  %v703_v3 = vmul.f32 %v695_v57, %v669_v52  ;;  %v734_v28 = vmul.f32 %v1699_v54, %v669_v52  ;;  %v733_v2 = vmul.f32 %v1705_v30, %v666_v43 }
 0x244   :  { %v672_v36 = vsub.f32 %v670_v55, %v671_v37  ;;  %v675_v0 = vadd.f32 %v674_v35, %v673_v25  ;;  %v710_v51 = vmul.f32 %v709_v29, %v669_v52  ;;  %v714_v8 = vsub.f32 %v712_v18, %v713_v38 }
 0x245   :  { %v731_v31 = vmul.f32 %v1705_v30, %v669_v52  ;;  %v730_v45 = vmul.f32 %v1699_v54, %v666_v43  ;;  %v696_v15 = vmul.f32 %v695_v57, %v666_v43  ;;  %v735_v49 = vadd.f32 %v734_v28, %v733_v2 }
 0x246   :  { %v684_v42 = vmul.f32 %v681_v56, %v672_v36  ;;  %v685_v39 = vmul.f32 %v679_v33, %v675_v0  ;;  %v739_v1 = vmul.f32 %v1703_v50, %v672_v36  ;;  %v740_v10 = vmul.f32 %v1699_v54, %v675_v0 }
 0x247   :  { %v680_v13 = vmul.f32 %v679_v33, %v672_v36  ;;  %v682_v12 = vmul.f32 %v681_v56, %v675_v0  ;;  %v737_v60 = vmul.f32 %v1703_v50, %v675_v0  ;;  %v711_v17 = vadd.f32 %v710_v51, %v708_v9 }
 0x248   :  { %v686_v16 = vsub.f32 %v684_v42, %v685_v39  ;;  %v741_v47 = vadd.f32 %v740_v10, %v739_v1  ;;  %v725_v40 = vmul.f32 %v714_v8, %v697_v59  ;;  %v726_v14 = vmul.f32 %v695_v57, %v675_v0 }
 0x249   :  { %v683_v27 = vadd.f32 %v682_v12, %v680_v13  ;;  %v736_v63 = vmul.f32 %v1699_v54, %v672_v36  ;;  %v720_v21 = vmul.f32 %v711_v17, %v697_v59  ;;  %v721_v33 = vmul.f32 %v695_v57, %v672_v36 }
 0x24a   :  { %v704_v23 = vmul.f32 %v697_v59, %v686_v16  ;;  %v743_v41 = vsub.f32 %v735_v49, %v741_v47  ;;  %v706_v52 = vmul.f32 %v700_v58, %v691_v22  ;;  %v732_v53 = vsub.f32 %v730_v45, %v731_v31 }
 0x24b   :  { %v698_v30 = vmul.f32 %v697_v59, %v683_v27  ;;  %v738_v43 = vsub.f32 %v736_v63, %v737_v60  ;;  %v701_v37 = vmul.f32 %v700_v58, %v1729_v24  ;;  %v750_v55 = vstv %s748_s19  ;;  %s2010_s19 = sld [smem:[#allocation8 + $0x107]] }
 0x24c   :  { %v705_v50 = vadd.f32 %v704_v23, %v703_v3  ;;  %v744_v35 = vmul.f32 %v743_v41, %v700_v58  ;;  %v727_v54 = vadd.f32 %v726_v14, %v725_v40  ;;  %v722_v38 = vadd.f32 %v721_v33, %v720_v21 }
 0x24d   :  { %v699_v29 = vadd.f32 %v698_v30, %v696_v15  ;;  %v749_v56 = vsub.f32 %v732_v53, %v738_v43  ;;  %v752_v24 = vmul.f32 %v1756_v32, %v1709_v34  ;;  %v723_v57 = vmul.f32 %v1733_v44, %v700_v58 }
 0x24e   :  { %v707_v25 = vadd.f32 %v706_v52, %v705_v50  ;;  %v747_v59 = vadd.f32 %v746_v62, %v744_v35  ;;  %v729_v0 = vsub.f32 %v727_v54, %v728_v61  ;;  %v1790_v62 = vstv %s1257_s20  ;;  %s1273_s20 = sld [smem:[#allocation8 + $0x287]] }
 0x24f   :  { %v702_v18 = vsub.f32 %v699_v29, %v701_v37  ;;  %v751_v22 = vmul.f32 %v750_v55, %v749_v56  ;;  %v724_v3 = vadd.f32 %v723_v57, %v722_v38  ;;  %v819_v49 = vstv %s1259_s25 }
 0x250   :  { %757 = vrot.lane.b32.xlu1 %v707_v25, %s1330_s5  ;;  %770 = vst [vmem:[#allocation13 + $0x24] sm:$0x1] %v747_v59  ;;  %v816_v36 = vmul.f32 %v747_v59, %v1380_v20  ;;  %v849_v63 = vstv %s803_s27  ;;  %v1847_v21 = vstv %s882_s28  ;;  %v835_v52 = vstv %s1826_s22  ;;  %s1083_s22 = ssub.f32 0.0, %s2008_s18 }
 0x251   :  { %754 = vrot.lane.b32.xlu0 %v702_v18, %s1330_s5  ;;  %v753_v9 = vadd.f32 %v752_v24, %v751_v22  ;;  %v840_v53 = vstv %s1832_s26  ;;  %v821_v43 = vstv %s1828_s23  ;;  %v837_v29 = vstv %s1830_s24  ;;  %s1168_s23 = ssub.f32 0.0, %s2010_s19 }
 0x252   :  { %v817_v28 = vadd.f32 %v816_v36, %v1392_v26 }
 0x253   :  { %771 = vst [vmem:[#allocation13 + $0x2c] sm:$0x1] %v753_v9  ;;  %v1800_v34 = vmul.f32 %v753_v9, %v1380_v20 }
 0x254   :  { %763 = vrot.lane.b32.xlu1 %v729_v0, %s1331_s6  ;;  %v1804_v48 = vmul.f32 %v1790_v62, %v817_v28  ;;  %v832_v44 = vmul.f32 %v1794_v46, %v817_v28  ;;  %v858_v32 = vmul.f32 %v1796_v19, %v817_v28  ;;  %v886_v56 = vmul.f32 %v1847_v21, %v817_v28 }
 0x255   :  { %760 = vrot.lane.b32.xlu0 %v724_v3, %s1331_s6  ;;  %v1810_v58 = vmul.f32 %v1794_v46, %v1800_v34  ;;  %v833_v2 = vmul.f32 %v1790_v62, %v1800_v34  ;;  %v1816_v51 = vmul.f32 %v1796_v19, %v1800_v34 }
 0x257   :  { %v831_v42 = vsub.f32 %v1804_v48, %v1810_v58  ;;  %v1820_v39 = vadd.f32 %v833_v2, %v832_v44  ;;  %v857_v1 = vsub.f32 %v1804_v48, %v1816_v51  ;;  %v1824_v8 = vadd.f32 %v858_v32, %v833_v2 }
 0x258   :  { %v1885_v48 = vstv %s1861_s29  ;;  %v1887_v51 = vstv %s942_s4 }
 0x259   :  { %v868_v58 = vmul.f32 %v857_v1, %v840_v53 }
 0x2c2   :  { %v758_v10 = vpop.permute.xlu1 %757 }
 0x2c3   :  { %v759_v13 = vmul.f32 %v1360_v4, %v758_v10  ;;  %v755_v12 = vpop.permute.xlu0 %754 }
 0x2c4   :  { %v756_v31 = vmul.f32 %v1360_v4, %v755_v12 }
 0x2c5   :  { %767 = vst [vmem:[#allocation13 + $0xc] sm:$0x1] %v759_v13  ;;  %v805_v16 = vmul.f32 %v759_v13, %v1368_v7  ;;  %v808_v60 = vmul.f32 %v759_v13, %v1364_v6 }
 0x2c6   :  { %766 = vst [vmem:[#allocation13 + $0x4] sm:$0x1] %v756_v31  ;;  %v804_v17 = vmul.f32 %v756_v31, %v1364_v6  ;;  %v807_v45 = vmul.f32 %v756_v31, %v1368_v7  ;;  %v764_v47 = vpop.permute.xlu1 %763 }
 0x2c7   :  { %v765_v27 = vmul.f32 %v1362_v5, %v764_v47  ;;  %v761_v15 = vpop.permute.xlu0 %760 }
 0x2c8   :  { %v806_v23 = vsub.f32 %v804_v17, %v805_v16  ;;  %v809_v40 = vadd.f32 %v808_v60, %v807_v45  ;;  %v762_v14 = vmul.f32 %v1362_v5, %v761_v15 }
 0x2c9   :  { %769 = vst [vmem:[#allocation13 + $0x1c] sm:$0x1] %v765_v27  ;;  %v811_v30 = vmul.f32 %v765_v27, %v1370_v11  ;;  %v814_v41 = vmul.f32 %v765_v27, %v1364_v6 }
 0x2ca   :  { %768 = vst [vmem:[#allocation13 + $0x14] sm:$0x1] %v762_v14  ;;  %v810_v33 = vmul.f32 %v762_v14, %v1364_v6  ;;  %v813_v50 = vmul.f32 %v762_v14, %v1370_v11  ;;  %v852_v37 = vmul.f32 %v849_v63, %v806_v23  ;;  %v853_v35 = vmul.f32 %v819_v49, %v809_v40 }
 0x2cb   :  { %v848_v54 = vmul.f32 %v819_v49, %v806_v23  ;;  %v843_v18 = vmul.f32 %v835_v52, %v809_v40  ;;  %v874_v38 = vmul.f32 %v1790_v62, %v809_v40  ;;  %v873_v59 = vmul.f32 %v1796_v19, %v806_v23 }
 0x2cc   :  { %v812_v55 = vsub.f32 %v810_v33, %v811_v30  ;;  %v815_v25 = vadd.f32 %v814_v41, %v813_v50  ;;  %v850_v61 = vmul.f32 %v849_v63, %v809_v40  ;;  %v854_v36 = vsub.f32 %v852_v37, %v853_v35 }
 0x2cd   :  { %v871_v44 = vmul.f32 %v1796_v19, %v809_v40  ;;  %v870_v10 = vmul.f32 %v1790_v62, %v806_v23  ;;  %v836_v31 = vmul.f32 %v835_v52, %v806_v23  ;;  %v875_v16 = vadd.f32 %v874_v38, %v873_v59 }
 0x2ce   :  { %v824_v22 = vmul.f32 %v821_v43, %v812_v55  ;;  %v825_v24 = vmul.f32 %v819_v49, %v815_v25  ;;  %v879_v57 = vmul.f32 %v1794_v46, %v812_v55  ;;  %v880_v0 = vmul.f32 %v1790_v62, %v815_v25 }
 0x2cf   :  { %v820_v9 = vmul.f32 %v819_v49, %v812_v55  ;;  %v822_v3 = vmul.f32 %v821_v43, %v815_v25  ;;  %v877_v32 = vmul.f32 %v1794_v46, %v815_v25  ;;  %v851_v2 = vadd.f32 %v850_v61, %v848_v54 }
 0x2d0   :  { %v826_v28 = vsub.f32 %v824_v22, %v825_v24  ;;  %v881_v13 = vadd.f32 %v880_v0, %v879_v57  ;;  %v865_v17 = vmul.f32 %v854_v36, %v837_v29  ;;  %v866_v45 = vmul.f32 %v835_v52, %v815_v25 }
 0x2d1   :  { %v823_v12 = vadd.f32 %v822_v3, %v820_v9  ;;  %v876_v47 = vmul.f32 %v1790_v62, %v812_v55  ;;  %v860_v15 = vmul.f32 %v851_v2, %v837_v29  ;;  %v861_v49 = vmul.f32 %v835_v52, %v812_v55 }
 0x2d2   :  { %v844_v60 = vmul.f32 %v837_v29, %v826_v28  ;;  %v883_v27 = vsub.f32 %v875_v16, %v881_v13  ;;  %v846_v40 = vmul.f32 %v840_v53, %v831_v42  ;;  %v872_v14 = vsub.f32 %v870_v10, %v871_v44 }
 0x2d3   :  { %v838_v19 = vmul.f32 %v837_v29, %v823_v12  ;;  %v878_v23 = vsub.f32 %v876_v47, %v877_v32  ;;  %v841_v30 = vmul.f32 %v840_v53, %v1820_v39  ;;  %v890_v33 = vstv %s888_s30 }
 0x2d4   :  { %v845_v46 = vadd.f32 %v844_v60, %v843_v18  ;;  %v884_v41 = vmul.f32 %v883_v27, %v840_v53  ;;  %v867_v62 = vadd.f32 %v866_v45, %v865_v17  ;;  %v862_v35 = vadd.f32 %v861_v49, %v860_v15 }
 0x2d5   :  { %v839_v63 = vadd.f32 %v838_v19, %v836_v31  ;;  %v889_v43 = vsub.f32 %v872_v14, %v878_v23  ;;  %v892_v39 = vmul.f32 %v1847_v21, %v1800_v34  ;;  %v863_v52 = vmul.f32 %v1824_v8, %v840_v53 }
 0x2d6   :  { %v847_v50 = vadd.f32 %v846_v40, %v845_v46  ;;  %v887_v29 = vadd.f32 %v886_v56, %v884_v41  ;;  %v869_v25 = vsub.f32 %v867_v62, %v868_v58  ;;  %v1881_v56 = vstv %s1264_s3 }
 0x2d7   :  { %v842_v37 = vsub.f32 %v839_v63, %v841_v30  ;;  %v891_v42 = vmul.f32 %v890_v33, %v889_v43  ;;  %v864_v18 = vadd.f32 %v863_v52, %v862_v35  ;;  %v959_v16 = vstv %s1266_s10 }
 0x2d8   :  { %897 = vrot.lane.b32.xlu1 %v847_v50, %s1330_s5  ;;  %910 = vst [vmem:[#allocation13 + $0x25] sm:$0x1] %v887_v29  ;;  %v956_v55 = vmul.f32 %v887_v29, %v1380_v20  ;;  %v989_v47 = vstv %s943_s12  ;;  %v1938_v15 = vstv %s1022_s13  ;;  %v975_v40 = vstv %s1917_s7 }
 0x2d9   :  { %894 = vrot.lane.b32.xlu0 %v842_v37, %s1330_s5  ;;  %v893_v54 = vadd.f32 %v892_v39, %v891_v42  ;;  %v980_v14 = vstv %s1923_s11  ;;  %v961_v23 = vstv %s1919_s8  ;;  %v977_v63 = vstv %s1921_s9 }
 0x2da   :  { %v957_v38 = vadd.f32 %v956_v55, %v1392_v26 }
 0x2db   :  { %911 = vst [vmem:[#allocation13 + $0x2d] sm:$0x1] %v893_v54  ;;  %v1891_v34 = vmul.f32 %v893_v54, %v1380_v20 }
 0x2dc   :  { %903 = vrot.lane.b32.xlu1 %v869_v25, %s1331_s6  ;;  %v1895_v1 = vmul.f32 %v1881_v56, %v957_v38  ;;  %v972_v8 = vmul.f32 %v1885_v48, %v957_v38  ;;  %v998_v21 = vmul.f32 %v1887_v51, %v957_v38  ;;  %v1026_v43 = vmul.f32 %v1938_v15, %v957_v38 }
 0x2dd   :  { %900 = vrot.lane.b32.xlu0 %v864_v18, %s1331_s6  ;;  %v1901_v53 = vmul.f32 %v1885_v48, %v1891_v34  ;;  %v973_v59 = vmul.f32 %v1881_v56, %v1891_v34  ;;  %v1907_v61 = vmul.f32 %v1887_v51, %v1891_v34 }
 0x2df   :  { %v971_v22 = vsub.f32 %v1895_v1, %v1901_v53  ;;  %v1911_v24 = vadd.f32 %v973_v59, %v972_v8  ;;  %v997_v57 = vsub.f32 %v1895_v1, %v1907_v61  ;;  %v1915_v36 = vadd.f32 %v998_v21, %v973_v59 }
 0x2e0   :  { %v1976_v1 = vstv %s1952_s14  ;;  %v1135_v61 = vstv %s1082_s1 }
 0x2e1   :  { %v1008_v53 = vmul.f32 %v997_v57, %v980_v14 }
 0x34a   :  { %v898_v0 = vpop.permute.xlu1 %897 }
 0x34b   :  { %v899_v9 = vmul.f32 %v1360_v4, %v898_v0  ;;  %v895_v3 = vpop.permute.xlu0 %894 }
 0x34c   :  { %v896_v44 = vmul.f32 %v1360_v4, %v895_v3 }
 0x34d   :  { %907 = vst [vmem:[#allocation13 + $0xd] sm:$0x1] %v899_v9  ;;  %v945_v28 = vmul.f32 %v899_v9, %v1368_v7  ;;  %v948_v32 = vmul.f32 %v899_v9, %v1364_v6 }
 0x34e   :  { %906 = vst [vmem:[#allocation13 + $0x5] sm:$0x1] %v896_v44  ;;  %v944_v2 = vmul.f32 %v896_v44, %v1364_v6  ;;  %v947_v10 = vmul.f32 %v896_v44, %v1368_v7  ;;  %v904_v13 = vpop.permute.xlu1 %903 }
 0x34f   :  { %v905_v12 = vmul.f32 %v1362_v5, %v904_v13  ;;  %v901_v31 = vpop.permute.xlu0 %900 }
 0x350   :  { %v946_v60 = vsub.f32 %v944_v2, %v945_v28  ;;  %v949_v17 = vadd.f32 %v948_v32, %v947_v10  ;;  %v902_v45 = vmul.f32 %v1362_v5, %v901_v31 }
 0x351   :  { %909 = vst [vmem:[#allocation13 + $0x1d] sm:$0x1] %v905_v12  ;;  %v951_v19 = vmul.f32 %v905_v12, %v1370_v11  ;;  %v954_v27 = vmul.f32 %v905_v12, %v1364_v6 }
 0x352   :  { %908 = vst [vmem:[#allocation13 + $0x15] sm:$0x1] %v902_v45  ;;  %v950_v49 = vmul.f32 %v902_v45, %v1364_v6  ;;  %v953_v46 = vmul.f32 %v902_v45, %v1370_v11  ;;  %v992_v30 = vmul.f32 %v989_v47, %v946_v60  ;;  %v993_v41 = vmul.f32 %v959_v16, %v949_v17 }
 0x353   :  { %v988_v62 = vmul.f32 %v959_v16, %v946_v60  ;;  %v983_v37 = vmul.f32 %v975_v40, %v949_v17  ;;  %v1014_v35 = vmul.f32 %v1881_v56, %v949_v17  ;;  %v1013_v29 = vmul.f32 %v1887_v51, %v946_v60 }
 0x354   :  { %v952_v33 = vsub.f32 %v950_v49, %v951_v19  ;;  %v955_v50 = vadd.f32 %v954_v27, %v953_v46  ;;  %v990_v58 = vmul.f32 %v989_v47, %v949_v17  ;;  %v994_v55 = vsub.f32 %v992_v30, %v993_v41 }
 0x355   :  { %v1011_v8 = vmul.f32 %v1887_v51, %v949_v17  ;;  %v1010_v0 = vmul.f32 %v1881_v56, %v946_v60  ;;  %v976_v44 = vmul.f32 %v975_v40, %v946_v60  ;;  %v1015_v28 = vadd.f32 %v1014_v35, %v1013_v29 }
 0x356   :  { %v964_v42 = vmul.f32 %v961_v23, %v952_v33  ;;  %v965_v39 = vmul.f32 %v959_v16, %v955_v50  ;;  %v1019_v52 = vmul.f32 %v1885_v48, %v952_v33  ;;  %v1020_v25 = vmul.f32 %v1881_v56, %v955_v50 }
 0x357   :  { %v960_v54 = vmul.f32 %v959_v16, %v952_v33  ;;  %v962_v18 = vmul.f32 %v961_v23, %v955_v50  ;;  %v1017_v21 = vmul.f32 %v1885_v48, %v955_v50  ;;  %v991_v59 = vadd.f32 %v990_v58, %v988_v62 }
 0x358   :  { %v966_v38 = vsub.f32 %v964_v42, %v965_v39  ;;  %v1021_v9 = vadd.f32 %v1020_v25, %v1019_v52  ;;  %v1005_v2 = vmul.f32 %v994_v55, %v977_v63  ;;  %v1006_v10 = vmul.f32 %v975_v40, %v955_v50 }
 0x359   :  { %v963_v3 = vadd.f32 %v962_v18, %v960_v54  ;;  %v1016_v13 = vmul.f32 %v1881_v56, %v952_v33  ;;  %v1000_v31 = vmul.f32 %v991_v59, %v977_v63  ;;  %v1001_v16 = vmul.f32 %v975_v40, %v952_v33 }
 0x35a   :  { %v984_v32 = vmul.f32 %v977_v63, %v966_v38  ;;  %v1023_v12 = vsub.f32 %v1015_v28, %v1021_v9  ;;  %v986_v17 = vmul.f32 %v980_v14, %v971_v22  ;;  %v1012_v45 = vsub.f32 %v1010_v0, %v1011_v8 }
 0x35b   :  { %v978_v51 = vmul.f32 %v977_v63, %v963_v3  ;;  %v1018_v60 = vsub.f32 %v1016_v13, %v1017_v21  ;;  %v981_v19 = vmul.f32 %v980_v14, %v1911_v24  ;;  %v1030_v49 = vstv %s1028_s15 }
 0x35c   :  { %v985_v48 = vadd.f32 %v984_v32, %v983_v37  ;;  %v1024_v27 = vmul.f32 %v1023_v12, %v980_v14  ;;  %v1007_v56 = vadd.f32 %v1006_v10, %v1005_v2  ;;  %v1002_v41 = vadd.f32 %v1001_v16, %v1000_v31 }
 0x35d   :  { %v979_v47 = vadd.f32 %v978_v51, %v976_v44  ;;  %v1029_v23 = vsub.f32 %v1012_v45, %v1018_v60  ;;  %v1032_v24 = vmul.f32 %v1938_v15, %v1891_v34  ;;  %v1003_v40 = vmul.f32 %v1915_v36, %v980_v14 }
 0x35e   :  { %v987_v46 = vadd.f32 %v986_v17, %v985_v48  ;;  %v1027_v63 = vadd.f32 %v1026_v43, %v1024_v27  ;;  %v1009_v50 = vsub.f32 %v1007_v56, %v1008_v53  ;;  %v1972_v43 = vstv %s1271_s16 }
 0x35f   :  { %v982_v30 = vsub.f32 %v979_v47, %v981_v19  ;;  %v1031_v22 = vmul.f32 %v1030_v49, %v1029_v23  ;;  %v1004_v37 = vadd.f32 %v1003_v40, %v1002_v41  ;;  %v1099_v3 = vstv %s1273_s20 }
 0x360   :  { %1037 = vrot.lane.b32.xlu1 %v987_v46, %s1330_s5  ;;  %1050 = vst [vmem:[#allocation13 + $0x26] sm:$0x1] %v1027_v63  ;;  %v1096_v33 = vmul.f32 %v1027_v63, %v1380_v20  ;;  %v2023_v44 = vstv %s2010_s19  ;;  %v1165_v28 = vstv %s1162_s21  ;;  %v1129_v13 = vstv %s1083_s22 }
 0x361   :  { %1034 = vrot.lane.b32.xlu0 %v982_v30, %s1330_s5  ;;  %v1033_v62 = vadd.f32 %v1032_v24, %v1031_v22  ;;  %v1101_v12 = vstv %s2008_s18  ;;  %v1115_v31 = vstv %s2004_s17  ;;  %v1117_v17 = vstv %s2006_s0 }
 0x362   :  { %v1097_v35 = vadd.f32 %v1096_v33, %v1392_v26  ;;  %v1170_v47 = vstv %s1168_s23 }
 0x363   :  { %1051 = vst [vmem:[#allocation13 + $0x2e] sm:$0x1] %v1033_v62  ;;  %v1980_v34 = vmul.f32 %v1033_v62, %v1380_v20 }
 0x364   :  { %1043 = vrot.lane.b32.xlu1 %v1009_v50, %s1331_s6  ;;  %v1984_v57 = vmul.f32 %v1972_v43, %v1097_v35  ;;  %v1112_v36 = vmul.f32 %v1976_v1, %v1097_v35  ;;  %v1138_v15 = vmul.f32 %v1135_v61, %v1097_v35  ;;  %v1166_v45 = vmul.f32 %v1165_v28, %v1097_v35 }
 0x365   :  { %1040 = vrot.lane.b32.xlu0 %v1004_v37, %s1331_s6  ;;  %v1989_v26 = vmul.f32 %v1976_v1, %v1980_v34  ;;  %v1113_v14 = vmul.f32 %v1972_v43, %v1980_v34  ;;  %v1994_v29 = vmul.f32 %v1135_v61, %v1980_v34 }
 0x367   :  { %v1111_v20 = vsub.f32 %v1984_v57, %v1989_v26  ;;  %v1998_v58 = vadd.f32 %v1113_v14, %v1112_v36  ;;  %v1137_v42 = vsub.f32 %v1984_v57, %v1994_v29  ;;  %v2002_v39 = vadd.f32 %v1138_v15, %v1113_v14 }
 0x369   :  { %v1143_v26 = vmul.f32 %v2002_v39, %v2023_v44 }
 0x3d2   :  { %v1038_v52 = vpop.permute.xlu1 %1037 }
 0x3d3   :  { %v1039_v55 = vmul.f32 %v1360_v4, %v1038_v52  ;;  %v1035_v25 = vpop.permute.xlu0 %1034 }
 0x3d4   :  { %v1036_v54 = vmul.f32 %v1360_v4, %v1035_v25 }
 0x3d5   :  { %1047 = vst [vmem:[#allocation13 + $0xe] sm:$0x1] %v1039_v55  ;;  %v1085_v18 = vmul.f32 %v1039_v55, %v1368_v7  ;;  %v1088_v8 = vmul.f32 %v1039_v55, %v1364_v6 }
 0x3d6   :  { %1046 = vst [vmem:[#allocation13 + $0x6] sm:$0x1] %v1036_v54  ;;  %v1084_v38 = vmul.f32 %v1036_v54, %v1364_v6  ;;  %v1087_v21 = vmul.f32 %v1036_v54, %v1368_v7  ;;  %v1044_v59 = vpop.permute.xlu1 %1043 }
 0x3d7   :  { %v1045_v0 = vmul.f32 %v1362_v5, %v1044_v59  ;;  %v1041_v9 = vpop.permute.xlu0 %1040 }
 0x3d8   :  { %v1086_v32 = vsub.f32 %v1084_v38, %v1085_v18  ;;  %v1089_v2 = vadd.f32 %v1088_v8, %v1087_v21  ;;  %v1042_v10 = vmul.f32 %v1362_v5, %v1041_v9  ;;  %v1172_v9 = vmul.f32 %v1165_v28, %v1980_v34 }
 0x3d9   :  { %1049 = vst [vmem:[#allocation13 + $0x1e] sm:$0x1] %v1045_v0  ;;  %v1091_v51 = vmul.f32 %v1045_v0, %v1370_v11  ;;  %v1094_v7 = vmul.f32 %v1045_v0, %v1364_v6  ;;  %v1148_v34 = vmul.f32 %v1137_v42, %v2023_v44 }
 0x3da   :  { %1048 = vst [vmem:[#allocation13 + $0x16] sm:$0x1] %v1042_v10  ;;  %v1090_v16 = vmul.f32 %v1042_v10, %v1364_v6  ;;  %v1093_v48 = vmul.f32 %v1042_v10, %v1370_v11  ;;  %v1150_v60 = vmul.f32 %v1972_v43, %v1086_v32  ;;  %v1132_v19 = vmul.f32 %v1129_v13, %v1086_v32 }
 0x3db   :  { %v1133_v27 = vmul.f32 %v1099_v3, %v1089_v2  ;;  %v1154_v56 = vmul.f32 %v1972_v43, %v1089_v2  ;;  %v1151_v23 = vmul.f32 %v1135_v61, %v1089_v2  ;;  %v1153_v41 = vmul.f32 %v1135_v61, %v1086_v32 }
 0x3dc   :  { %v1092_v49 = vsub.f32 %v1090_v16, %v1091_v51  ;;  %v1095_v46 = vadd.f32 %v1094_v7, %v1093_v48  ;;  %v1128_v63 = vmul.f32 %v1099_v3, %v1086_v32  ;;  %v1130_v53 = vmul.f32 %v1129_v13, %v1089_v2 }
 0x3dd   :  { %v1134_v30 = vsub.f32 %v1132_v19, %v1133_v27  ;;  %v1123_v35 = vmul.f32 %v1115_v31, %v1089_v2  ;;  %v1116_v15 = vmul.f32 %v1115_v31, %v1086_v32  ;;  %v1152_v52 = vsub.f32 %v1150_v60, %v1151_v23 }
 0x3de   :  { %v1104_v22 = vmul.f32 %v1101_v12, %v1092_v49  ;;  %v1105_v6 = vmul.f32 %v1099_v3, %v1095_v46  ;;  %v1156_v11 = vmul.f32 %v1972_v43, %v1092_v49  ;;  %v1157_v24 = vmul.f32 %v1976_v1, %v1095_v46 }
 0x3df   :  { %v1159_v40 = vmul.f32 %v1976_v1, %v1092_v49  ;;  %v1160_v33 = vmul.f32 %v1972_v43, %v1095_v46  ;;  %v1100_v50 = vmul.f32 %v1099_v3, %v1092_v49  ;;  %v1102_v62 = vmul.f32 %v1101_v12, %v1095_v46 }
 0x3e0   :  { %v1106_v37 = vsub.f32 %v1104_v22, %v1105_v6  ;;  %v1158_v36 = vsub.f32 %v1156_v11, %v1157_v24  ;;  %v1155_v55 = vadd.f32 %v1154_v56, %v1153_v41  ;;  %v1145_v54 = vmul.f32 %v1134_v30, %v1117_v17 }
 0x3e1   :  { %v1161_v14 = vadd.f32 %v1160_v33, %v1159_v40  ;;  %v1103_v61 = vadd.f32 %v1102_v62, %v1100_v50  ;;  %v1146_v18 = vmul.f32 %v1115_v31, %v1095_v46  ;;  %v1131_v8 = vadd.f32 %v1130_v53, %v1128_v63 }
 0x3e2   :  { %v1124_v25 = vmul.f32 %v1117_v17, %v1106_v37  ;;  %v1169_v59 = vsub.f32 %v1152_v52, %v1158_v36  ;;  %v1141_v1 = vmul.f32 %v1115_v31, %v1092_v49  ;;  %v1126_v43 = vmul.f32 %v2023_v44, %v1111_v20 }
 0x3e3   :  { %v1118_v38 = vmul.f32 %v1117_v17, %v1103_v61  ;;  %v1163_v21 = vsub.f32 %v1155_v55, %v1161_v14  ;;  %v1140_v3 = vmul.f32 %v1131_v8, %v1117_v17  ;;  %v1121_v2 = vmul.f32 %v2023_v44, %v1998_v58 }
 0x3e4   :  { %v1125_v0 = vadd.f32 %v1124_v25, %v1123_v35  ;;  %v1171_v13 = vmul.f32 %v1170_v47, %v1169_v59  ;;  %v1147_v7 = vadd.f32 %v1146_v18, %v1145_v54 }
 0x3e5   :  { %v1119_v32 = vadd.f32 %v1118_v38, %v1116_v15  ;;  %v1164_v10 = vmul.f32 %v1163_v21, %v2023_v44  ;;  %v1142_v48 = vadd.f32 %v1141_v1, %v1140_v3 }
 0x3e6   :  { %v1127_v51 = vadd.f32 %v1126_v43, %v1125_v0  ;;  %v1173_v16 = vadd.f32 %v1172_v9, %v1171_v13  ;;  %v1149_v20 = vsub.f32 %v1147_v7, %v1148_v34 }
 0x3e7   :  { %v1122_v12 = vsub.f32 %v1119_v32, %v1121_v2  ;;  %v1167_v31 = vadd.f32 %v1166_v45, %v1164_v10  ;;  %v1144_v58 = vadd.f32 %v1143_v26, %v1142_v48 }
 0x3e8   :  { %1177 = vrot.lane.b32.xlu1 %v1127_v51, %s1330_s5  ;;  %1191 = vst [vmem:[#allocation13 + $0x2f] sm:$0x1] %v1173_v16  ;;  %1197 = vst [vmem:[#allocation7] sm:$0x1] %v1173_v16 }
 0x3e9   :  { %1174 = vrot.lane.b32.xlu0 %v1122_v12, %s1330_s5  ;;  %1190 = vst [vmem:[#allocation13 + $0x27] sm:$0x1] %v1167_v31  ;;  %1196 = vst [vmem:[#allocation6] sm:$0x1] %v1167_v31  ;;  %s1332_s5 = smov [#allocation13]  }
 0x3ea   :  { %s1204_s24 = sshll.u32 %s1332_s5, 4  ;;  %s1205_s24 = int_to_ptr.vmem [resolvable:$true] %s1204_s24 }
 0x3eb   :  { %p1306_p6 = scmp.lt.s32.totalorder %s1205_s24, %s1205_s24 }
 0x3ec   :  { %1183 = vrot.lane.b32.xlu1 %v1149_v20, %s1331_s6 }
 0x3ed   :  { %1180 = vrot.lane.b32.xlu0 %v1144_v58, %s1331_s6  ;;  %s1301_s6 = scalar_lea.vmem %s1205_s24, 768 }
 0x3ee   :  { %p1302_p5 = scmp.ne.s32.totalorder %s1205_s24, %s1301_s6  ;;  %p1307_p7 = scmp.lt.s32.totalorder %s1301_s6, %s1301_s6 }
 0x3f0   :  { %p1308_p8 = por %p1307_p7, %p1306_p6 }
 0x3f2   :  { %p1309_p9 = pnand %p1308_p8, %p1302_p5 }
 0x45a   :  { %v1178_v28 = vpop.permute.xlu1 %1177 }
 0x45b   :  { %v1179_v17 = vmul.f32 %v1360_v4, %v1178_v28  ;;  %v1175_v57 = vpop.permute.xlu0 %1174 }
 0x45c   :  { %v1176_v29 = vmul.f32 %v1360_v4, %v1175_v57 }
 0x45d   :  { %1187 = vst [vmem:[#allocation13 + $0xf] sm:$0x1] %v1179_v17  ;;  %1193 = vst [vmem:[#allocation3] sm:$0x1] %v1179_v17 }
 0x45e   :  { %1186 = vst [vmem:[#allocation13 + $0x7] sm:$0x1] %v1176_v29  ;;  %1192 = vst [vmem:[#allocation2] sm:$0x1] %v1176_v29  ;;  %v1184_v42 = vpop.permute.xlu1 %1183 }
 0x45f   :  { %v1185_v39 = vmul.f32 %v1362_v5, %v1184_v42  ;;  %v1181_v44 = vpop.permute.xlu0 %1180 }
 0x460   :  { %v1182_v45 = vmul.f32 %v1362_v5, %v1181_v44 }
 0x461   :  { %1189 = vst [vmem:[#allocation13 + $0x1f] sm:$0x1] %v1185_v39  ;;  %1195 = vst [vmem:[#allocation5] sm:$0x1] %v1185_v39 }
 0x462   :  { %1188 = vst [vmem:[#allocation13 + $0x17] sm:$0x1] %v1182_v45  ;;  %1194 = vst [vmem:[#allocation4] sm:$0x1] %v1182_v45 }
 0x463   :  { %1312 = shalt.err (!%p1309_p9)
}
 0x464   :  { %1207 = dma.vmem_to_hbm [thread:$0]  %s1205_s24, 768, %s2067_s2, [#allocation9]  }
 0x465   :  { %1325 = dma.done.wait [#allocation9], 768  }
 0x466   :  { %1326 = vsyncadd [#allocation9], 4294966528 }
 0x467   :  { %1211 = vsyncpa [#allocation9], 1 }
 0x468   :  { %1212 = vsyncpa [#allocation10], 1 }
 0x469   :  { %1213 = vsyncpa [#allocation11], 1 }

</bundles_post_ra>
